<compile_context>
chip_gen: v6e
topology: v6e:2x2x1
jax: 0.10.0
libtpu: 0.0.40
codegen_flags: <defaults>
</compile_context>

<pallas_src>
import math

import numpy as np
import jax
import jax.numpy as jnp
from jax import lax
from jax.experimental import pallas as pl
from jax.experimental.pallas import tpu as pltpu

# ----------------------------- configuration ------------------------------
D_MODEL = 32
EXPAND = 2
D_INNER = EXPAND * D_MODEL              # 64
D_STATE = 16
D_CONV = 4
DT_RANK = math.ceil(D_MODEL / 16)       # 2
B = 2                                   # batch
L = 8                                   # sequence length
EPS = 1e-6                              # LayerNorm eps

BL = B * L                              # 16   (batch folded onto sublanes)
DI2 = 2 * D_INNER                       # 128  (fwd|bwd packed -> lane dense)
NX = DT_RANK + 2 * D_STATE              # 34   (x_proj output width per dir)

# row layout of the 128-lane parameter slab (p128)
R_INW = 0                               # rows  0..31 : in_proj weight (32,128)
R_CONVW = R_INW + D_MODEL               # rows 32..35 : conv weights   (4,128)
R_CONVB = R_CONVW + D_CONV              # row  36     : conv bias
R_DTW = R_CONVB + 1                     # rows 37..38 : dt_proj weight (2,128)
R_DTB = R_DTW + DT_RANK                 # row  39     : dt_proj bias
R_D = R_DTB + 1                         # row  40     : D skip
R_A = R_D + 1                           # rows 41..56 : A = -exp(A_log).T (16,128)
R_P128 = R_A + D_STATE                  # 57 rows total

# row layout of the 32-lane parameter slab (p32)
R_OUTW = 0                              # rows 0..63 : out_proj weight (64,32)
R_GAMMA = D_INNER                       # row 64     : LayerNorm gamma
R_BETA = D_INNER + 1                    # row 65     : LayerNorm beta
R_P32 = D_INNER + 2


def _sigmoid(x):
    # stable, single EUP op (tanh) instead of exp + full-precision divide
    return 0.5 * (jnp.tanh(0.5 * x) + 1.0)


def _softplus(x):
    return jnp.maximum(x, 0.0) + jnp.log1p(jnp.exp(-jnp.abs(x)))


# --------------------------- single fused kernel ---------------------------
def _en_bimamba_kernel(x_ref, p128_ref, xpw_ref, p32_ref, o_ref, y_scr):
    x2d = x_ref[...]                                               # (16, 32)

    # ---- unpack the packed parameter slabs (static slices of VMEM refs) ----
    in_w = p128_ref[R_INW:R_INW + D_MODEL, :]                      # (32, 128)
    conv_w = p128_ref[R_CONVW:R_CONVW + D_CONV, :]                 # (4, 128)
    conv_b = p128_ref[R_CONVB:R_CONVB + 1, :]                      # (1, 128)
    dt_w = p128_ref[R_DTW:R_DTW + DT_RANK, :]                      # (2, 128)
    dtb_row = p128_ref[R_DTB:R_DTB + 1, :]                         # (1, 128)
    D_row = p128_ref[R_D:R_D + 1, :]                               # (1, 128)
    A_p = p128_ref[R_A:R_A + D_STATE, :]                           # (16, 128)
    out_w = p32_ref[R_OUTW:R_OUTW + D_INNER, :]                    # (64, 32)
    gamma = p32_ref[R_GAMMA:R_GAMMA + 1, :]                        # (1, 32)
    beta = p32_ref[R_BETA:R_BETA + 1, :]                           # (1, 32)

    # ---- shared in_proj: (B*L, 32) @ (32, 128) -> (16, 128), one MXU pass ---
    xz = jnp.dot(x2d, in_w, preferred_element_type=jnp.float32,
                 precision=lax.Precision.DEFAULT)
    x_part = xz[:, :D_INNER]                                       # (16, 64)
    z_part = xz[:, D_INNER:]                                       # (16, 64)

    # ---- index helpers (no flip machinery: data stays forward-ordered) -----
    row_l = lax.broadcasted_iota(jnp.int32, (BL, 1), 0) % L        # within-batch t
    fwd_lane = lax.broadcasted_iota(jnp.int32, (BL, DI2), 1) < D_INNER

    # ---- packed depthwise conv + SiLU:
    #      forward lanes: causal taps x[t-s]; backward lanes: anti-causal x[t+s]
    xin = jnp.concatenate([x_part, x_part], axis=1)                # (16, 128)
    acc = jnp.broadcast_to(conv_b, (BL, DI2))
    for k in range(D_CONV):
        s = D_CONV - 1 - k
        if s == 0:
            tap = xin
        else:
            tap_c = jnp.where(row_l >= s, pltpu.roll(xin, s, 0), 0.0)
            tap_a = jnp.where(row_l <= L - 1 - s, pltpu.roll(xin, BL - s, 0), 0.0)
            tap = jnp.where(fwd_lane, tap_c, tap_a)
        acc = acc + conv_w[k:k + 1, :] * tap
    u_p = acc * _sigmoid(acc)                                      # (16, 128)

    # ---- x_proj for both directions via one block-diagonal matmul -> (16, 68)
    x_dbl = jnp.dot(u_p, xpw_ref[...], preferred_element_type=jnp.float32,
                    precision=lax.Precision.DEFAULT)
    B_f = x_dbl[:, DT_RANK:DT_RANK + D_STATE]                      # (16, 16)
    C_f = x_dbl[:, DT_RANK + D_STATE:NX]                           # (16, 16)
    B_b = x_dbl[:, NX + DT_RANK:NX + DT_RANK + D_STATE]            # (16, 16)
    C_b = x_dbl[:, NX + DT_RANK + D_STATE:]                        # (16, 16)

    # ---- dt projection (K = DT_RANK = 2) as VPU broadcast-FMAs, then softplus
    dt_f = (x_dbl[:, 0:1] * dt_w[0:1, :D_INNER]
            + x_dbl[:, 1:2] * dt_w[1:2, :D_INNER] + dtb_row[:, :D_INNER])
    dt_bw = (x_dbl[:, NX:NX + 1] * dt_w[0:1, D_INNER:]
             + x_dbl[:, NX + 1:NX + 2] * dt_w[1:2, D_INNER:] + dtb_row[:, D_INNER:])
    dt_p = _softplus(jnp.concatenate([dt_f, dt_bw], axis=1))       # (16, 128)

    # ---- scan precompute (EUP exp + B/C broadcasts, all off the serial chain)
    # TODO(synk): when A keeps its S4D integer-column init, the 32-vreg exp can
    # be replaced by running powers of exp(-dt); kept general for arbitrary A_log.
    dA = jnp.exp(dt_p[:, None, :] * A_p[None, :, :])               # (16, 16, 128)
    dtu = dt_p * u_p                                               # (16, 128)
    dBu = jnp.concatenate(
        [dtu[:, None, :D_INNER] * B_f[:, :, None],
         dtu[:, None, D_INNER:] * B_b[:, :, None]], axis=2)        # (16, 16, 128)
    C3 = jnp.concatenate(
        [jnp.broadcast_to(C_f[:, :, None], (BL, D_STATE, D_INNER)),
         jnp.broadcast_to(C_b[:, :, None], (BL, D_STATE, D_INNER))],
        axis=2)                                                    # (16, 16, 128)

    # ---- serial recurrence: L = 8 unrolled steps; both batches and both
    #      directions advance per step.  Backward lanes read their inputs and
    #      write their outputs at the un-flipped row rb = b*L + (L-1-t), so the
    #      final y scratch is forward-ordered for both directions.
    dir_mask = lax.broadcasted_iota(jnp.int32, (D_STATE, DI2), 1) < D_INNER
    h = [jnp.zeros((D_STATE, DI2), jnp.float32) for _ in range(B)]
    for t in range(L):
        for b in range(B):
            rf = b * L + t                                         # fwd-lane row
            rb = b * L + (L - 1 - t)                               # bwd-lane row
            dA_s = jnp.where(dir_mask, dA[rf], dA[rb])
            dBu_s = jnp.where(dir_mask, dBu[rf], dBu[rb])
            C_s = jnp.where(dir_mask, C3[rf], C3[rb])
            h[b] = dA_s * h[b] + dBu_s                             # (16, 128)
            y_row = jnp.sum(C_s * h[b], axis=0, keepdims=True)     # (1, 128)
            y_scr[rf:rf + 1, :] = y_row[:, :D_INNER]               # fwd y at t
            y_scr[BL + rb:BL + rb + 1, :] = y_row[:, D_INNER:]     # bwd y at L-1-t

    # ---- D*u skip, combine directions, SiLU(z) gate, out_proj ---------------
    s_f = y_scr[0:BL, :]                                           # (16, 64)
    s_b = y_scr[BL:2 * BL, :]                                      # (16, 64)
    v_f = s_f + D_row[:, :D_INNER] * u_p[:, :D_INNER]
    v_b = s_b + D_row[:, D_INNER:] * u_p[:, D_INNER:]
    y = (v_f + v_b) * (z_part * _sigmoid(z_part))                  # (16, 64)
    out_m = jnp.dot(y, out_w, preferred_element_type=jnp.float32,
                    precision=lax.Precision.DEFAULT)               # (16, 32)

    # ---- LayerNorm(out_m) + residual; single block store --------------------
    mu = jnp.mean(out_m, axis=-1, keepdims=True)
    xc = out_m - mu
    var = jnp.mean(xc * xc, axis=-1, keepdims=True)
    nrm = xc * lax.rsqrt(var + EPS)
    o_ref[...] = x2d + nrm * gamma + beta


# --------------------- one-time host-side parameter packing -----------------
def pack_params(params):
    """Pack parameters ONCE (outside the jitted hot path) into 3 dense slabs."""
    f, bwd = params["fwd"], params["bwd"]
    n = lambda a: np.asarray(a, np.float32)

    p128 = np.zeros((R_P128, DI2), np.float32)
    p128[R_INW:R_INW + D_MODEL] = n(params["in_proj_w"])
    p128[R_CONVW:R_CONVW + D_CONV] = np.concatenate(
        [n(f["conv_w"]), n(bwd["conv_w"])], axis=1)
    p128[R_CONVB] = np.concatenate([n(f["conv_b"]), n(bwd["conv_b"])])
    p128[R_DTW:R_DTW + DT_RANK] = np.concatenate(
        [n(f["dt_proj_w"]), n(bwd["dt_proj_w"])], axis=1)
    p128[R_DTB] = np.concatenate([n(f["dt_proj_b"]), n(bwd["dt_proj_b"])])
    p128[R_D] = np.concatenate([n(f["D"]), n(bwd["D"])])
    p128[R_A:R_A + D_STATE] = np.concatenate(
        [-np.exp(n(f["A_log"])).T, -np.exp(n(bwd["A_log"])).T], axis=1)

    xpw = np.zeros((DI2, 2 * NX), np.float32)                      # block-diagonal
    xpw[:D_INNER, :NX] = n(f["x_proj_w"])
    xpw[D_INNER:, NX:] = n(bwd["x_proj_w"])

    p32 = np.zeros((R_P32, D_MODEL), np.float32)
    p32[R_OUTW:R_OUTW + D_INNER] = n(params["out_proj_w"])
    p32[R_GAMMA] = n(params["ln_gamma"])
    p32[R_BETA] = n(params["ln_beta"])

    return jnp.asarray(p128), jnp.asarray(xpw), jnp.asarray(p32)


# ------------------------------ jitted wrapper ------------------------------
def en_bimamba_layer(x, packed):
    """out = x + LayerNorm(BiMamba_v2(x)); x: (B, L, D_MODEL)."""
    p128, xpw, p32 = packed
    out2d = pl.pallas_call(
        _en_bimamba_kernel,
        out_shape=jax.ShapeDtypeStruct((BL, D_MODEL), jnp.float32),
        scratch_shapes=[pltpu.VMEM((2 * BL, D_INNER), jnp.float32)],
    )(x.reshape(BL, D_MODEL), p128, xpw, p32)
    return out2d.reshape(B, L, D_MODEL)


# ----------------------- pure-JAX reference (for checking) ------------------
def _ref_branch(x_in, z_in, p):
    xp = jnp.pad(x_in, ((0, 0), (D_CONV - 1, 0), (0, 0)))
    acc = p["conv_b"][None, None, :]
    for k in range(D_CONV):
        acc = acc + p["conv_w"][k] * xp[:, k:k + L, :]
    u = acc * jax.nn.sigmoid(acc)
    x_dbl = u.reshape(BL, D_INNER) @ p["x_proj_w"]
    dtr = x_dbl[:, :DT_RANK]
    Bm = x_dbl[:, DT_RANK:DT_RANK + D_STATE].reshape(B, L, D_STATE)
    Cm = x_dbl[:, DT_RANK + D_STATE:].reshape(B, L, D_STATE)
    dt = jax.nn.softplus(
        (dtr @ p["dt_proj_w"] + p["dt_proj_b"]).reshape(B, L, D_INNER))
    A = -jnp.exp(p["A_log"])                                       # (D_INNER, D_STATE)
    dA = jnp.exp(jnp.einsum("bld,dn->bldn", dt, A))
    dBu = jnp.einsum("bld,bln->bldn", dt * u, Bm)

    def step(h, inp):
        dA_t, dBu_t, C_t = inp
        h = dA_t * h + dBu_t
        return h, jnp.einsum("bdn,bn->bd", h, C_t)

    h0 = jnp.zeros((B, D_INNER, D_STATE), jnp.float32)
    _, ys = lax.scan(step, h0, (dA.transpose(1, 0, 2, 3),
                                dBu.transpose(1, 0, 2, 3),
                                Cm.transpose(1, 0, 2)))
    y = ys.transpose(1, 0, 2) + p["D"] * u
    return y * (z_in * jax.nn.sigmoid(z_in))


def _ref_layer(x, params):
    xz = (x.reshape(BL, D_MODEL) @ params["in_proj_w"]).reshape(B, L, 2 * D_INNER)
    x_part, z_part = xz[..., :D_INNER], xz[..., D_INNER:]
    y_f = _ref_branch(x_part, z_part, params["fwd"])
    y_b = _ref_branch(jnp.flip(x_part, 1), jnp.flip(z_part, 1), params["bwd"])
    y = y_f + jnp.flip(y_b, 1)
    m = (y.reshape(BL, D_INNER) @ params["out_proj_w"]).reshape(B, L, D_MODEL)
    mu = jnp.mean(m, -1, keepdims=True)
    var = jnp.mean((m - mu) ** 2, -1, keepdims=True)
    return x + (m - mu) * lax.rsqrt(var + EPS) * params["ln_gamma"] + params["ln_beta"]


# ------------------------- deterministic parameters -----------------------
def init_params(key):
    def branch(k):
        kk = jax.random.split(k, 5)
        A_log = jnp.log(jnp.broadcast_to(
            jnp.arange(1, D_STATE + 1, dtype=jnp.float32), (D_INNER, D_STATE)))
        return dict(
            conv_w=0.1 * jax.random.normal(kk[0], (D_CONV, D_INNER), jnp.float32),
            conv_b=0.1 * jax.random.normal(kk[1], (D_INNER,), jnp.float32),
            x_proj_w=0.1 * jax.random.normal(kk[2], (D_INNER, NX), jnp.float32),
            dt_proj_w=0.5 * jax.random.normal(kk[3], (DT_RANK, D_INNER), jnp.float32),
            dt_proj_b=0.1 * jax.random.normal(kk[4], (D_INNER,), jnp.float32),
            A_log=A_log,
            D=jnp.ones((D_INNER,), jnp.float32),
        )

    ks = jax.random.split(key, 4)
    return dict(
        in_proj_w=0.1 * jax.random.normal(ks[0], (D_MODEL, 2 * D_INNER), jnp.float32),
        out_proj_w=0.1 * jax.random.normal(ks[1], (D_INNER, D_MODEL), jnp.float32),
        ln_gamma=jnp.ones((D_MODEL,), jnp.float32),
        ln_beta=jnp.zeros((D_MODEL,), jnp.float32),
        fwd=branch(ks[2]),
        bwd=branch(ks[3]),
    )


# ---------------------------------- main -----------------------------------
if __name__ == "__main__":
    key = jax.random.PRNGKey(0)
    kx, kp = jax.random.split(key)
    x = jax.random.normal(kx, (B, L, D_MODEL), dtype=jnp.float32)
    params = init_params(kp)

    # one-time host-side packing -- NOT in the per-call hot path
    packed = jax.block_until_ready(pack_params(params))

    fn = jax.jit(en_bimamba_layer)
    out = jax.block_until_ready(fn(x, packed))
    assert out.shape == (B, L, D_MODEL)
    assert bool(jnp.all(jnp.isfinite(out)))

    ref = jax.block_until_ready(jax.jit(_ref_layer)(x, params))
    err = float(jnp.max(jnp.abs(out - ref)))
    assert err < 5e-2, f"kernel vs reference mismatch: max abs err = {err}"

    print("KERNEL_OK")
</pallas_src>

<mosaic_0001>
module attributes {stable_mosaic.version = 11 : i64} {
  func.func @_en_bimamba_kernel(%arg0: memref<16x32xf32, #tpu.memory_space<vmem>>, %arg1: memref<57x128xf32, #tpu.memory_space<vmem>>, %arg2: memref<128x68xf32, #tpu.memory_space<vmem>>, %arg3: memref<66x32xf32, #tpu.memory_space<vmem>>, %arg4: memref<16x32xf32, #tpu.memory_space<vmem>>, %arg5: memref<32x64xf32, #tpu.memory_space<vmem>>) attributes {dimension_semantics = [], scalar_prefetch = 0 : i64, scratch_operands = 1 : i64, tpu.core_type = #tpu.core_type<tc>} {
    %c0 = arith.constant 0 : index
    %c0_0 = arith.constant 0 : index
    %0 = vector.load %arg0[%c0, %c0_0] : memref<16x32xf32, #tpu.memory_space<vmem>>, vector<16x32xf32>
    %c0_1 = arith.constant 0 : index
    %c0_2 = arith.constant 0 : index
    %1 = vector.load %arg1[%c0_1, %c0_2] : memref<57x128xf32, #tpu.memory_space<vmem>>, vector<32x128xf32>
    %c32 = arith.constant 32 : index
    %c0_3 = arith.constant 0 : index
    %2 = vector.load %arg1[%c32, %c0_3] : memref<57x128xf32, #tpu.memory_space<vmem>>, vector<4x128xf32>
    %c36 = arith.constant 36 : index
    %c0_4 = arith.constant 0 : index
    %3 = vector.load %arg1[%c36, %c0_4] : memref<57x128xf32, #tpu.memory_space<vmem>>, vector<1x128xf32>
    %c37 = arith.constant 37 : index
    %c0_5 = arith.constant 0 : index
    %4 = vector.load %arg1[%c37, %c0_5] : memref<57x128xf32, #tpu.memory_space<vmem>>, vector<2x128xf32>
    %c39 = arith.constant 39 : index
    %c0_6 = arith.constant 0 : index
    %5 = vector.load %arg1[%c39, %c0_6] : memref<57x128xf32, #tpu.memory_space<vmem>>, vector<1x128xf32>
    %c40 = arith.constant 40 : index
    %c0_7 = arith.constant 0 : index
    %6 = vector.load %arg1[%c40, %c0_7] : memref<57x128xf32, #tpu.memory_space<vmem>>, vector<1x128xf32>
    %c41 = arith.constant 41 : index
    %c0_8 = arith.constant 0 : index
    %7 = vector.load %arg1[%c41, %c0_8] : memref<57x128xf32, #tpu.memory_space<vmem>>, vector<16x128xf32>
    %c0_9 = arith.constant 0 : index
    %c0_10 = arith.constant 0 : index
    %8 = vector.load %arg3[%c0_9, %c0_10] : memref<66x32xf32, #tpu.memory_space<vmem>>, vector<64x32xf32>
    %c64 = arith.constant 64 : index
    %c0_11 = arith.constant 0 : index
    %9 = vector.load %arg3[%c64, %c0_11] : memref<66x32xf32, #tpu.memory_space<vmem>>, vector<1x32xf32>
    %c65 = arith.constant 65 : index
    %c0_12 = arith.constant 0 : index
    %10 = vector.load %arg3[%c65, %c0_12] : memref<66x32xf32, #tpu.memory_space<vmem>>, vector<1x32xf32>
    %cst = arith.constant dense<0.000000e+00> : vector<16x128xf32>
    %11 = tpu.matmul %0, %1, %cst {dimension_numbers = #tpu.dot_dimension_numbers<[1], [0], [0], [1], [0, 0, 1, 1], [], []>} : vector<16x32xf32>, vector<32x128xf32>, vector<16x128xf32> -> vector<16x128xf32>
    %12 = vector.extract_strided_slice %11 {offsets = [0, 0], sizes = [16, 64], strides = [1, 1]} : vector<16x128xf32> to vector<16x64xf32>
    %13 = vector.extract_strided_slice %11 {offsets = [0, 64], sizes = [16, 64], strides = [1, 1]} : vector<16x128xf32> to vector<16x64xf32>
    %14 = tpu.iota {dimensions = array<i32: 0>} : vector<16x1xi32>
    %c8_i32 = arith.constant 8 : i32
    %c0_i32 = arith.constant 0 : i32
    %15 = arith.cmpi eq, %c8_i32, %c0_i32 : i32
    %c1_i32 = arith.constant 1 : i32
    %16 = arith.select %15, %c1_i32, %c8_i32 : i32
    %17 = vector.broadcast %16 : i32 to vector<16x1xi32>
    %18 = arith.remsi %14, %17 : vector<16x1xi32>
    %c0_i32_13 = arith.constant 0 : i32
    %19 = vector.broadcast %c0_i32_13 : i32 to vector<16x1xi32>
    %20 = arith.cmpi ne, %18, %19 : vector<16x1xi32>
    %c0_i32_14 = arith.constant 0 : i32
    %21 = vector.broadcast %c0_i32_14 : i32 to vector<16x1xi32>
    %22 = arith.cmpi slt, %18, %21 : vector<16x1xi32>
    %c0_i32_15 = arith.constant 0 : i32
    %23 = arith.cmpi slt, %16, %c0_i32_15 : i32
    %24 = vector.broadcast %23 : i1 to vector<16x1xi1>
    %25 = vector.broadcast %24 : vector<16x1xi1> to vector<16x1xi1>
    %26 = arith.xori %22, %25 : vector<16x1xi1>
    %27 = arith.andi %26, %20 : vector<16x1xi1>
    %28 = vector.broadcast %16 : i32 to vector<16x1xi32>
    %29 = arith.addi %18, %28 : vector<16x1xi32>
    %30 = arith.select %27, %29, %18 : vector<16x1xi1>, vector<16x1xi32>
    %31 = tpu.iota {dimensions = array<i32: 1>} : vector<16x128xi32>
    %c64_i32 = arith.constant 64 : i32
    %32 = vector.broadcast %c64_i32 : i32 to vector<16x128xi32>
    %33 = arith.cmpi slt, %31, %32 : vector<16x128xi32>
    %34 = tpu.concatenate %12, %12 in 1 : vector<16x64xf32>, vector<16x64xf32> -> vector<16x128xf32>
    %35 = vector.shape_cast %3 : vector<1x128xf32> to vector<1x128xf32>
    %36 = vector.broadcast %35 : vector<1x128xf32> to vector<16x128xf32>
    %c3_i32 = arith.constant 3 : i32
    %37 = vector.broadcast %c3_i32 : i32 to vector<16x1xi32>
    %38 = arith.cmpi sge, %30, %37 : vector<16x1xi32>
    %c3_i32_16 = arith.constant 3 : i32
    %39 = tpu.dynamic_rotate %34 by %c3_i32_16 dim 0 : vector<16x128xf32>, i32 -> vector<16x128xf32>
    %cst_17 = arith.constant 0.000000e+00 : f32
    %40 = vector.shape_cast %38 : vector<16x1xi1> to vector<16x1xi1>
    %41 = vector.broadcast %40 : vector<16x1xi1> to vector<16x128xi1>
    %42 = vector.broadcast %cst_17 : f32 to vector<16x128xf32>
    %43 = arith.select %41, %39, %42 : vector<16x128xi1>, vector<16x128xf32>
    %c4_i32 = arith.constant 4 : i32
    %44 = vector.broadcast %c4_i32 : i32 to vector<16x1xi32>
    %45 = arith.cmpi sle, %30, %44 : vector<16x1xi32>
    %c13_i32 = arith.constant 13 : i32
    %46 = tpu.dynamic_rotate %34 by %c13_i32 dim 0 : vector<16x128xf32>, i32 -> vector<16x128xf32>
    %cst_18 = arith.constant 0.000000e+00 : f32
    %47 = vector.shape_cast %45 : vector<16x1xi1> to vector<16x1xi1>
    %48 = vector.broadcast %47 : vector<16x1xi1> to vector<16x128xi1>
    %49 = vector.broadcast %cst_18 : f32 to vector<16x128xf32>
    %50 = arith.select %48, %46, %49 : vector<16x128xi1>, vector<16x128xf32>
    %51 = arith.select %33, %43, %50 : vector<16x128xi1>, vector<16x128xf32>
    %52 = vector.extract_strided_slice %2 {offsets = [0, 0], sizes = [1, 128], strides = [1, 1]} : vector<4x128xf32> to vector<1x128xf32>
    %53 = vector.broadcast %52 : vector<1x128xf32> to vector<16x128xf32>
    %54 = arith.mulf %53, %51 : vector<16x128xf32>
    %55 = arith.addf %36, %54 : vector<16x128xf32>
    %c2_i32 = arith.constant 2 : i32
    %56 = vector.broadcast %c2_i32 : i32 to vector<16x1xi32>
    %57 = arith.cmpi sge, %30, %56 : vector<16x1xi32>
    %c2_i32_19 = arith.constant 2 : i32
    %58 = tpu.dynamic_rotate %34 by %c2_i32_19 dim 0 : vector<16x128xf32>, i32 -> vector<16x128xf32>
    %cst_20 = arith.constant 0.000000e+00 : f32
    %59 = vector.shape_cast %57 : vector<16x1xi1> to vector<16x1xi1>
    %60 = vector.broadcast %59 : vector<16x1xi1> to vector<16x128xi1>
    %61 = vector.broadcast %cst_20 : f32 to vector<16x128xf32>
    %62 = arith.select %60, %58, %61 : vector<16x128xi1>, vector<16x128xf32>
    %c5_i32 = arith.constant 5 : i32
    %63 = vector.broadcast %c5_i32 : i32 to vector<16x1xi32>
    %64 = arith.cmpi sle, %30, %63 : vector<16x1xi32>
    %c14_i32 = arith.constant 14 : i32
    %65 = tpu.dynamic_rotate %34 by %c14_i32 dim 0 : vector<16x128xf32>, i32 -> vector<16x128xf32>
    %cst_21 = arith.constant 0.000000e+00 : f32
    %66 = vector.shape_cast %64 : vector<16x1xi1> to vector<16x1xi1>
    %67 = vector.broadcast %66 : vector<16x1xi1> to vector<16x128xi1>
    %68 = vector.broadcast %cst_21 : f32 to vector<16x128xf32>
    %69 = arith.select %67, %65, %68 : vector<16x128xi1>, vector<16x128xf32>
    %70 = arith.select %33, %62, %69 : vector<16x128xi1>, vector<16x128xf32>
    %71 = vector.extract_strided_slice %2 {offsets = [1, 0], sizes = [1, 128], strides = [1, 1]} : vector<4x128xf32> to vector<1x128xf32>
    %72 = vector.broadcast %71 : vector<1x128xf32> to vector<16x128xf32>
    %73 = arith.mulf %72, %70 : vector<16x128xf32>
    %74 = arith.addf %55, %73 : vector<16x128xf32>
    %c1_i32_22 = arith.constant 1 : i32
    %75 = vector.broadcast %c1_i32_22 : i32 to vector<16x1xi32>
    %76 = arith.cmpi sge, %30, %75 : vector<16x1xi32>
    %c1_i32_23 = arith.constant 1 : i32
    %77 = tpu.dynamic_rotate %34 by %c1_i32_23 dim 0 : vector<16x128xf32>, i32 -> vector<16x128xf32>
    %cst_24 = arith.constant 0.000000e+00 : f32
    %78 = vector.shape_cast %76 : vector<16x1xi1> to vector<16x1xi1>
    %79 = vector.broadcast %78 : vector<16x1xi1> to vector<16x128xi1>
    %80 = vector.broadcast %cst_24 : f32 to vector<16x128xf32>
    %81 = arith.select %79, %77, %80 : vector<16x128xi1>, vector<16x128xf32>
    %c6_i32 = arith.constant 6 : i32
    %82 = vector.broadcast %c6_i32 : i32 to vector<16x1xi32>
    %83 = arith.cmpi sle, %30, %82 : vector<16x1xi32>
    %c15_i32 = arith.constant 15 : i32
    %84 = tpu.dynamic_rotate %34 by %c15_i32 dim 0 : vector<16x128xf32>, i32 -> vector<16x128xf32>
    %cst_25 = arith.constant 0.000000e+00 : f32
    %85 = vector.shape_cast %83 : vector<16x1xi1> to vector<16x1xi1>
    %86 = vector.broadcast %85 : vector<16x1xi1> to vector<16x128xi1>
    %87 = vector.broadcast %cst_25 : f32 to vector<16x128xf32>
    %88 = arith.select %86, %84, %87 : vector<16x128xi1>, vector<16x128xf32>
    %89 = arith.select %33, %81, %88 : vector<16x128xi1>, vector<16x128xf32>
    %90 = vector.extract_strided_slice %2 {offsets = [2, 0], sizes = [1, 128], strides = [1, 1]} : vector<4x128xf32> to vector<1x128xf32>
    %91 = vector.broadcast %90 : vector<1x128xf32> to vector<16x128xf32>
    %92 = arith.mulf %91, %89 : vector<16x128xf32>
    %93 = arith.addf %74, %92 : vector<16x128xf32>
    %94 = vector.extract_strided_slice %2 {offsets = [3, 0], sizes = [1, 128], strides = [1, 1]} : vector<4x128xf32> to vector<1x128xf32>
    %95 = vector.broadcast %94 : vector<1x128xf32> to vector<16x128xf32>
    %96 = arith.mulf %95, %34 : vector<16x128xf32>
    %97 = arith.addf %93, %96 : vector<16x128xf32>
    %cst_26 = arith.constant 5.000000e-01 : f32
    %98 = vector.broadcast %cst_26 : f32 to vector<16x128xf32>
    %99 = arith.mulf %98, %97 : vector<16x128xf32>
    %100 = math.tanh %99 : vector<16x128xf32>
    %cst_27 = arith.constant 1.000000e+00 : f32
    %101 = vector.broadcast %cst_27 : f32 to vector<16x128xf32>
    %102 = arith.addf %100, %101 : vector<16x128xf32>
    %cst_28 = arith.constant 5.000000e-01 : f32
    %103 = vector.broadcast %cst_28 : f32 to vector<16x128xf32>
    %104 = arith.mulf %103, %102 : vector<16x128xf32>
    %105 = arith.mulf %97, %104 : vector<16x128xf32>
    %c0_29 = arith.constant 0 : index
    %c0_30 = arith.constant 0 : index
    %106 = vector.load %arg2[%c0_29, %c0_30] : memref<128x68xf32, #tpu.memory_space<vmem>>, vector<128x68xf32>
    %cst_31 = arith.constant dense<0.000000e+00> : vector<16x68xf32>
    %107 = tpu.matmul %105, %106, %cst_31 {dimension_numbers = #tpu.dot_dimension_numbers<[1], [0], [0], [1], [0, 0, 1, 1], [], []>} : vector<16x128xf32>, vector<128x68xf32>, vector<16x68xf32> -> vector<16x68xf32>
    %108 = vector.extract_strided_slice %107 {offsets = [0, 2], sizes = [16, 16], strides = [1, 1]} : vector<16x68xf32> to vector<16x16xf32>
    %109 = vector.extract_strided_slice %107 {offsets = [0, 18], sizes = [16, 16], strides = [1, 1]} : vector<16x68xf32> to vector<16x16xf32>
    %110 = vector.extract_strided_slice %107 {offsets = [0, 36], sizes = [16, 16], strides = [1, 1]} : vector<16x68xf32> to vector<16x16xf32>
    %111 = vector.extract_strided_slice %107 {offsets = [0, 52], sizes = [16, 16], strides = [1, 1]} : vector<16x68xf32> to vector<16x16xf32>
    %112 = vector.extract_strided_slice %107 {offsets = [0, 0], sizes = [16, 1], strides = [1, 1]} : vector<16x68xf32> to vector<16x1xf32>
    %113 = vector.extract_strided_slice %4 {offsets = [0, 0], sizes = [1, 64], strides = [1, 1]} : vector<2x128xf32> to vector<1x64xf32>
    %114 = vector.broadcast %112 : vector<16x1xf32> to vector<16x64xf32>
    %115 = vector.broadcast %113 : vector<1x64xf32> to vector<16x64xf32>
    %116 = arith.mulf %114, %115 : vector<16x64xf32>
    %117 = vector.extract_strided_slice %107 {offsets = [0, 1], sizes = [16, 1], strides = [1, 1]} : vector<16x68xf32> to vector<16x1xf32>
    %118 = vector.extract_strided_slice %4 {offsets = [1, 0], sizes = [1, 64], strides = [1, 1]} : vector<2x128xf32> to vector<1x64xf32>
    %119 = vector.broadcast %117 : vector<16x1xf32> to vector<16x64xf32>
    %120 = vector.broadcast %118 : vector<1x64xf32> to vector<16x64xf32>
    %121 = arith.mulf %119, %120 : vector<16x64xf32>
    %122 = arith.addf %116, %121 : vector<16x64xf32>
    %123 = vector.extract_strided_slice %5 {offsets = [0, 0], sizes = [1, 64], strides = [1, 1]} : vector<1x128xf32> to vector<1x64xf32>
    %124 = vector.broadcast %123 : vector<1x64xf32> to vector<16x64xf32>
    %125 = arith.addf %122, %124 : vector<16x64xf32>
    %126 = vector.extract_strided_slice %107 {offsets = [0, 34], sizes = [16, 1], strides = [1, 1]} : vector<16x68xf32> to vector<16x1xf32>
    %127 = vector.extract_strided_slice %4 {offsets = [0, 64], sizes = [1, 64], strides = [1, 1]} : vector<2x128xf32> to vector<1x64xf32>
    %128 = vector.broadcast %126 : vector<16x1xf32> to vector<16x64xf32>
    %129 = vector.broadcast %127 : vector<1x64xf32> to vector<16x64xf32>
    %130 = arith.mulf %128, %129 : vector<16x64xf32>
    %131 = vector.extract_strided_slice %107 {offsets = [0, 35], sizes = [16, 1], strides = [1, 1]} : vector<16x68xf32> to vector<16x1xf32>
    %132 = vector.extract_strided_slice %4 {offsets = [1, 64], sizes = [1, 64], strides = [1, 1]} : vector<2x128xf32> to vector<1x64xf32>
    %133 = vector.broadcast %131 : vector<16x1xf32> to vector<16x64xf32>
    %134 = vector.broadcast %132 : vector<1x64xf32> to vector<16x64xf32>
    %135 = arith.mulf %133, %134 : vector<16x64xf32>
    %136 = arith.addf %130, %135 : vector<16x64xf32>
    %137 = vector.extract_strided_slice %5 {offsets = [0, 64], sizes = [1, 64], strides = [1, 1]} : vector<1x128xf32> to vector<1x64xf32>
    %138 = vector.broadcast %137 : vector<1x64xf32> to vector<16x64xf32>
    %139 = arith.addf %136, %138 : vector<16x64xf32>
    %140 = tpu.concatenate %125, %139 in 1 : vector<16x64xf32>, vector<16x64xf32> -> vector<16x128xf32>
    %cst_32 = arith.constant 0.000000e+00 : f32
    %141 = vector.broadcast %cst_32 : f32 to vector<16x128xf32>
    %142 = arith.maximumf %140, %141 : vector<16x128xf32>
    %143 = math.absf %140 : vector<16x128xf32>
    %cst_33 = arith.constant 0.000000e+00 : f32
    %144 = vector.broadcast %cst_33 : f32 to vector<16x128xf32>
    %145 = arith.subf %144, %143 : vector<16x128xf32>
    %146 = math.exp %145 : vector<16x128xf32>
    %147 = math.log1p %146 : vector<16x128xf32>
    %148 = arith.addf %142, %147 : vector<16x128xf32>
    %149 = vector.shape_cast %148 : vector<16x128xf32> to vector<16x1x128xf32>
    %150 = vector.shape_cast %7 : vector<16x128xf32> to vector<1x16x128xf32>
    %151 = vector.broadcast %149 : vector<16x1x128xf32> to vector<16x16x128xf32>
    %152 = vector.broadcast %150 : vector<1x16x128xf32> to vector<16x16x128xf32>
    %153 = arith.mulf %151, %152 : vector<16x16x128xf32>
    %154 = math.exp %153 : vector<16x16x128xf32>
    %155 = arith.mulf %148, %105 : vector<16x128xf32>
    %156 = vector.extract_strided_slice %155 {offsets = [0, 0], sizes = [16, 64], strides = [1, 1]} : vector<16x128xf32> to vector<16x64xf32>
    %157 = vector.shape_cast %156 : vector<16x64xf32> to vector<16x1x64xf32>
    %158 = vector.shape_cast %108 : vector<16x16xf32> to vector<16x16x1xf32>
    %159 = vector.broadcast %157 : vector<16x1x64xf32> to vector<16x16x64xf32>
    %160 = vector.broadcast %158 : vector<16x16x1xf32> to vector<16x16x64xf32>
    %161 = arith.mulf %159, %160 : vector<16x16x64xf32>
    %162 = vector.extract_strided_slice %155 {offsets = [0, 64], sizes = [16, 64], strides = [1, 1]} : vector<16x128xf32> to vector<16x64xf32>
    %163 = vector.shape_cast %162 : vector<16x64xf32> to vector<16x1x64xf32>
    %164 = vector.shape_cast %110 : vector<16x16xf32> to vector<16x16x1xf32>
    %165 = vector.broadcast %163 : vector<16x1x64xf32> to vector<16x16x64xf32>
    %166 = vector.broadcast %164 : vector<16x16x1xf32> to vector<16x16x64xf32>
    %167 = arith.mulf %165, %166 : vector<16x16x64xf32>
    %168 = tpu.concatenate %161, %167 in 2 : vector<16x16x64xf32>, vector<16x16x64xf32> -> vector<16x16x128xf32>
    %169 = vector.shape_cast %109 : vector<16x16xf32> to vector<16x16x1xf32>
    %170 = vector.shape_cast %169 : vector<16x16x1xf32> to vector<16x16x1xf32>
    %171 = vector.broadcast %170 : vector<16x16x1xf32> to vector<16x16x64xf32>
    %172 = vector.shape_cast %111 : vector<16x16xf32> to vector<16x16x1xf32>
    %173 = vector.shape_cast %172 : vector<16x16x1xf32> to vector<16x16x1xf32>
    %174 = vector.broadcast %173 : vector<16x16x1xf32> to vector<16x16x64xf32>
    %175 = tpu.concatenate %171, %174 in 2 : vector<16x16x64xf32>, vector<16x16x64xf32> -> vector<16x16x128xf32>
    %176 = tpu.iota {dimensions = array<i32: 1>} : vector<16x128xi32>
    %c64_i32_34 = arith.constant 64 : i32
    %177 = vector.broadcast %c64_i32_34 : i32 to vector<16x128xi32>
    %178 = arith.cmpi slt, %176, %177 : vector<16x128xi32>
    %cst_35 = arith.constant 0.000000e+00 : f32
    %179 = vector.broadcast %cst_35 : f32 to vector<16x128xf32>
    %cst_36 = arith.constant 0.000000e+00 : f32
    %180 = vector.broadcast %cst_36 : f32 to vector<16x128xf32>
    %181 = vector.extract_strided_slice %154 {offsets = [0, 0, 0], sizes = [1, 16, 128], strides = [1, 1, 1]} : vector<16x16x128xf32> to vector<1x16x128xf32>
    %182 = vector.shape_cast %181 : vector<1x16x128xf32> to vector<16x128xf32>
    %183 = vector.extract_strided_slice %154 {offsets = [7, 0, 0], sizes = [1, 16, 128], strides = [1, 1, 1]} : vector<16x16x128xf32> to vector<1x16x128xf32>
    %184 = vector.shape_cast %183 : vector<1x16x128xf32> to vector<16x128xf32>
    %185 = arith.select %178, %182, %184 : vector<16x128xi1>, vector<16x128xf32>
    %186 = vector.extract_strided_slice %168 {offsets = [0, 0, 0], sizes = [1, 16, 128], strides = [1, 1, 1]} : vector<16x16x128xf32> to vector<1x16x128xf32>
    %187 = vector.shape_cast %186 : vector<1x16x128xf32> to vector<16x128xf32>
    %188 = vector.extract_strided_slice %168 {offsets = [7, 0, 0], sizes = [1, 16, 128], strides = [1, 1, 1]} : vector<16x16x128xf32> to vector<1x16x128xf32>
    %189 = vector.shape_cast %188 : vector<1x16x128xf32> to vector<16x128xf32>
    %190 = arith.select %178, %187, %189 : vector<16x128xi1>, vector<16x128xf32>
    %191 = vector.extract_strided_slice %175 {offsets = [0, 0, 0], sizes = [1, 16, 128], strides = [1, 1, 1]} : vector<16x16x128xf32> to vector<1x16x128xf32>
    %192 = vector.shape_cast %191 : vector<1x16x128xf32> to vector<16x128xf32>
    %193 = vector.extract_strided_slice %175 {offsets = [7, 0, 0], sizes = [1, 16, 128], strides = [1, 1, 1]} : vector<16x16x128xf32> to vector<1x16x128xf32>
    %194 = vector.shape_cast %193 : vector<1x16x128xf32> to vector<16x128xf32>
    %195 = arith.select %178, %192, %194 : vector<16x128xi1>, vector<16x128xf32>
    %196 = arith.mulf %185, %179 : vector<16x128xf32>
    %197 = arith.addf %196, %190 : vector<16x128xf32>
    %198 = arith.mulf %195, %197 : vector<16x128xf32>
    %cst_37 = arith.constant dense<0.000000e+00> : vector<128xf32>
    %199 = vector.multi_reduction <add>, %198, %cst_37 [0] : vector<16x128xf32> to vector<128xf32>
    %200 = vector.shape_cast %199 : vector<128xf32> to vector<1x128xf32>
    %201 = vector.extract_strided_slice %200 {offsets = [0, 0], sizes = [1, 64], strides = [1, 1]} : vector<1x128xf32> to vector<1x64xf32>
    %c0_38 = arith.constant 0 : index
    %c0_39 = arith.constant 0 : index
    %202 = vector.load %arg5[%c0_38, %c0_39] : memref<32x64xf32, #tpu.memory_space<vmem>>, vector<1x64xf32>
    tpu.vector_store %arg5[%c0_38, %c0_39], %201 {strides = array<i32>} : memref<32x64xf32, #tpu.memory_space<vmem>>, vector<1x64xf32>,
    %203 = vector.extract_strided_slice %200 {offsets = [0, 64], sizes = [1, 64], strides = [1, 1]} : vector<1x128xf32> to vector<1x64xf32>
    %c23 = arith.constant 23 : index
    %c0_40 = arith.constant 0 : index
    %204 = vector.load %arg5[%c23, %c0_40] : memref<32x64xf32, #tpu.memory_space<vmem>>, vector<1x64xf32>
    tpu.vector_store %arg5[%c23, %c0_40], %203 {strides = array<i32>} : memref<32x64xf32, #tpu.memory_space<vmem>>, vector<1x64xf32>,
    %205 = vector.extract_strided_slice %154 {offsets = [8, 0, 0], sizes = [1, 16, 128], strides = [1, 1, 1]} : vector<16x16x128xf32> to vector<1x16x128xf32>
    %206 = vector.shape_cast %205 : vector<1x16x128xf32> to vector<16x128xf32>
    %207 = vector.extract_strided_slice %154 {offsets = [15, 0, 0], sizes = [1, 16, 128], strides = [1, 1, 1]} : vector<16x16x128xf32> to vector<1x16x128xf32>
    %208 = vector.shape_cast %207 : vector<1x16x128xf32> to vector<16x128xf32>
    %209 = arith.select %178, %206, %208 : vector<16x128xi1>, vector<16x128xf32>
    %210 = vector.extract_strided_slice %168 {offsets = [8, 0, 0], sizes = [1, 16, 128], strides = [1, 1, 1]} : vector<16x16x128xf32> to vector<1x16x128xf32>
    %211 = vector.shape_cast %210 : vector<1x16x128xf32> to vector<16x128xf32>
    %212 = vector.extract_strided_slice %168 {offsets = [15, 0, 0], sizes = [1, 16, 128], strides = [1, 1, 1]} : vector<16x16x128xf32> to vector<1x16x128xf32>
    %213 = vector.shape_cast %212 : vector<1x16x128xf32> to vector<16x128xf32>
    %214 = arith.select %178, %211, %213 : vector<16x128xi1>, vector<16x128xf32>
    %215 = vector.extract_strided_slice %175 {offsets = [8, 0, 0], sizes = [1, 16, 128], strides = [1, 1, 1]} : vector<16x16x128xf32> to vector<1x16x128xf32>
    %216 = vector.shape_cast %215 : vector<1x16x128xf32> to vector<16x128xf32>
    %217 = vector.extract_strided_slice %175 {offsets = [15, 0, 0], sizes = [1, 16, 128], strides = [1, 1, 1]} : vector<16x16x128xf32> to vector<1x16x128xf32>
    %218 = vector.shape_cast %217 : vector<1x16x128xf32> to vector<16x128xf32>
    %219 = arith.select %178, %216, %218 : vector<16x128xi1>, vector<16x128xf32>
    %220 = arith.mulf %209, %180 : vector<16x128xf32>
    %221 = arith.addf %220, %214 : vector<16x128xf32>
    %222 = arith.mulf %219, %221 : vector<16x128xf32>
    %cst_41 = arith.constant dense<0.000000e+00> : vector<128xf32>
    %223 = vector.multi_reduction <add>, %222, %cst_41 [0] : vector<16x128xf32> to vector<128xf32>
    %224 = vector.shape_cast %223 : vector<128xf32> to vector<1x128xf32>
    %225 = vector.extract_strided_slice %224 {offsets = [0, 0], sizes = [1, 64], strides = [1, 1]} : vector<1x128xf32> to vector<1x64xf32>
    %c8 = arith.constant 8 : index
    %c0_42 = arith.constant 0 : index
    %226 = vector.load %arg5[%c8, %c0_42] : memref<32x64xf32, #tpu.memory_space<vmem>>, vector<1x64xf32>
    tpu.vector_store %arg5[%c8, %c0_42], %225 {strides = array<i32>} : memref<32x64xf32, #tpu.memory_space<vmem>>, vector<1x64xf32>,
    %227 = vector.extract_strided_slice %224 {offsets = [0, 64], sizes = [1, 64], strides = [1, 1]} : vector<1x128xf32> to vector<1x64xf32>
    %c31 = arith.constant 31 : index
    %c0_43 = arith.constant 0 : index
    %228 = vector.load %arg5[%c31, %c0_43] : memref<32x64xf32, #tpu.memory_space<vmem>>, vector<1x64xf32>
    tpu.vector_store %arg5[%c31, %c0_43], %227 {strides = array<i32>} : memref<32x64xf32, #tpu.memory_space<vmem>>, vector<1x64xf32>,
    %229 = vector.extract_strided_slice %154 {offsets = [1, 0, 0], sizes = [1, 16, 128], strides = [1, 1, 1]} : vector<16x16x128xf32> to vector<1x16x128xf32>
    %230 = vector.shape_cast %229 : vector<1x16x128xf32> to vector<16x128xf32>
    %231 = vector.extract_strided_slice %154 {offsets = [6, 0, 0], sizes = [1, 16, 128], strides = [1, 1, 1]} : vector<16x16x128xf32> to vector<1x16x128xf32>
    %232 = vector.shape_cast %231 : vector<1x16x128xf32> to vector<16x128xf32>
    %233 = arith.select %178, %230, %232 : vector<16x128xi1>, vector<16x128xf32>
    %234 = vector.extract_strided_slice %168 {offsets = [1, 0, 0], sizes = [1, 16, 128], strides = [1, 1, 1]} : vector<16x16x128xf32> to vector<1x16x128xf32>
    %235 = vector.shape_cast %234 : vector<1x16x128xf32> to vector<16x128xf32>
    %236 = vector.extract_strided_slice %168 {offsets = [6, 0, 0], sizes = [1, 16, 128], strides = [1, 1, 1]} : vector<16x16x128xf32> to vector<1x16x128xf32>
    %237 = vector.shape_cast %236 : vector<1x16x128xf32> to vector<16x128xf32>
    %238 = arith.select %178, %235, %237 : vector<16x128xi1>, vector<16x128xf32>
    %239 = vector.extract_strided_slice %175 {offsets = [1, 0, 0], sizes = [1, 16, 128], strides = [1, 1, 1]} : vector<16x16x128xf32> to vector<1x16x128xf32>
    %240 = vector.shape_cast %239 : vector<1x16x128xf32> to vector<16x128xf32>
    %241 = vector.extract_strided_slice %175 {offsets = [6, 0, 0], sizes = [1, 16, 128], strides = [1, 1, 1]} : vector<16x16x128xf32> to vector<1x16x128xf32>
    %242 = vector.shape_cast %241 : vector<1x16x128xf32> to vector<16x128xf32>
    %243 = arith.select %178, %240, %242 : vector<16x128xi1>, vector<16x128xf32>
    %244 = arith.mulf %233, %197 : vector<16x128xf32>
    %245 = arith.addf %244, %238 : vector<16x128xf32>
    %246 = arith.mulf %243, %245 : vector<16x128xf32>
    %cst_44 = arith.constant dense<0.000000e+00> : vector<128xf32>
    %247 = vector.multi_reduction <add>, %246, %cst_44 [0] : vector<16x128xf32> to vector<128xf32>
    %248 = vector.shape_cast %247 : vector<128xf32> to vector<1x128xf32>
    %249 = vector.extract_strided_slice %248 {offsets = [0, 0], sizes = [1, 64], strides = [1, 1]} : vector<1x128xf32> to vector<1x64xf32>
    %c1 = arith.constant 1 : index
    %c0_45 = arith.constant 0 : index
    %250 = vector.load %arg5[%c1, %c0_45] : memref<32x64xf32, #tpu.memory_space<vmem>>, vector<1x64xf32>
    tpu.vector_store %arg5[%c1, %c0_45], %249 {strides = array<i32>} : memref<32x64xf32, #tpu.memory_space<vmem>>, vector<1x64xf32>,
    %251 = vector.extract_strided_slice %248 {offsets = [0, 64], sizes = [1, 64], strides = [1, 1]} : vector<1x128xf32> to vector<1x64xf32>
    %c22 = arith.constant 22 : index
    %c0_46 = arith.constant 0 : index
    %252 = vector.load %arg5[%c22, %c0_46] : memref<32x64xf32, #tpu.memory_space<vmem>>, vector<1x64xf32>
    tpu.vector_store %arg5[%c22, %c0_46], %251 {strides = array<i32>} : memref<32x64xf32, #tpu.memory_space<vmem>>, vector<1x64xf32>,
    %253 = vector.extract_strided_slice %154 {offsets = [9, 0, 0], sizes = [1, 16, 128], strides = [1, 1, 1]} : vector<16x16x128xf32> to vector<1x16x128xf32>
    %254 = vector.shape_cast %253 : vector<1x16x128xf32> to vector<16x128xf32>
    %255 = vector.extract_strided_slice %154 {offsets = [14, 0, 0], sizes = [1, 16, 128], strides = [1, 1, 1]} : vector<16x16x128xf32> to vector<1x16x128xf32>
    %256 = vector.shape_cast %255 : vector<1x16x128xf32> to vector<16x128xf32>
    %257 = arith.select %178, %254, %256 : vector<16x128xi1>, vector<16x128xf32>
    %258 = vector.extract_strided_slice %168 {offsets = [9, 0, 0], sizes = [1, 16, 128], strides = [1, 1, 1]} : vector<16x16x128xf32> to vector<1x16x128xf32>
    %259 = vector.shape_cast %258 : vector<1x16x128xf32> to vector<16x128xf32>
    %260 = vector.extract_strided_slice %168 {offsets = [14, 0, 0], sizes = [1, 16, 128], strides = [1, 1, 1]} : vector<16x16x128xf32> to vector<1x16x128xf32>
    %261 = vector.shape_cast %260 : vector<1x16x128xf32> to vector<16x128xf32>
    %262 = arith.select %178, %259, %261 : vector<16x128xi1>, vector<16x128xf32>
    %263 = vector.extract_strided_slice %175 {offsets = [9, 0, 0], sizes = [1, 16, 128], strides = [1, 1, 1]} : vector<16x16x128xf32> to vector<1x16x128xf32>
    %264 = vector.shape_cast %263 : vector<1x16x128xf32> to vector<16x128xf32>
    %265 = vector.extract_strided_slice %175 {offsets = [14, 0, 0], sizes = [1, 16, 128], strides = [1, 1, 1]} : vector<16x16x128xf32> to vector<1x16x128xf32>
    %266 = vector.shape_cast %265 : vector<1x16x128xf32> to vector<16x128xf32>
    %267 = arith.select %178, %264, %266 : vector<16x128xi1>, vector<16x128xf32>
    %268 = arith.mulf %257, %221 : vector<16x128xf32>
    %269 = arith.addf %268, %262 : vector<16x128xf32>
    %270 = arith.mulf %267, %269 : vector<16x128xf32>
    %cst_47 = arith.constant dense<0.000000e+00> : vector<128xf32>
    %271 = vector.multi_reduction <add>, %270, %cst_47 [0] : vector<16x128xf32> to vector<128xf32>
    %272 = vector.shape_cast %271 : vector<128xf32> to vector<1x128xf32>
    %273 = vector.extract_strided_slice %272 {offsets = [0, 0], sizes = [1, 64], strides = [1, 1]} : vector<1x128xf32> to vector<1x64xf32>
    %c9 = arith.constant 9 : index
    %c0_48 = arith.constant 0 : index
    %274 = vector.load %arg5[%c9, %c0_48] : memref<32x64xf32, #tpu.memory_space<vmem>>, vector<1x64xf32>
    tpu.vector_store %arg5[%c9, %c0_48], %273 {strides = array<i32>} : memref<32x64xf32, #tpu.memory_space<vmem>>, vector<1x64xf32>,
    %275 = vector.extract_strided_slice %272 {offsets = [0, 64], sizes = [1, 64], strides = [1, 1]} : vector<1x128xf32> to vector<1x64xf32>
    %c30 = arith.constant 30 : index
    %c0_49 = arith.constant 0 : index
    %276 = vector.load %arg5[%c30, %c0_49] : memref<32x64xf32, #tpu.memory_space<vmem>>, vector<1x64xf32>
    tpu.vector_store %arg5[%c30, %c0_49], %275 {strides = array<i32>} : memref<32x64xf32, #tpu.memory_space<vmem>>, vector<1x64xf32>,
    %277 = vector.extract_strided_slice %154 {offsets = [2, 0, 0], sizes = [1, 16, 128], strides = [1, 1, 1]} : vector<16x16x128xf32> to vector<1x16x128xf32>
    %278 = vector.shape_cast %277 : vector<1x16x128xf32> to vector<16x128xf32>
    %279 = vector.extract_strided_slice %154 {offsets = [5, 0, 0], sizes = [1, 16, 128], strides = [1, 1, 1]} : vector<16x16x128xf32> to vector<1x16x128xf32>
    %280 = vector.shape_cast %279 : vector<1x16x128xf32> to vector<16x128xf32>
    %281 = arith.select %178, %278, %280 : vector<16x128xi1>, vector<16x128xf32>
    %282 = vector.extract_strided_slice %168 {offsets = [2, 0, 0], sizes = [1, 16, 128], strides = [1, 1, 1]} : vector<16x16x128xf32> to vector<1x16x128xf32>
    %283 = vector.shape_cast %282 : vector<1x16x128xf32> to vector<16x128xf32>
    %284 = vector.extract_strided_slice %168 {offsets = [5, 0, 0], sizes = [1, 16, 128], strides = [1, 1, 1]} : vector<16x16x128xf32> to vector<1x16x128xf32>
    %285 = vector.shape_cast %284 : vector<1x16x128xf32> to vector<16x128xf32>
    %286 = arith.select %178, %283, %285 : vector<16x128xi1>, vector<16x128xf32>
    %287 = vector.extract_strided_slice %175 {offsets = [2, 0, 0], sizes = [1, 16, 128], strides = [1, 1, 1]} : vector<16x16x128xf32> to vector<1x16x128xf32>
    %288 = vector.shape_cast %287 : vector<1x16x128xf32> to vector<16x128xf32>
    %289 = vector.extract_strided_slice %175 {offsets = [5, 0, 0], sizes = [1, 16, 128], strides = [1, 1, 1]} : vector<16x16x128xf32> to vector<1x16x128xf32>
    %290 = vector.shape_cast %289 : vector<1x16x128xf32> to vector<16x128xf32>
    %291 = arith.select %178, %288, %290 : vector<16x128xi1>, vector<16x128xf32>
    %292 = arith.mulf %281, %245 : vector<16x128xf32>
    %293 = arith.addf %292, %286 : vector<16x128xf32>
    %294 = arith.mulf %291, %293 : vector<16x128xf32>
    %cst_50 = arith.constant dense<0.000000e+00> : vector<128xf32>
    %295 = vector.multi_reduction <add>, %294, %cst_50 [0] : vector<16x128xf32> to vector<128xf32>
    %296 = vector.shape_cast %295 : vector<128xf32> to vector<1x128xf32>
    %297 = vector.extract_strided_slice %296 {offsets = [0, 0], sizes = [1, 64], strides = [1, 1]} : vector<1x128xf32> to vector<1x64xf32>
    %c2 = arith.constant 2 : index
    %c0_51 = arith.constant 0 : index
    %298 = vector.load %arg5[%c2, %c0_51] : memref<32x64xf32, #tpu.memory_space<vmem>>, vector<1x64xf32>
    tpu.vector_store %arg5[%c2, %c0_51], %297 {strides = array<i32>} : memref<32x64xf32, #tpu.memory_space<vmem>>, vector<1x64xf32>,
    %299 = vector.extract_strided_slice %296 {offsets = [0, 64], sizes = [1, 64], strides = [1, 1]} : vector<1x128xf32> to vector<1x64xf32>
    %c21 = arith.constant 21 : index
    %c0_52 = arith.constant 0 : index
    %300 = vector.load %arg5[%c21, %c0_52] : memref<32x64xf32, #tpu.memory_space<vmem>>, vector<1x64xf32>
    tpu.vector_store %arg5[%c21, %c0_52], %299 {strides = array<i32>} : memref<32x64xf32, #tpu.memory_space<vmem>>, vector<1x64xf32>,
    %301 = vector.extract_strided_slice %154 {offsets = [10, 0, 0], sizes = [1, 16, 128], strides = [1, 1, 1]} : vector<16x16x128xf32> to vector<1x16x128xf32>
    %302 = vector.shape_cast %301 : vector<1x16x128xf32> to vector<16x128xf32>
    %303 = vector.extract_strided_slice %154 {offsets = [13, 0, 0], sizes = [1, 16, 128], strides = [1, 1, 1]} : vector<16x16x128xf32> to vector<1x16x128xf32>
    %304 = vector.shape_cast %303 : vector<1x16x128xf32> to vector<16x128xf32>
    %305 = arith.select %178, %302, %304 : vector<16x128xi1>, vector<16x128xf32>
    %306 = vector.extract_strided_slice %168 {offsets = [10, 0, 0], sizes = [1, 16, 128], strides = [1, 1, 1]} : vector<16x16x128xf32> to vector<1x16x128xf32>
    %307 = vector.shape_cast %306 : vector<1x16x128xf32> to vector<16x128xf32>
    %308 = vector.extract_strided_slice %168 {offsets = [13, 0, 0], sizes = [1, 16, 128], strides = [1, 1, 1]} : vector<16x16x128xf32> to vector<1x16x128xf32>
    %309 = vector.shape_cast %308 : vector<1x16x128xf32> to vector<16x128xf32>
    %310 = arith.select %178, %307, %309 : vector<16x128xi1>, vector<16x128xf32>
    %311 = vector.extract_strided_slice %175 {offsets = [10, 0, 0], sizes = [1, 16, 128], strides = [1, 1, 1]} : vector<16x16x128xf32> to vector<1x16x128xf32>
    %312 = vector.shape_cast %311 : vector<1x16x128xf32> to vector<16x128xf32>
    %313 = vector.extract_strided_slice %175 {offsets = [13, 0, 0], sizes = [1, 16, 128], strides = [1, 1, 1]} : vector<16x16x128xf32> to vector<1x16x128xf32>
    %314 = vector.shape_cast %313 : vector<1x16x128xf32> to vector<16x128xf32>
    %315 = arith.select %178, %312, %314 : vector<16x128xi1>, vector<16x128xf32>
    %316 = arith.mulf %305, %269 : vector<16x128xf32>
    %317 = arith.addf %316, %310 : vector<16x128xf32>
    %318 = arith.mulf %315, %317 : vector<16x128xf32>
    %cst_53 = arith.constant dense<0.000000e+00> : vector<128xf32>
    %319 = vector.multi_reduction <add>, %318, %cst_53 [0] : vector<16x128xf32> to vector<128xf32>
    %320 = vector.shape_cast %319 : vector<128xf32> to vector<1x128xf32>
    %321 = vector.extract_strided_slice %320 {offsets = [0, 0], sizes = [1, 64], strides = [1, 1]} : vector<1x128xf32> to vector<1x64xf32>
    %c10 = arith.constant 10 : index
    %c0_54 = arith.constant 0 : index
    %322 = vector.load %arg5[%c10, %c0_54] : memref<32x64xf32, #tpu.memory_space<vmem>>, vector<1x64xf32>
    tpu.vector_store %arg5[%c10, %c0_54], %321 {strides = array<i32>} : memref<32x64xf32, #tpu.memory_space<vmem>>, vector<1x64xf32>,
    %323 = vector.extract_strided_slice %320 {offsets = [0, 64], sizes = [1, 64], strides = [1, 1]} : vector<1x128xf32> to vector<1x64xf32>
    %c29 = arith.constant 29 : index
    %c0_55 = arith.constant 0 : index
    %324 = vector.load %arg5[%c29, %c0_55] : memref<32x64xf32, #tpu.memory_space<vmem>>, vector<1x64xf32>
    tpu.vector_store %arg5[%c29, %c0_55], %323 {strides = array<i32>} : memref<32x64xf32, #tpu.memory_space<vmem>>, vector<1x64xf32>,
    %325 = vector.extract_strided_slice %154 {offsets = [3, 0, 0], sizes = [1, 16, 128], strides = [1, 1, 1]} : vector<16x16x128xf32> to vector<1x16x128xf32>
    %326 = vector.shape_cast %325 : vector<1x16x128xf32> to vector<16x128xf32>
    %327 = vector.extract_strided_slice %154 {offsets = [4, 0, 0], sizes = [1, 16, 128], strides = [1, 1, 1]} : vector<16x16x128xf32> to vector<1x16x128xf32>
    %328 = vector.shape_cast %327 : vector<1x16x128xf32> to vector<16x128xf32>
    %329 = arith.select %178, %326, %328 : vector<16x128xi1>, vector<16x128xf32>
    %330 = vector.extract_strided_slice %168 {offsets = [3, 0, 0], sizes = [1, 16, 128], strides = [1, 1, 1]} : vector<16x16x128xf32> to vector<1x16x128xf32>
    %331 = vector.shape_cast %330 : vector<1x16x128xf32> to vector<16x128xf32>
    %332 = vector.extract_strided_slice %168 {offsets = [4, 0, 0], sizes = [1, 16, 128], strides = [1, 1, 1]} : vector<16x16x128xf32> to vector<1x16x128xf32>
    %333 = vector.shape_cast %332 : vector<1x16x128xf32> to vector<16x128xf32>
    %334 = arith.select %178, %331, %333 : vector<16x128xi1>, vector<16x128xf32>
    %335 = vector.extract_strided_slice %175 {offsets = [3, 0, 0], sizes = [1, 16, 128], strides = [1, 1, 1]} : vector<16x16x128xf32> to vector<1x16x128xf32>
    %336 = vector.shape_cast %335 : vector<1x16x128xf32> to vector<16x128xf32>
    %337 = vector.extract_strided_slice %175 {offsets = [4, 0, 0], sizes = [1, 16, 128], strides = [1, 1, 1]} : vector<16x16x128xf32> to vector<1x16x128xf32>
    %338 = vector.shape_cast %337 : vector<1x16x128xf32> to vector<16x128xf32>
    %339 = arith.select %178, %336, %338 : vector<16x128xi1>, vector<16x128xf32>
    %340 = arith.mulf %329, %293 : vector<16x128xf32>
    %341 = arith.addf %340, %334 : vector<16x128xf32>
    %342 = arith.mulf %339, %341 : vector<16x128xf32>
    %cst_56 = arith.constant dense<0.000000e+00> : vector<128xf32>
    %343 = vector.multi_reduction <add>, %342, %cst_56 [0] : vector<16x128xf32> to vector<128xf32>
    %344 = vector.shape_cast %343 : vector<128xf32> to vector<1x128xf32>
    %345 = vector.extract_strided_slice %344 {offsets = [0, 0], sizes = [1, 64], strides = [1, 1]} : vector<1x128xf32> to vector<1x64xf32>
    %c3 = arith.constant 3 : index
    %c0_57 = arith.constant 0 : index
    %346 = vector.load %arg5[%c3, %c0_57] : memref<32x64xf32, #tpu.memory_space<vmem>>, vector<1x64xf32>
    tpu.vector_store %arg5[%c3, %c0_57], %345 {strides = array<i32>} : memref<32x64xf32, #tpu.memory_space<vmem>>, vector<1x64xf32>,
    %347 = vector.extract_strided_slice %344 {offsets = [0, 64], sizes = [1, 64], strides = [1, 1]} : vector<1x128xf32> to vector<1x64xf32>
    %c20 = arith.constant 20 : index
    %c0_58 = arith.constant 0 : index
    %348 = vector.load %arg5[%c20, %c0_58] : memref<32x64xf32, #tpu.memory_space<vmem>>, vector<1x64xf32>
    tpu.vector_store %arg5[%c20, %c0_58], %347 {strides = array<i32>} : memref<32x64xf32, #tpu.memory_space<vmem>>, vector<1x64xf32>,
    %349 = vector.extract_strided_slice %154 {offsets = [11, 0, 0], sizes = [1, 16, 128], strides = [1, 1, 1]} : vector<16x16x128xf32> to vector<1x16x128xf32>
    %350 = vector.shape_cast %349 : vector<1x16x128xf32> to vector<16x128xf32>
    %351 = vector.extract_strided_slice %154 {offsets = [12, 0, 0], sizes = [1, 16, 128], strides = [1, 1, 1]} : vector<16x16x128xf32> to vector<1x16x128xf32>
    %352 = vector.shape_cast %351 : vector<1x16x128xf32> to vector<16x128xf32>
    %353 = arith.select %178, %350, %352 : vector<16x128xi1>, vector<16x128xf32>
    %354 = vector.extract_strided_slice %168 {offsets = [11, 0, 0], sizes = [1, 16, 128], strides = [1, 1, 1]} : vector<16x16x128xf32> to vector<1x16x128xf32>
    %355 = vector.shape_cast %354 : vector<1x16x128xf32> to vector<16x128xf32>
    %356 = vector.extract_strided_slice %168 {offsets = [12, 0, 0], sizes = [1, 16, 128], strides = [1, 1, 1]} : vector<16x16x128xf32> to vector<1x16x128xf32>
    %357 = vector.shape_cast %356 : vector<1x16x128xf32> to vector<16x128xf32>
    %358 = arith.select %178, %355, %357 : vector<16x128xi1>, vector<16x128xf32>
    %359 = vector.extract_strided_slice %175 {offsets = [11, 0, 0], sizes = [1, 16, 128], strides = [1, 1, 1]} : vector<16x16x128xf32> to vector<1x16x128xf32>
    %360 = vector.shape_cast %359 : vector<1x16x128xf32> to vector<16x128xf32>
    %361 = vector.extract_strided_slice %175 {offsets = [12, 0, 0], sizes = [1, 16, 128], strides = [1, 1, 1]} : vector<16x16x128xf32> to vector<1x16x128xf32>
    %362 = vector.shape_cast %361 : vector<1x16x128xf32> to vector<16x128xf32>
    %363 = arith.select %178, %360, %362 : vector<16x128xi1>, vector<16x128xf32>
    %364 = arith.mulf %353, %317 : vector<16x128xf32>
    %365 = arith.addf %364, %358 : vector<16x128xf32>
    %366 = arith.mulf %363, %365 : vector<16x128xf32>
    %cst_59 = arith.constant dense<0.000000e+00> : vector<128xf32>
    %367 = vector.multi_reduction <add>, %366, %cst_59 [0] : vector<16x128xf32> to vector<128xf32>
    %368 = vector.shape_cast %367 : vector<128xf32> to vector<1x128xf32>
    %369 = vector.extract_strided_slice %368 {offsets = [0, 0], sizes = [1, 64], strides = [1, 1]} : vector<1x128xf32> to vector<1x64xf32>
    %c11 = arith.constant 11 : index
    %c0_60 = arith.constant 0 : index
    %370 = vector.load %arg5[%c11, %c0_60] : memref<32x64xf32, #tpu.memory_space<vmem>>, vector<1x64xf32>
    tpu.vector_store %arg5[%c11, %c0_60], %369 {strides = array<i32>} : memref<32x64xf32, #tpu.memory_space<vmem>>, vector<1x64xf32>,
    %371 = vector.extract_strided_slice %368 {offsets = [0, 64], sizes = [1, 64], strides = [1, 1]} : vector<1x128xf32> to vector<1x64xf32>
    %c28 = arith.constant 28 : index
    %c0_61 = arith.constant 0 : index
    %372 = vector.load %arg5[%c28, %c0_61] : memref<32x64xf32, #tpu.memory_space<vmem>>, vector<1x64xf32>
    tpu.vector_store %arg5[%c28, %c0_61], %371 {strides = array<i32>} : memref<32x64xf32, #tpu.memory_space<vmem>>, vector<1x64xf32>,
    %373 = vector.extract_strided_slice %154 {offsets = [4, 0, 0], sizes = [1, 16, 128], strides = [1, 1, 1]} : vector<16x16x128xf32> to vector<1x16x128xf32>
    %374 = vector.shape_cast %373 : vector<1x16x128xf32> to vector<16x128xf32>
    %375 = vector.extract_strided_slice %154 {offsets = [3, 0, 0], sizes = [1, 16, 128], strides = [1, 1, 1]} : vector<16x16x128xf32> to vector<1x16x128xf32>
    %376 = vector.shape_cast %375 : vector<1x16x128xf32> to vector<16x128xf32>
    %377 = arith.select %178, %374, %376 : vector<16x128xi1>, vector<16x128xf32>
    %378 = vector.extract_strided_slice %168 {offsets = [4, 0, 0], sizes = [1, 16, 128], strides = [1, 1, 1]} : vector<16x16x128xf32> to vector<1x16x128xf32>
    %379 = vector.shape_cast %378 : vector<1x16x128xf32> to vector<16x128xf32>
    %380 = vector.extract_strided_slice %168 {offsets = [3, 0, 0], sizes = [1, 16, 128], strides = [1, 1, 1]} : vector<16x16x128xf32> to vector<1x16x128xf32>
    %381 = vector.shape_cast %380 : vector<1x16x128xf32> to vector<16x128xf32>
    %382 = arith.select %178, %379, %381 : vector<16x128xi1>, vector<16x128xf32>
    %383 = vector.extract_strided_slice %175 {offsets = [4, 0, 0], sizes = [1, 16, 128], strides = [1, 1, 1]} : vector<16x16x128xf32> to vector<1x16x128xf32>
    %384 = vector.shape_cast %383 : vector<1x16x128xf32> to vector<16x128xf32>
    %385 = vector.extract_strided_slice %175 {offsets = [3, 0, 0], sizes = [1, 16, 128], strides = [1, 1, 1]} : vector<16x16x128xf32> to vector<1x16x128xf32>
    %386 = vector.shape_cast %385 : vector<1x16x128xf32> to vector<16x128xf32>
    %387 = arith.select %178, %384, %386 : vector<16x128xi1>, vector<16x128xf32>
    %388 = arith.mulf %377, %341 : vector<16x128xf32>
    %389 = arith.addf %388, %382 : vector<16x128xf32>
    %390 = arith.mulf %387, %389 : vector<16x128xf32>
    %cst_62 = arith.constant dense<0.000000e+00> : vector<128xf32>
    %391 = vector.multi_reduction <add>, %390, %cst_62 [0] : vector<16x128xf32> to vector<128xf32>
    %392 = vector.shape_cast %391 : vector<128xf32> to vector<1x128xf32>
    %393 = vector.extract_strided_slice %392 {offsets = [0, 0], sizes = [1, 64], strides = [1, 1]} : vector<1x128xf32> to vector<1x64xf32>
    %c4 = arith.constant 4 : index
    %c0_63 = arith.constant 0 : index
    %394 = vector.load %arg5[%c4, %c0_63] : memref<32x64xf32, #tpu.memory_space<vmem>>, vector<1x64xf32>
    tpu.vector_store %arg5[%c4, %c0_63], %393 {strides = array<i32>} : memref<32x64xf32, #tpu.memory_space<vmem>>, vector<1x64xf32>,
    %395 = vector.extract_strided_slice %392 {offsets = [0, 64], sizes = [1, 64], strides = [1, 1]} : vector<1x128xf32> to vector<1x64xf32>
    %c19 = arith.constant 19 : index
    %c0_64 = arith.constant 0 : index
    %396 = vector.load %arg5[%c19, %c0_64] : memref<32x64xf32, #tpu.memory_space<vmem>>, vector<1x64xf32>
    tpu.vector_store %arg5[%c19, %c0_64], %395 {strides = array<i32>} : memref<32x64xf32, #tpu.memory_space<vmem>>, vector<1x64xf32>,
    %397 = vector.extract_strided_slice %154 {offsets = [12, 0, 0], sizes = [1, 16, 128], strides = [1, 1, 1]} : vector<16x16x128xf32> to vector<1x16x128xf32>
    %398 = vector.shape_cast %397 : vector<1x16x128xf32> to vector<16x128xf32>
    %399 = vector.extract_strided_slice %154 {offsets = [11, 0, 0], sizes = [1, 16, 128], strides = [1, 1, 1]} : vector<16x16x128xf32> to vector<1x16x128xf32>
    %400 = vector.shape_cast %399 : vector<1x16x128xf32> to vector<16x128xf32>
    %401 = arith.select %178, %398, %400 : vector<16x128xi1>, vector<16x128xf32>
    %402 = vector.extract_strided_slice %168 {offsets = [12, 0, 0], sizes = [1, 16, 128], strides = [1, 1, 1]} : vector<16x16x128xf32> to vector<1x16x128xf32>
    %403 = vector.shape_cast %402 : vector<1x16x128xf32> to vector<16x128xf32>
    %404 = vector.extract_strided_slice %168 {offsets = [11, 0, 0], sizes = [1, 16, 128], strides = [1, 1, 1]} : vector<16x16x128xf32> to vector<1x16x128xf32>
    %405 = vector.shape_cast %404 : vector<1x16x128xf32> to vector<16x128xf32>
    %406 = arith.select %178, %403, %405 : vector<16x128xi1>, vector<16x128xf32>
    %407 = vector.extract_strided_slice %175 {offsets = [12, 0, 0], sizes = [1, 16, 128], strides = [1, 1, 1]} : vector<16x16x128xf32> to vector<1x16x128xf32>
    %408 = vector.shape_cast %407 : vector<1x16x128xf32> to vector<16x128xf32>
    %409 = vector.extract_strided_slice %175 {offsets = [11, 0, 0], sizes = [1, 16, 128], strides = [1, 1, 1]} : vector<16x16x128xf32> to vector<1x16x128xf32>
    %410 = vector.shape_cast %409 : vector<1x16x128xf32> to vector<16x128xf32>
    %411 = arith.select %178, %408, %410 : vector<16x128xi1>, vector<16x128xf32>
    %412 = arith.mulf %401, %365 : vector<16x128xf32>
    %413 = arith.addf %412, %406 : vector<16x128xf32>
    %414 = arith.mulf %411, %413 : vector<16x128xf32>
    %cst_65 = arith.constant dense<0.000000e+00> : vector<128xf32>
    %415 = vector.multi_reduction <add>, %414, %cst_65 [0] : vector<16x128xf32> to vector<128xf32>
    %416 = vector.shape_cast %415 : vector<128xf32> to vector<1x128xf32>
    %417 = vector.extract_strided_slice %416 {offsets = [0, 0], sizes = [1, 64], strides = [1, 1]} : vector<1x128xf32> to vector<1x64xf32>
    %c12 = arith.constant 12 : index
    %c0_66 = arith.constant 0 : index
    %418 = vector.load %arg5[%c12, %c0_66] : memref<32x64xf32, #tpu.memory_space<vmem>>, vector<1x64xf32>
    tpu.vector_store %arg5[%c12, %c0_66], %417 {strides = array<i32>} : memref<32x64xf32, #tpu.memory_space<vmem>>, vector<1x64xf32>,
    %419 = vector.extract_strided_slice %416 {offsets = [0, 64], sizes = [1, 64], strides = [1, 1]} : vector<1x128xf32> to vector<1x64xf32>
    %c27 = arith.constant 27 : index
    %c0_67 = arith.constant 0 : index
    %420 = vector.load %arg5[%c27, %c0_67] : memref<32x64xf32, #tpu.memory_space<vmem>>, vector<1x64xf32>
    tpu.vector_store %arg5[%c27, %c0_67], %419 {strides = array<i32>} : memref<32x64xf32, #tpu.memory_space<vmem>>, vector<1x64xf32>,
    %421 = vector.extract_strided_slice %154 {offsets = [5, 0, 0], sizes = [1, 16, 128], strides = [1, 1, 1]} : vector<16x16x128xf32> to vector<1x16x128xf32>
    %422 = vector.shape_cast %421 : vector<1x16x128xf32> to vector<16x128xf32>
    %423 = vector.extract_strided_slice %154 {offsets = [2, 0, 0], sizes = [1, 16, 128], strides = [1, 1, 1]} : vector<16x16x128xf32> to vector<1x16x128xf32>
    %424 = vector.shape_cast %423 : vector<1x16x128xf32> to vector<16x128xf32>
    %425 = arith.select %178, %422, %424 : vector<16x128xi1>, vector<16x128xf32>
    %426 = vector.extract_strided_slice %168 {offsets = [5, 0, 0], sizes = [1, 16, 128], strides = [1, 1, 1]} : vector<16x16x128xf32> to vector<1x16x128xf32>
    %427 = vector.shape_cast %426 : vector<1x16x128xf32> to vector<16x128xf32>
    %428 = vector.extract_strided_slice %168 {offsets = [2, 0, 0], sizes = [1, 16, 128], strides = [1, 1, 1]} : vector<16x16x128xf32> to vector<1x16x128xf32>
    %429 = vector.shape_cast %428 : vector<1x16x128xf32> to vector<16x128xf32>
    %430 = arith.select %178, %427, %429 : vector<16x128xi1>, vector<16x128xf32>
    %431 = vector.extract_strided_slice %175 {offsets = [5, 0, 0], sizes = [1, 16, 128], strides = [1, 1, 1]} : vector<16x16x128xf32> to vector<1x16x128xf32>
    %432 = vector.shape_cast %431 : vector<1x16x128xf32> to vector<16x128xf32>
    %433 = vector.extract_strided_slice %175 {offsets = [2, 0, 0], sizes = [1, 16, 128], strides = [1, 1, 1]} : vector<16x16x128xf32> to vector<1x16x128xf32>
    %434 = vector.shape_cast %433 : vector<1x16x128xf32> to vector<16x128xf32>
    %435 = arith.select %178, %432, %434 : vector<16x128xi1>, vector<16x128xf32>
    %436 = arith.mulf %425, %389 : vector<16x128xf32>
    %437 = arith.addf %436, %430 : vector<16x128xf32>
    %438 = arith.mulf %435, %437 : vector<16x128xf32>
    %cst_68 = arith.constant dense<0.000000e+00> : vector<128xf32>
    %439 = vector.multi_reduction <add>, %438, %cst_68 [0] : vector<16x128xf32> to vector<128xf32>
    %440 = vector.shape_cast %439 : vector<128xf32> to vector<1x128xf32>
    %441 = vector.extract_strided_slice %440 {offsets = [0, 0], sizes = [1, 64], strides = [1, 1]} : vector<1x128xf32> to vector<1x64xf32>
    %c5 = arith.constant 5 : index
    %c0_69 = arith.constant 0 : index
    %442 = vector.load %arg5[%c5, %c0_69] : memref<32x64xf32, #tpu.memory_space<vmem>>, vector<1x64xf32>
    tpu.vector_store %arg5[%c5, %c0_69], %441 {strides = array<i32>} : memref<32x64xf32, #tpu.memory_space<vmem>>, vector<1x64xf32>,
    %443 = vector.extract_strided_slice %440 {offsets = [0, 64], sizes = [1, 64], strides = [1, 1]} : vector<1x128xf32> to vector<1x64xf32>
    %c18 = arith.constant 18 : index
    %c0_70 = arith.constant 0 : index
    %444 = vector.load %arg5[%c18, %c0_70] : memref<32x64xf32, #tpu.memory_space<vmem>>, vector<1x64xf32>
    tpu.vector_store %arg5[%c18, %c0_70], %443 {strides = array<i32>} : memref<32x64xf32, #tpu.memory_space<vmem>>, vector<1x64xf32>,
    %445 = vector.extract_strided_slice %154 {offsets = [13, 0, 0], sizes = [1, 16, 128], strides = [1, 1, 1]} : vector<16x16x128xf32> to vector<1x16x128xf32>
    %446 = vector.shape_cast %445 : vector<1x16x128xf32> to vector<16x128xf32>
    %447 = vector.extract_strided_slice %154 {offsets = [10, 0, 0], sizes = [1, 16, 128], strides = [1, 1, 1]} : vector<16x16x128xf32> to vector<1x16x128xf32>
    %448 = vector.shape_cast %447 : vector<1x16x128xf32> to vector<16x128xf32>
    %449 = arith.select %178, %446, %448 : vector<16x128xi1>, vector<16x128xf32>
    %450 = vector.extract_strided_slice %168 {offsets = [13, 0, 0], sizes = [1, 16, 128], strides = [1, 1, 1]} : vector<16x16x128xf32> to vector<1x16x128xf32>
    %451 = vector.shape_cast %450 : vector<1x16x128xf32> to vector<16x128xf32>
    %452 = vector.extract_strided_slice %168 {offsets = [10, 0, 0], sizes = [1, 16, 128], strides = [1, 1, 1]} : vector<16x16x128xf32> to vector<1x16x128xf32>
    %453 = vector.shape_cast %452 : vector<1x16x128xf32> to vector<16x128xf32>
    %454 = arith.select %178, %451, %453 : vector<16x128xi1>, vector<16x128xf32>
    %455 = vector.extract_strided_slice %175 {offsets = [13, 0, 0], sizes = [1, 16, 128], strides = [1, 1, 1]} : vector<16x16x128xf32> to vector<1x16x128xf32>
    %456 = vector.shape_cast %455 : vector<1x16x128xf32> to vector<16x128xf32>
    %457 = vector.extract_strided_slice %175 {offsets = [10, 0, 0], sizes = [1, 16, 128], strides = [1, 1, 1]} : vector<16x16x128xf32> to vector<1x16x128xf32>
    %458 = vector.shape_cast %457 : vector<1x16x128xf32> to vector<16x128xf32>
    %459 = arith.select %178, %456, %458 : vector<16x128xi1>, vector<16x128xf32>
    %460 = arith.mulf %449, %413 : vector<16x128xf32>
    %461 = arith.addf %460, %454 : vector<16x128xf32>
    %462 = arith.mulf %459, %461 : vector<16x128xf32>
    %cst_71 = arith.constant dense<0.000000e+00> : vector<128xf32>
    %463 = vector.multi_reduction <add>, %462, %cst_71 [0] : vector<16x128xf32> to vector<128xf32>
    %464 = vector.shape_cast %463 : vector<128xf32> to vector<1x128xf32>
    %465 = vector.extract_strided_slice %464 {offsets = [0, 0], sizes = [1, 64], strides = [1, 1]} : vector<1x128xf32> to vector<1x64xf32>
    %c13 = arith.constant 13 : index
    %c0_72 = arith.constant 0 : index
    %466 = vector.load %arg5[%c13, %c0_72] : memref<32x64xf32, #tpu.memory_space<vmem>>, vector<1x64xf32>
    tpu.vector_store %arg5[%c13, %c0_72], %465 {strides = array<i32>} : memref<32x64xf32, #tpu.memory_space<vmem>>, vector<1x64xf32>,
    %467 = vector.extract_strided_slice %464 {offsets = [0, 64], sizes = [1, 64], strides = [1, 1]} : vector<1x128xf32> to vector<1x64xf32>
    %c26 = arith.constant 26 : index
    %c0_73 = arith.constant 0 : index
    %468 = vector.load %arg5[%c26, %c0_73] : memref<32x64xf32, #tpu.memory_space<vmem>>, vector<1x64xf32>
    tpu.vector_store %arg5[%c26, %c0_73], %467 {strides = array<i32>} : memref<32x64xf32, #tpu.memory_space<vmem>>, vector<1x64xf32>,
    %469 = vector.extract_strided_slice %154 {offsets = [6, 0, 0], sizes = [1, 16, 128], strides = [1, 1, 1]} : vector<16x16x128xf32> to vector<1x16x128xf32>
    %470 = vector.shape_cast %469 : vector<1x16x128xf32> to vector<16x128xf32>
    %471 = vector.extract_strided_slice %154 {offsets = [1, 0, 0], sizes = [1, 16, 128], strides = [1, 1, 1]} : vector<16x16x128xf32> to vector<1x16x128xf32>
    %472 = vector.shape_cast %471 : vector<1x16x128xf32> to vector<16x128xf32>
    %473 = arith.select %178, %470, %472 : vector<16x128xi1>, vector<16x128xf32>
    %474 = vector.extract_strided_slice %168 {offsets = [6, 0, 0], sizes = [1, 16, 128], strides = [1, 1, 1]} : vector<16x16x128xf32> to vector<1x16x128xf32>
    %475 = vector.shape_cast %474 : vector<1x16x128xf32> to vector<16x128xf32>
    %476 = vector.extract_strided_slice %168 {offsets = [1, 0, 0], sizes = [1, 16, 128], strides = [1, 1, 1]} : vector<16x16x128xf32> to vector<1x16x128xf32>
    %477 = vector.shape_cast %476 : vector<1x16x128xf32> to vector<16x128xf32>
    %478 = arith.select %178, %475, %477 : vector<16x128xi1>, vector<16x128xf32>
    %479 = vector.extract_strided_slice %175 {offsets = [6, 0, 0], sizes = [1, 16, 128], strides = [1, 1, 1]} : vector<16x16x128xf32> to vector<1x16x128xf32>
    %480 = vector.shape_cast %479 : vector<1x16x128xf32> to vector<16x128xf32>
    %481 = vector.extract_strided_slice %175 {offsets = [1, 0, 0], sizes = [1, 16, 128], strides = [1, 1, 1]} : vector<16x16x128xf32> to vector<1x16x128xf32>
    %482 = vector.shape_cast %481 : vector<1x16x128xf32> to vector<16x128xf32>
    %483 = arith.select %178, %480, %482 : vector<16x128xi1>, vector<16x128xf32>
    %484 = arith.mulf %473, %437 : vector<16x128xf32>
    %485 = arith.addf %484, %478 : vector<16x128xf32>
    %486 = arith.mulf %483, %485 : vector<16x128xf32>
    %cst_74 = arith.constant dense<0.000000e+00> : vector<128xf32>
    %487 = vector.multi_reduction <add>, %486, %cst_74 [0] : vector<16x128xf32> to vector<128xf32>
    %488 = vector.shape_cast %487 : vector<128xf32> to vector<1x128xf32>
    %489 = vector.extract_strided_slice %488 {offsets = [0, 0], sizes = [1, 64], strides = [1, 1]} : vector<1x128xf32> to vector<1x64xf32>
    %c6 = arith.constant 6 : index
    %c0_75 = arith.constant 0 : index
    %490 = vector.load %arg5[%c6, %c0_75] : memref<32x64xf32, #tpu.memory_space<vmem>>, vector<1x64xf32>
    tpu.vector_store %arg5[%c6, %c0_75], %489 {strides = array<i32>} : memref<32x64xf32, #tpu.memory_space<vmem>>, vector<1x64xf32>,
    %491 = vector.extract_strided_slice %488 {offsets = [0, 64], sizes = [1, 64], strides = [1, 1]} : vector<1x128xf32> to vector<1x64xf32>
    %c17 = arith.constant 17 : index
    %c0_76 = arith.constant 0 : index
    %492 = vector.load %arg5[%c17, %c0_76] : memref<32x64xf32, #tpu.memory_space<vmem>>, vector<1x64xf32>
    tpu.vector_store %arg5[%c17, %c0_76], %491 {strides = array<i32>} : memref<32x64xf32, #tpu.memory_space<vmem>>, vector<1x64xf32>,
    %493 = vector.extract_strided_slice %154 {offsets = [14, 0, 0], sizes = [1, 16, 128], strides = [1, 1, 1]} : vector<16x16x128xf32> to vector<1x16x128xf32>
    %494 = vector.shape_cast %493 : vector<1x16x128xf32> to vector<16x128xf32>
    %495 = vector.extract_strided_slice %154 {offsets = [9, 0, 0], sizes = [1, 16, 128], strides = [1, 1, 1]} : vector<16x16x128xf32> to vector<1x16x128xf32>
    %496 = vector.shape_cast %495 : vector<1x16x128xf32> to vector<16x128xf32>
    %497 = arith.select %178, %494, %496 : vector<16x128xi1>, vector<16x128xf32>
    %498 = vector.extract_strided_slice %168 {offsets = [14, 0, 0], sizes = [1, 16, 128], strides = [1, 1, 1]} : vector<16x16x128xf32> to vector<1x16x128xf32>
    %499 = vector.shape_cast %498 : vector<1x16x128xf32> to vector<16x128xf32>
    %500 = vector.extract_strided_slice %168 {offsets = [9, 0, 0], sizes = [1, 16, 128], strides = [1, 1, 1]} : vector<16x16x128xf32> to vector<1x16x128xf32>
    %501 = vector.shape_cast %500 : vector<1x16x128xf32> to vector<16x128xf32>
    %502 = arith.select %178, %499, %501 : vector<16x128xi1>, vector<16x128xf32>
    %503 = vector.extract_strided_slice %175 {offsets = [14, 0, 0], sizes = [1, 16, 128], strides = [1, 1, 1]} : vector<16x16x128xf32> to vector<1x16x128xf32>
    %504 = vector.shape_cast %503 : vector<1x16x128xf32> to vector<16x128xf32>
    %505 = vector.extract_strided_slice %175 {offsets = [9, 0, 0], sizes = [1, 16, 128], strides = [1, 1, 1]} : vector<16x16x128xf32> to vector<1x16x128xf32>
    %506 = vector.shape_cast %505 : vector<1x16x128xf32> to vector<16x128xf32>
    %507 = arith.select %178, %504, %506 : vector<16x128xi1>, vector<16x128xf32>
    %508 = arith.mulf %497, %461 : vector<16x128xf32>
    %509 = arith.addf %508, %502 : vector<16x128xf32>
    %510 = arith.mulf %507, %509 : vector<16x128xf32>
    %cst_77 = arith.constant dense<0.000000e+00> : vector<128xf32>
    %511 = vector.multi_reduction <add>, %510, %cst_77 [0] : vector<16x128xf32> to vector<128xf32>
    %512 = vector.shape_cast %511 : vector<128xf32> to vector<1x128xf32>
    %513 = vector.extract_strided_slice %512 {offsets = [0, 0], sizes = [1, 64], strides = [1, 1]} : vector<1x128xf32> to vector<1x64xf32>
    %c14 = arith.constant 14 : index
    %c0_78 = arith.constant 0 : index
    %514 = vector.load %arg5[%c14, %c0_78] : memref<32x64xf32, #tpu.memory_space<vmem>>, vector<1x64xf32>
    tpu.vector_store %arg5[%c14, %c0_78], %513 {strides = array<i32>} : memref<32x64xf32, #tpu.memory_space<vmem>>, vector<1x64xf32>,
    %515 = vector.extract_strided_slice %512 {offsets = [0, 64], sizes = [1, 64], strides = [1, 1]} : vector<1x128xf32> to vector<1x64xf32>
    %c25 = arith.constant 25 : index
    %c0_79 = arith.constant 0 : index
    %516 = vector.load %arg5[%c25, %c0_79] : memref<32x64xf32, #tpu.memory_space<vmem>>, vector<1x64xf32>
    tpu.vector_store %arg5[%c25, %c0_79], %515 {strides = array<i32>} : memref<32x64xf32, #tpu.memory_space<vmem>>, vector<1x64xf32>,
    %517 = vector.extract_strided_slice %154 {offsets = [7, 0, 0], sizes = [1, 16, 128], strides = [1, 1, 1]} : vector<16x16x128xf32> to vector<1x16x128xf32>
    %518 = vector.shape_cast %517 : vector<1x16x128xf32> to vector<16x128xf32>
    %519 = vector.extract_strided_slice %154 {offsets = [0, 0, 0], sizes = [1, 16, 128], strides = [1, 1, 1]} : vector<16x16x128xf32> to vector<1x16x128xf32>
    %520 = vector.shape_cast %519 : vector<1x16x128xf32> to vector<16x128xf32>
    %521 = arith.select %178, %518, %520 : vector<16x128xi1>, vector<16x128xf32>
    %522 = vector.extract_strided_slice %168 {offsets = [7, 0, 0], sizes = [1, 16, 128], strides = [1, 1, 1]} : vector<16x16x128xf32> to vector<1x16x128xf32>
    %523 = vector.shape_cast %522 : vector<1x16x128xf32> to vector<16x128xf32>
    %524 = vector.extract_strided_slice %168 {offsets = [0, 0, 0], sizes = [1, 16, 128], strides = [1, 1, 1]} : vector<16x16x128xf32> to vector<1x16x128xf32>
    %525 = vector.shape_cast %524 : vector<1x16x128xf32> to vector<16x128xf32>
    %526 = arith.select %178, %523, %525 : vector<16x128xi1>, vector<16x128xf32>
    %527 = vector.extract_strided_slice %175 {offsets = [7, 0, 0], sizes = [1, 16, 128], strides = [1, 1, 1]} : vector<16x16x128xf32> to vector<1x16x128xf32>
    %528 = vector.shape_cast %527 : vector<1x16x128xf32> to vector<16x128xf32>
    %529 = vector.extract_strided_slice %175 {offsets = [0, 0, 0], sizes = [1, 16, 128], strides = [1, 1, 1]} : vector<16x16x128xf32> to vector<1x16x128xf32>
    %530 = vector.shape_cast %529 : vector<1x16x128xf32> to vector<16x128xf32>
    %531 = arith.select %178, %528, %530 : vector<16x128xi1>, vector<16x128xf32>
    %532 = arith.mulf %521, %485 : vector<16x128xf32>
    %533 = arith.addf %532, %526 : vector<16x128xf32>
    %534 = arith.mulf %531, %533 : vector<16x128xf32>
    %cst_80 = arith.constant dense<0.000000e+00> : vector<128xf32>
    %535 = vector.multi_reduction <add>, %534, %cst_80 [0] : vector<16x128xf32> to vector<128xf32>
    %536 = vector.shape_cast %535 : vector<128xf32> to vector<1x128xf32>
    %537 = vector.extract_strided_slice %536 {offsets = [0, 0], sizes = [1, 64], strides = [1, 1]} : vector<1x128xf32> to vector<1x64xf32>
    %c7 = arith.constant 7 : index
    %c0_81 = arith.constant 0 : index
    %538 = vector.load %arg5[%c7, %c0_81] : memref<32x64xf32, #tpu.memory_space<vmem>>, vector<1x64xf32>
    tpu.vector_store %arg5[%c7, %c0_81], %537 {strides = array<i32>} : memref<32x64xf32, #tpu.memory_space<vmem>>, vector<1x64xf32>,
    %539 = vector.extract_strided_slice %536 {offsets = [0, 64], sizes = [1, 64], strides = [1, 1]} : vector<1x128xf32> to vector<1x64xf32>
    %c16 = arith.constant 16 : index
    %c0_82 = arith.constant 0 : index
    %540 = vector.load %arg5[%c16, %c0_82] : memref<32x64xf32, #tpu.memory_space<vmem>>, vector<1x64xf32>
    tpu.vector_store %arg5[%c16, %c0_82], %539 {strides = array<i32>} : memref<32x64xf32, #tpu.memory_space<vmem>>, vector<1x64xf32>,
    %541 = vector.extract_strided_slice %154 {offsets = [15, 0, 0], sizes = [1, 16, 128], strides = [1, 1, 1]} : vector<16x16x128xf32> to vector<1x16x128xf32>
    %542 = vector.shape_cast %541 : vector<1x16x128xf32> to vector<16x128xf32>
    %543 = vector.extract_strided_slice %154 {offsets = [8, 0, 0], sizes = [1, 16, 128], strides = [1, 1, 1]} : vector<16x16x128xf32> to vector<1x16x128xf32>
    %544 = vector.shape_cast %543 : vector<1x16x128xf32> to vector<16x128xf32>
    %545 = arith.select %178, %542, %544 : vector<16x128xi1>, vector<16x128xf32>
    %546 = vector.extract_strided_slice %168 {offsets = [15, 0, 0], sizes = [1, 16, 128], strides = [1, 1, 1]} : vector<16x16x128xf32> to vector<1x16x128xf32>
    %547 = vector.shape_cast %546 : vector<1x16x128xf32> to vector<16x128xf32>
    %548 = vector.extract_strided_slice %168 {offsets = [8, 0, 0], sizes = [1, 16, 128], strides = [1, 1, 1]} : vector<16x16x128xf32> to vector<1x16x128xf32>
    %549 = vector.shape_cast %548 : vector<1x16x128xf32> to vector<16x128xf32>
    %550 = arith.select %178, %547, %549 : vector<16x128xi1>, vector<16x128xf32>
    %551 = vector.extract_strided_slice %175 {offsets = [15, 0, 0], sizes = [1, 16, 128], strides = [1, 1, 1]} : vector<16x16x128xf32> to vector<1x16x128xf32>
    %552 = vector.shape_cast %551 : vector<1x16x128xf32> to vector<16x128xf32>
    %553 = vector.extract_strided_slice %175 {offsets = [8, 0, 0], sizes = [1, 16, 128], strides = [1, 1, 1]} : vector<16x16x128xf32> to vector<1x16x128xf32>
    %554 = vector.shape_cast %553 : vector<1x16x128xf32> to vector<16x128xf32>
    %555 = arith.select %178, %552, %554 : vector<16x128xi1>, vector<16x128xf32>
    %556 = arith.mulf %545, %509 : vector<16x128xf32>
    %557 = arith.addf %556, %550 : vector<16x128xf32>
    %558 = arith.mulf %555, %557 : vector<16x128xf32>
    %cst_83 = arith.constant dense<0.000000e+00> : vector<128xf32>
    %559 = vector.multi_reduction <add>, %558, %cst_83 [0] : vector<16x128xf32> to vector<128xf32>
    %560 = vector.shape_cast %559 : vector<128xf32> to vector<1x128xf32>
    %561 = vector.extract_strided_slice %560 {offsets = [0, 0], sizes = [1, 64], strides = [1, 1]} : vector<1x128xf32> to vector<1x64xf32>
    %c15 = arith.constant 15 : index
    %c0_84 = arith.constant 0 : index
    %562 = vector.load %arg5[%c15, %c0_84] : memref<32x64xf32, #tpu.memory_space<vmem>>, vector<1x64xf32>
    tpu.vector_store %arg5[%c15, %c0_84], %561 {strides = array<i32>} : memref<32x64xf32, #tpu.memory_space<vmem>>, vector<1x64xf32>,
    %563 = vector.extract_strided_slice %560 {offsets = [0, 64], sizes = [1, 64], strides = [1, 1]} : vector<1x128xf32> to vector<1x64xf32>
    %c24 = arith.constant 24 : index
    %c0_85 = arith.constant 0 : index
    %564 = vector.load %arg5[%c24, %c0_85] : memref<32x64xf32, #tpu.memory_space<vmem>>, vector<1x64xf32>
    tpu.vector_store %arg5[%c24, %c0_85], %563 {strides = array<i32>} : memref<32x64xf32, #tpu.memory_space<vmem>>, vector<1x64xf32>,
    %c0_86 = arith.constant 0 : index
    %c0_87 = arith.constant 0 : index
    %565 = vector.load %arg5[%c0_86, %c0_87] : memref<32x64xf32, #tpu.memory_space<vmem>>, vector<16x64xf32>
    %c16_88 = arith.constant 16 : index
    %c0_89 = arith.constant 0 : index
    %566 = vector.load %arg5[%c16_88, %c0_89] : memref<32x64xf32, #tpu.memory_space<vmem>>, vector<16x64xf32>
    %567 = vector.extract_strided_slice %6 {offsets = [0, 0], sizes = [1, 64], strides = [1, 1]} : vector<1x128xf32> to vector<1x64xf32>
    %568 = vector.extract_strided_slice %105 {offsets = [0, 0], sizes = [16, 64], strides = [1, 1]} : vector<16x128xf32> to vector<16x64xf32>
    %569 = vector.broadcast %567 : vector<1x64xf32> to vector<16x64xf32>
    %570 = arith.mulf %569, %568 : vector<16x64xf32>
    %571 = arith.addf %565, %570 : vector<16x64xf32>
    %572 = vector.extract_strided_slice %6 {offsets = [0, 64], sizes = [1, 64], strides = [1, 1]} : vector<1x128xf32> to vector<1x64xf32>
    %573 = vector.extract_strided_slice %105 {offsets = [0, 64], sizes = [16, 64], strides = [1, 1]} : vector<16x128xf32> to vector<16x64xf32>
    %574 = vector.broadcast %572 : vector<1x64xf32> to vector<16x64xf32>
    %575 = arith.mulf %574, %573 : vector<16x64xf32>
    %576 = arith.addf %566, %575 : vector<16x64xf32>
    %577 = arith.addf %571, %576 : vector<16x64xf32>
    %cst_90 = arith.constant 5.000000e-01 : f32
    %578 = vector.broadcast %cst_90 : f32 to vector<16x64xf32>
    %579 = arith.mulf %578, %13 : vector<16x64xf32>
    %580 = math.tanh %579 : vector<16x64xf32>
    %cst_91 = arith.constant 1.000000e+00 : f32
    %581 = vector.broadcast %cst_91 : f32 to vector<16x64xf32>
    %582 = arith.addf %580, %581 : vector<16x64xf32>
    %cst_92 = arith.constant 5.000000e-01 : f32
    %583 = vector.broadcast %cst_92 : f32 to vector<16x64xf32>
    %584 = arith.mulf %583, %582 : vector<16x64xf32>
    %585 = arith.mulf %13, %584 : vector<16x64xf32>
    %586 = arith.mulf %577, %585 : vector<16x64xf32>
    %cst_93 = arith.constant dense<0.000000e+00> : vector<16x32xf32>
    %587 = tpu.matmul %586, %8, %cst_93 {dimension_numbers = #tpu.dot_dimension_numbers<[1], [0], [0], [1], [0, 0, 1, 1], [], []>} : vector<16x64xf32>, vector<64x32xf32>, vector<16x32xf32> -> vector<16x32xf32>
    %cst_94 = arith.constant dense<0.000000e+00> : vector<16xf32>
    %588 = vector.multi_reduction <add>, %587, %cst_94 [1] : vector<16x32xf32> to vector<16xf32>
    %589 = vector.shape_cast %588 : vector<16xf32> to vector<16x1xf32>
    %cst_95 = arith.constant 3.200000e+01 : f32
    %590 = vector.broadcast %cst_95 : f32 to vector<16x1xf32>
    %591 = arith.divf %589, %590 : vector<16x1xf32>
    %592 = vector.broadcast %591 : vector<16x1xf32> to vector<16x32xf32>
    %593 = arith.subf %587, %592 : vector<16x32xf32>
    %594 = arith.mulf %593, %593 : vector<16x32xf32>
    %cst_96 = arith.constant dense<0.000000e+00> : vector<16xf32>
    %595 = vector.multi_reduction <add>, %594, %cst_96 [1] : vector<16x32xf32> to vector<16xf32>
    %596 = vector.shape_cast %595 : vector<16xf32> to vector<16x1xf32>
    %cst_97 = arith.constant 3.200000e+01 : f32
    %597 = vector.broadcast %cst_97 : f32 to vector<16x1xf32>
    %598 = arith.divf %596, %597 : vector<16x1xf32>
    %cst_98 = arith.constant 9.99999997E-7 : f32
    %599 = vector.broadcast %cst_98 : f32 to vector<16x1xf32>
    %600 = arith.addf %598, %599 : vector<16x1xf32>
    %601 = math.rsqrt %600 : vector<16x1xf32>
    %602 = vector.broadcast %601 : vector<16x1xf32> to vector<16x32xf32>
    %603 = arith.mulf %593, %602 : vector<16x32xf32>
    %604 = vector.broadcast %9 : vector<1x32xf32> to vector<16x32xf32>
    %605 = arith.mulf %603, %604 : vector<16x32xf32>
    %606 = arith.addf %0, %605 : vector<16x32xf32>
    %607 = vector.broadcast %10 : vector<1x32xf32> to vector<16x32xf32>
    %608 = arith.addf %606, %607 : vector<16x32xf32>
    %c0_99 = arith.constant 0 : index
    %c0_100 = arith.constant 0 : index
    %609 = vector.load %arg4[%c0_99, %c0_100] : memref<16x32xf32, #tpu.memory_space<vmem>>, vector<16x32xf32>
    tpu.vector_store %arg4[%c0_99, %c0_100], %608 {strides = array<i32>} : memref<16x32xf32, #tpu.memory_space<vmem>>, vector<16x32xf32>,
    return
  }
}

</mosaic_0001>

<bundles_post_ra>
// kernel: en_bimamba_layer.1
= control target key start
LH: loop header
LB: loop body
LE: loop exit
PB: predicated region body
PF: predicated region fallthrough
CT: control target
= control target key end

     0   :  { %vm4099_vm0 = vcmask 261120   ;;  %s4094_s0 = inlined_call_operand.vmem [shape: f32[16,32], index: 0, kind: input, shape index: {}]   ;;  %s4095_s1 = inlined_call_operand.vmem [shape: f32[57,128], index: 1, kind: input, shape index: {}]   ;;  %s4096_s2 = inlined_call_operand.vmem [shape: f32[128,68], index: 2, kind: input, shape index: {}]   ;;  %s4097_s3 = inlined_call_operand.vmem [shape: f32[66,32], index: 3, kind: input, shape index: {}]   ;;  %s4098_s4 = inlined_call_operand.hbm [shape: f32[16,32], index: 4, kind: output, shape index: {}]  }
   0x1   :  { %v23_v0 = vld [vmem:[%s4095_s1 + $0x18] sm:$0xff]  ;;  %v22_v1 = vld [vmem:[%s4095_s1 + $0x10] sm:$0xff]  ;;  %v18_v2 = vld [vmem:[%s4094_s0] sm:$0xff] }
   0x2   :  { %2269 = vmatprep.subr.mxu0 %v23_v0  ;;  %v21_v3 = vld [vmem:[%s4095_s1 + $0x8] sm:$0xff]  ;;  %2277 = vmatprep.mubr.msk.f32.mxu0 %vm4099_vm0, %v18_v2 }
   0x3   :  { %2270 = vmatpush3.msra.mxu0 %v23_v0 }
   0x4   :  { %9 = vsyncpa [#allocation4], 0  ;;  %2271 = vmatprep.subr.mxu0 %v22_v1  ;;  %v20_v4 = vld [vmem:[%s4095_s1] sm:$0xff]  ;;  %v19_v5 = vld [vmem:[%s4094_s0 + $0x8] sm:$0xff]  ;;  %s2460_s11 = smov 64   ;;  %v2461_v24 = vmov 1   ;;  %v123_v26 = vlaneseq }
   0x5   :  { %2272 = vmatpush3.msra.mxu0 %v22_v1  ;;  %v309_v6 = vld [vmem:[%s4096_s2 + $0x78] sm:$0xff]  ;;  %v308_v7 = vld [vmem:[%s4096_s2 + $0x70] sm:$0xff]  ;;  %v307_v8 = vld [vmem:[%s4096_s2 + $0x68] sm:$0xff]  ;;  %2344 = vset.pattern.permute.xlu0 %v2461_v24  ;;  %v2462_v25 = vmov 0   ;;  %vm161_vm1 = vcmask 523264   ;;  %s2466_s16 = smov [#allocation3]  }
   0x6   :  { %2273 = vmatprep.subr.mxu0 %v21_v3  ;;  %2280 = vmatprep.subr.mxu1 %v309_v6  ;;  %v306_v10 = vld [vmem:[%s4096_s2 + $0x60] sm:$0xff]  ;;  %v305_v12 = vld [vmem:[%s4096_s2 + $0x58] sm:$0xff]  ;;  %v304_v13 = vld [vmem:[%s4096_s2 + $0x50] sm:$0xff]  ;;  %v2572_v27 = vshrl.u32 %v123_v26, 7  ;;  %v2584_v32 = vand.u32 127, %v123_v26  ;;  %s2215_s17 = sshll.u32 %s2466_s16, 4  ;;  %s2216_s17 = int_to_ptr.vmem [resolvable:$true] %s2215_s17 }
   0x7   :  { %2274 = vmatpush3.msra.mxu0 %v21_v3  ;;  %2281 = vmatpush3.msra.mxu1 %v309_v6  ;;  %v303_v14 = vld [vmem:[%s4096_s2 + $0x48] sm:$0xff]  ;;  %v302_v15 = vld [vmem:[%s4096_s2 + $0x40] sm:$0xff]  ;;  %v301_v16 = vld [vmem:[%s4096_s2 + $0x38] sm:$0xff]  ;;  %p2443_p1 = scmp.lt.s32.totalorder %s2216_s17, %s2216_s17 }
   0x8   :  { %2275 = vmatprep.subr.mxu0 %v20_v4  ;;  %2282 = vmatprep.subr.mxu1 %v308_v7  ;;  %v300_v17 = vld [vmem:[%s4096_s2 + $0x30] sm:$0xff]  ;;  %v299_v18 = vld [vmem:[%s4096_s2 + $0x28] sm:$0xff]  ;;  %v298_v19 = vld [vmem:[%s4096_s2 + $0x20] sm:$0xff]  ;;  %v2575_v28 = vsub.s32 3, %v2572_v27  ;;  %v125_v30 = vadd.s32 8, %v2572_v27  ;;  %v2582_v31 = vand.u32 7, %v2572_v27 }
   0x9   :  { %2276 = vmatpush3.msra.mxu0 %v20_v4  ;;  %2283 = vmatpush3.msra.mxu1 %v308_v7  ;;  %v297_v20 = vld [vmem:[%s4096_s2 + $0x18] sm:$0xff]  ;;  %v296_v21 = vld [vmem:[%s4096_s2 + $0x10] sm:$0xff]  ;;  %v295_v22 = vld [vmem:[%s4096_s2 + $0x8] sm:$0xff]  ;;  %v2587_v33 = vsub.s32 0, %v2572_v27  ;;  %vm172_vm2 = vcmp.lt.s32.totalorder %v2572_v27, 3  ;;  %vm185_vm3 = vcmp.lt.s32.totalorder %v2572_v27, 5 }
   0xa   :  { %2278 = vmatmul.mubr.msk.f32.vlgmr.msra.gmra.mxu0 %vm4099_vm0, %v19_v5  ;;  %2284 = vmatprep.subr.mxu1 %v307_v8  ;;  %v294_v23 = vld [vmem:[%s4096_s2] sm:$0xff]  ;;  %vm208_vm4 = vcmp.lt.s32.totalorder %v2572_v27, 2  ;;  %v2596_v35 = vsub.s32 1, %v2572_v27  ;;  %v2599_v36 = vsub.s32 2, %v2572_v27  ;;  %v2601_v37 = vand.u32 7, %v125_v30 }
   0xb   :  { %2285 = vmatpush3.msra.mxu1 %v307_v8  ;;  %2343 = vset.pattern.permute.xlu1 %v2462_v25  ;;  %v24_v29 = vld [vmem:[%s4095_s1 + $0x20] sm:$0xf]  ;;  %vm152_vm5 = vcmp.lt.s32.totalorder %v2584_v32, 64  ;;  %vm168_vm6 = vcmp.ge.s32.totalorder %v2582_v31, 3  ;;  %vm181_vm7 = vcmp.le.s32.totalorder %v2582_v31, 4  ;;  %vm204_vm8 = vcmp.ge.s32.totalorder %v2582_v31, 2 }
   0xc   :  { %2286 = vmatprep.subr.mxu1 %v306_v10  ;;  %v2592_v34 = vrot.slane %v24_v29, %v2575_v28  ;;  %v199_v39 = vrot.slane %v24_v29, %v2587_v33  ;;  %vm217_vm9 = vcmp.le.s32.totalorder %v2582_v31, 5  ;;  %vm221_vm10 = vcmp.lt.s32.totalorder %v2572_v27, 6  ;;  %v2228_v1 = vld [vmem:[%s4095_s1 + $0x24] ss:$0 sm:$0xff] }
   0xd   :  { %2287 = vmatpush3.msra.mxu1 %v306_v10  ;;  %vm257_vm14 = vcmp.lt.s32.totalorder %v2572_v27, 7  ;;  %v235_v41 = vrot.slane %v24_v29, %v2596_v35  ;;  %v2620_v42 = vrot.slane %v24_v29, %v2599_v36  ;;  %vm169_vm15 = vcmp.ge.s32.totalorder %v2601_v37, 3 }
   0xe   :  { %2288 = vmatprep.subr.mxu1 %v305_v12  ;;  %vm205_vm11 = vcmp.ge.s32.totalorder %v2601_v37, 2  ;;  %vm218_vm12 = vcmp.le.s32.totalorder %v2601_v37, 5  ;;  %vm241_vm13 = vcmp.ge.s32.totalorder %v2601_v37, 1  ;;  %vm254_vm0 = vcmp.le.s32.totalorder %v2601_v37, 6 }
   0xf   :  { %2289 = vmatpush3.msra.mxu1 %v305_v12 }
  0x10   :  { %2290 = vmatprep.subr.mxu1 %v304_v13 }
  0x11   :  { %2291 = vmatpush3.msra.mxu1 %v304_v13 }
  0x12   :  { %2292 = vmatprep.subr.mxu1 %v303_v14 }
  0x13   :  { %2293 = vmatpush3.msra.mxu1 %v303_v14 }
  0x14   :  { %2294 = vmatprep.subr.mxu1 %v302_v15 }
  0x15   :  { %2295 = vmatpush3.msra.mxu1 %v302_v15 }
  0x16   :  { %2296 = vmatprep.subr.mxu1 %v301_v16 }
  0x17   :  { %2297 = vmatpush3.msra.mxu1 %v301_v16 }
  0x18   :  { %2298 = vmatprep.subr.mxu1 %v300_v17 }
  0x19   :  { %2299 = vmatpush3.msra.mxu1 %v300_v17 }
  0x1a   :  { %2300 = vmatprep.subr.mxu1 %v299_v18 }
  0x1b   :  { %2301 = vmatpush3.msra.mxu1 %v299_v18 }
  0x1c   :  { %2302 = vmatprep.subr.mxu1 %v298_v19 }
  0x1d   :  { %2303 = vmatpush3.msra.mxu1 %v298_v19 }
  0x1e   :  { %2304 = vmatprep.subr.mxu1 %v297_v20 }
  0x1f   :  { %2305 = vmatpush3.msra.mxu1 %v297_v20 }
  0x20   :  { %2306 = vmatprep.subr.mxu1 %v296_v21 }
  0x21   :  { %2307 = vmatpush3.msra.mxu1 %v296_v21 }
  0x22   :  { %2308 = vmatprep.subr.mxu1 %v295_v22 }
  0x23   :  { %2309 = vmatpush3.msra.mxu1 %v295_v22 }
  0x24   :  { %2310 = vmatprep.subr.mxu1 %v294_v23 }
  0x25   :  { %2311 = vmatpush3.msra.mxu1 %v294_v23 }
  0xca   :  { %v2523_v9 = vpop.f32.mrf.mxu0 }
  0xcb   :  { %4134 = vst [vmem:[#allocation6_spill] sm:$0xff] %v2523_v9 }
  0xcc   :  { %v2528_v11 = vpop.f32.mrf.mxu0 }
  0xcd   :  { %4135 = vst [vmem:[#allocation7_spill] sm:$0xff] %v2528_v11  ;;  %155 = vrot.lane.b32.xlu0 %v2528_v11, %s2460_s11 }
  0xd1   :  { %157 = vrot.lane.b32.xlu0 %v2523_v9, %s2460_s11 }
 0x13f   :  { %v156_v38 = vpop.permute.xlu0 %155 }
 0x140   :  { %v2609_v40 = vsel %vm161_vm1, %v2528_v11, %v156_v38 }
 0x141   :  { %v170_v43 = vrot.slane %v2609_v40, 5  ;;  %v183_v45 = vrot.slane %v2609_v40, 3  ;;  %v206_v46 = vrot.slane %v2609_v40, 6  ;;  %v219_v47 = vrot.slane %v2609_v40, 2 }
 0x142   :  { %v242_v53 = vrot.slane %v2609_v40, 7  ;;  %v255_v54 = vrot.slane %v2609_v40, 1  ;;  %v280_v38 = vmul.f32 %v2592_v34, %v2609_v40 }
 0x143   :  { %v158_v44 = vpop.permute.xlu0 %157 }
 0x144   :  { %v163_v48 = vsel %vm161_vm1, %v2523_v9, %v158_v44 }
 0x145   :  { %v171_v49 = vrot.slane %v163_v48, 5  ;;  %v184_v50 = vrot.slane %v163_v48, 3  ;;  %v207_v51 = vrot.slane %v163_v48, 6  ;;  %v220_v52 = vrot.slane %v163_v48, 2 }
 0x146   :  { %v243_v55 = vrot.slane %v163_v48, 7  ;;  %v256_v56 = vrot.slane %v163_v48, 1 }
 0x147   :  { %v174_v57 = vsel %vm172_vm2, %v171_v49, %v170_v43  ;;  %v186_v58 = vsel %vm185_vm3, %v183_v45, %v184_v50  ;;  %v210_v59 = vsel %vm208_vm4, %v207_v51, %v206_v46  ;;  %v222_v60 = vsel %vm221_vm10, %v219_v47, %v220_v52 }
 0x148   :  { %v179_v61 = vsel %vm168_vm6, %v174_v57, 0.0  ;;  %v192_v62 = vsel %vm181_vm7, %v186_v58, 0.0  ;;  %v215_v63 = vsel %vm204_vm8, %v210_v59, 0.0  ;;  %v228_v0 = vsel %vm217_vm9, %v222_v60, 0.0 }
 0x149   :  { %v194_v2 = vsel %vm152_vm5, %v179_v61, %v192_v62  ;;  %v230_v3 = vsel %vm152_vm5, %v215_v63, %v228_v0  ;;  %vm4136_vm6 = vcmp.lt.s32.totalorder %v2572_v27, 1  ;;  %v258_v5 = vsel %vm257_vm14, %v255_v54, %v256_v56 }
 0x14a   :  { %v246_v4 = vsel %vm4136_vm6, %v243_v55, %v242_v53  ;;  %v200_v6 = vmul.f32 %v199_v39, %v194_v2  ;;  %v236_v7 = vmul.f32 %v235_v41, %v230_v3  ;;  %vm4137_vm7 = vcmp.ge.s32.totalorder %v2582_v31, 1 }
 0x14b   :  { %v251_v8 = vsel %vm4137_vm7, %v246_v4, 0.0  ;;  %vm4138_vm8 = vcmp.le.s32.totalorder %v2582_v31, 6  ;;  %v173_v13 = vsel %vm172_vm2, %v170_v43, %v171_v49  ;;  %v187_v14 = vsel %vm185_vm3, %v184_v50, %v183_v45  ;;  %vm4140_vm2 = vmmov %vm4136_vm6 }
 0x14c   :  { %v264_v10 = vsel %vm4138_vm8, %v258_v5, 0.0  ;;  %v209_v15 = vsel %vm208_vm4, %v206_v46, %v207_v51  ;;  %v202_v16 = vadd.f32 %v2228_v1, %v200_v6  ;;  %v180_v18 = vsel %vm169_vm15, %v173_v13, 0.0 }
 0x14d   :  { %v266_v12 = vsel %vm152_vm5, %v251_v8, %v264_v10  ;;  %vm4139_vm9 = vcmp.le.s32.totalorder %v2601_v37, 4  ;;  %v216_v21 = vsel %vm205_vm11, %v209_v15, 0.0  ;;  %v223_v22 = vsel %vm221_vm10, %v220_v52, %v219_v47 }
 0x14e   :  { %v272_v17 = vmul.f32 %v2620_v42, %v266_v12  ;;  %v193_v19 = vsel %vm4139_vm9, %v187_v14, 0.0  ;;  %v245_v23 = vsel %vm4140_vm2, %v242_v53, %v243_v55  ;;  %v238_v26 = vadd.f32 %v236_v7, %v202_v16  ;;  %v26_v16 = vld [vmem:[%s4095_s1 + $0x25] sm:$0x3] }
 0x14f   :  { %v195_v20 = vsel %vm152_vm5, %v180_v18, %v193_v19  ;;  %v229_v30 = vsel %vm218_vm12, %v223_v22, 0.0  ;;  %v252_v31 = vsel %vm241_vm13, %v245_v23, 0.0  ;;  %v259_v44 = vsel %vm257_vm14, %v256_v56, %v255_v54 }
 0x150   :  { %v201_v29 = vmul.f32 %v199_v39, %v195_v20  ;;  %v231_v43 = vsel %vm152_vm5, %v216_v21, %v229_v30  ;;  %v274_v45 = vadd.f32 %v272_v17, %v238_v26  ;;  %v265_v39 = vsel %vm254_vm0, %v259_v44, 0.0 }
 0x151   :  { %v237_v47 = vmul.f32 %v235_v41, %v231_v43  ;;  %v267_v49 = vsel %vm152_vm5, %v252_v31, %v265_v39  ;;  %v281_v55 = vmul.f32 %v2592_v34, %v163_v48  ;;  %v943_v34 = vsub.s32 7, %v2572_v27 }
 0x152   :  { %v203_v46 = vadd.f32 %v2228_v1, %v201_v29  ;;  %v282_v50 = vadd.f32 %v280_v38, %v274_v45  ;;  %v273_v52 = vmul.f32 %v2620_v42, %v267_v49  ;;  %v931_v63 = vsub.s32 6, %v2572_v27  ;;  %v2229_v45 = vld [vmem:[%s4095_s1 + $0x27] ss:$0 sm:$0xff] }
 0x153   :  { %v919_v0 = vsub.s32 5, %v2572_v27  ;;  %v907_v1 = vsub.s32 4, %v2572_v27  ;;  %v2463_v5 = vmov 34   ;;  %v2464_v8 = vmov 35  }
 0x154   :  { %v239_v51 = vadd.f32 %v237_v47, %v203_v46  ;;  %v284_v40 = vmul.f32 0.5, %v282_v50  ;;  %v412_v19 = vrot.slane %v26_v16, %v2596_v35  ;;  %v398_v20 = vrot.slane %v26_v16, %v2587_v33 }
 0x155   :  { %vm1660_vm4 = vcmask 516096  }
 0x156   :  { %v275_v53 = vadd.f32 %v273_v52, %v239_v51  ;;  %2352 = vtanh.f32 %v284_v40 }
 0x158   :  { %v283_v57 = vadd.f32 %v281_v55, %v275_v53 }
 0x15a   :  { %v285_v54 = vmul.f32 0.5, %v283_v57 }
 0x15c   :  { %2354 = vtanh.f32 %v285_v54 }
 0x163   :  { %v2353_v56 = vpop.eup %2352 }
 0x164   :  { %v288_v41 = vadd.f32 1.0, %v2353_v56 }
 0x166   :  { %v290_v58 = vmul.f32 0.5, %v288_v41 }
 0x168   :  { %v2704_v59 = vmul.f32 %v290_v58, %v282_v50 }
 0x169   :  { %v2355_v37 = vpop.eup %2354 }
 0x16a   :  { %4141 = vst [vmem:[#allocation8_spill] sm:$0xff] %v2704_v59  ;;  %v289_v60 = vadd.f32 1.0, %v2355_v37  ;;  %2312 = vmatprep.mubr.f32.mxu1 %v2704_v59 }
 0x16c   :  { %v291_v61 = vmul.f32 0.5, %v289_v60 }
 0x16e   :  { %v2707_v62 = vmul.f32 %v291_v61, %v283_v57 }
 0x170   :  { %4142 = vst [vmem:[#allocation9_spill] sm:$0xff] %v2707_v62  ;;  %2313 = vmatmul.mubr.f32.vlgmr.msra.gmra.mxu1 %v2707_v62 }
 0x230   :  { %v2314_v42 = vpop.f32.mrf.mxu1 }
 0x231   :  { %406 = vperm.xlu0 %2344, %v2314_v42   ;;  %392 = vperm.xlu1 %2343, %v2314_v42   ;;  %v2730_v7 = vrot.slane %v2314_v42, %v2587_v33  ;;  %v2733_v10 = vrot.slane %v2314_v42, %v943_v34  ;;  %v2743_v12 = vrot.slane %v2314_v42, %v2596_v35 }
 0x232   :  { %v2711_v48 = vpop.f32.mrf.mxu1  ;;  %v2747_v13 = vrot.slane %v2314_v42, %v931_v63  ;;  %v992_v14 = vrot.slane %v2314_v42, %v2575_v28  ;;  %v2766_v15 = vrot.slane %v2314_v42, %v907_v1 }
 0x233   :  { %v2717_v2 = vrot.slane %v2711_v48, %v943_v34  ;;  %v2720_v3 = vrot.slane %v2711_v48, %v931_v63  ;;  %v2723_v4 = vrot.slane %v2711_v48, %v919_v0  ;;  %v2726_v6 = vrot.slane %v2711_v48, %v907_v1  ;;  %4144 = vst [vmem:[#allocation11_spill] sm:$0xff] %v2733_v10 }
 0x234   :  { %v2800_v29 = vrot.slane %v2711_v48, %v2587_v33  ;;  %v2825_v37 = vrot.slane %v2711_v48, %v2596_v35 }
 0x235   :  { %4143 = vst [vmem:[#allocation10_spill] sm:$0xff] %v2717_v2  ;;  %2349 = vset.pattern.permute.xlu0 %v2463_v5  ;;  %2345 = vset.pattern.permute.xlu1 %v2463_v5 }
 0x236   :  { %428 = vperm.xlu1 %2345, %v2314_v42   ;;  %424 = vperm.xlu0 %2349, %v2711_v48  }
 0x23a   :  { %2346 = vset.pattern.permute.xlu1 %v2464_v8  ;;  %959 = vbcast.lane.b32.xlu0 %v2730_v7, 258 }
 0x23b   :  { %438 = vperm.xlu1 %2346, %v2314_v42   ;;  %2351 = vset.pattern.permute.xlu0 %v2464_v8 }
 0x23e   :  { %1043 = vbcast.lane.b32.xlu0 %v2733_v10, 258 }
 0x23f   :  { %2347 = vset.pattern.permute.xlu1 %v2462_v25  ;;  %v2757_v25 = vrot.slane %v2314_v42, %v919_v0 }
 0x240   :  { %387 = vperm.xlu1 %2347, %v2711_v48  }
 0x242   :  { %1227 = vbcast.lane.b32.xlu0 %v2730_v7, 292 }
 0x244   :  { %2348 = vset.pattern.permute.xlu1 %v2461_v24  ;;  %v980_v24 = vrot.slane %v2314_v42, %v2599_v36 }
 0x245   :  { %402 = vperm.xlu1 %2348, %v2711_v48  }
 0x246   :  { %1283 = vbcast.lane.b32.xlu0 %v2733_v10, 292 }
 0x249   :  { %2350 = vset.pattern.permute.xlu1 %v2464_v8 }
 0x24a   :  { %971 = vbcast.lane.b32.xlu0 %v2743_v12, 258  ;;  %434 = vperm.xlu1 %2350, %v2711_v48  }
 0x24e   :  { %1031 = vbcast.lane.b32.xlu0 %v2747_v13, 258  ;;  %963 = vbcast.lane.b32.xlu1 %v2730_v7, 266 }
 0x252   :  { %1235 = vbcast.lane.b32.xlu0 %v2743_v12, 292  ;;  %1047 = vbcast.lane.b32.xlu1 %v2733_v10, 266 }
 0x256   :  { %1275 = vbcast.lane.b32.xlu0 %v2747_v13, 292  ;;  %1231 = vbcast.lane.b32.xlu1 %v2730_v7, 300 }
 0x25a   :  { %983 = vbcast.lane.b32.xlu0 %v980_v24, 258  ;;  %1287 = vbcast.lane.b32.xlu1 %v2733_v10, 300 }
 0x25e   :  { %1019 = vbcast.lane.b32.xlu0 %v2757_v25, 258  ;;  %975 = vbcast.lane.b32.xlu1 %v2743_v12, 266 }
 0x262   :  { %1243 = vbcast.lane.b32.xlu0 %v980_v24, 292  ;;  %1035 = vbcast.lane.b32.xlu1 %v2747_v13, 266 }
 0x266   :  { %1267 = vbcast.lane.b32.xlu0 %v2757_v25, 292  ;;  %1239 = vbcast.lane.b32.xlu1 %v2743_v12, 300 }
 0x26a   :  { %995 = vbcast.lane.b32.xlu0 %v992_v14, 258  ;;  %1279 = vbcast.lane.b32.xlu1 %v2747_v13, 300 }
 0x26e   :  { %1007 = vbcast.lane.b32.xlu0 %v2766_v15, 258  ;;  %987 = vbcast.lane.b32.xlu1 %v980_v24, 266 }
 0x272   :  { %1251 = vbcast.lane.b32.xlu0 %v992_v14, 292  ;;  %1023 = vbcast.lane.b32.xlu1 %v2757_v25, 266 }
 0x276   :  { %1259 = vbcast.lane.b32.xlu0 %v2766_v15, 292  ;;  %1247 = vbcast.lane.b32.xlu1 %v980_v24, 300 }
 0x27a   :  { %1419 = vbcast.lane.b32.xlu0 %v2730_v7, 274  ;;  %1271 = vbcast.lane.b32.xlu1 %v2757_v25, 300 }
 0x27e   :  { %1427 = vbcast.lane.b32.xlu0 %v2743_v12, 274  ;;  %999 = vbcast.lane.b32.xlu1 %v992_v14, 266 }
 0x282   :  { %1435 = vbcast.lane.b32.xlu0 %v980_v24, 274  ;;  %1011 = vbcast.lane.b32.xlu1 %v2766_v15, 266 }
 0x286   :  { %1443 = vbcast.lane.b32.xlu0 %v992_v14, 274  ;;  %1255 = vbcast.lane.b32.xlu1 %v992_v14, 300 }
 0x28a   :  { %1451 = vbcast.lane.b32.xlu0 %v2766_v15, 274  ;;  %1263 = vbcast.lane.b32.xlu1 %v2766_v15, 300 }
 0x28e   :  { %1459 = vbcast.lane.b32.xlu0 %v2757_v25, 274  ;;  %1423 = vbcast.lane.b32.xlu1 %v2730_v7, 282 }
 0x292   :  { %1467 = vbcast.lane.b32.xlu0 %v2747_v13, 274  ;;  %1431 = vbcast.lane.b32.xlu1 %v2743_v12, 282 }
 0x296   :  { %1475 = vbcast.lane.b32.xlu0 %v2733_v10, 274  ;;  %1439 = vbcast.lane.b32.xlu1 %v980_v24, 282 }
 0x29a   :  { %1547 = vbcast.lane.b32.xlu0 %v2730_v7, 308  ;;  %1447 = vbcast.lane.b32.xlu1 %v992_v14, 282 }
 0x29e   :  { %1555 = vbcast.lane.b32.xlu0 %v2743_v12, 308  ;;  %1455 = vbcast.lane.b32.xlu1 %v2766_v15, 282 }
 0x2a2   :  { %1563 = vbcast.lane.b32.xlu0 %v980_v24, 308  ;;  %1463 = vbcast.lane.b32.xlu1 %v2757_v25, 282 }
 0x2a6   :  { %1571 = vbcast.lane.b32.xlu0 %v992_v14, 308  ;;  %1471 = vbcast.lane.b32.xlu1 %v2747_v13, 282 }
 0x2aa   :  { %1579 = vbcast.lane.b32.xlu0 %v2766_v15, 308  ;;  %1479 = vbcast.lane.b32.xlu1 %v2733_v10, 282 }
 0x2ac   :  { %v407_v17 = vpop.permute.xlu0 %406  ;;  %v393_v18 = vpop.permute.xlu1 %392 }
 0x2ad   :  { %v414_v23 = vmul.f32 %v412_v19, %v407_v17  ;;  %v400_v26 = vmul.f32 %v398_v20, %v393_v18  ;;  %v2855_v18 = vrot.slane %v2711_v48, %v2599_v36  ;;  %v2465_v36 = vmov 1966171168  }
 0x2ae   :  { %1587 = vbcast.lane.b32.xlu0 %v2757_v25, 308  ;;  %1551 = vbcast.lane.b32.xlu1 %v2730_v7, 316 }
 0x2af   :  { %v416_v38 = vadd.f32 %v414_v23, %v400_v26  ;;  %v483_v26 = vunpack.c.l.s4 %v2465_v36  ;;  %v2914_v36 = vld [vmem:[%s4095_s1 + $0x29] sm:$0xff] }
 0x2b1   :  { %v429_v21 = vpop.permute.xlu1 %428  ;;  %v425_v22 = vpop.permute.xlu0 %424  ;;  %v422_v39 = vadd.f32 %v2229_v45, %v416_v38 }
 0x2b2   :  { %1595 = vbcast.lane.b32.xlu0 %v2747_v13, 308  ;;  %1559 = vbcast.lane.b32.xlu1 %v2743_v12, 316  ;;  %v432_v43 = vmul.f32 %v429_v21, %v398_v20  ;;  %v431_v34 = vmul.f32 %v425_v22, %v398_v20 }
 0x2b5   :  { %v2802_v30 = vpop.permute.xlu0 %959 }
 0x2b6   :  { %v439_v31 = vpop.permute.xlu1 %438  ;;  %1567 = vbcast.lane.b32.xlu1 %v980_v24, 316  ;;  %863 = vbcast.lane.b32.xlu0 %v2800_v29, 258 }
 0x2b7   :  { %v442_v44 = vmul.f32 %v439_v31, %v412_v19 }
 0x2b9   :  { %v444_v46 = vadd.f32 %v442_v44, %v432_v43  ;;  %v2808_v47 = vpop.permute.xlu0 %1043  ;;  %v484_v44 = vunpack.c.0.s8 %v483_v26 }
 0x2ba   :  { %1575 = vbcast.lane.b32.xlu1 %v992_v14, 316  ;;  %947 = vbcast.lane.b32.xlu0 %v2717_v2, 258 }
 0x2bb   :  { %v446_v49 = vadd.f32 %v2229_v45, %v444_v46  ;;  %v388_v50 = vpop.permute.xlu1 %387 }
 0x2bc   :  { %v399_v57 = vmul.f32 %v398_v20, %v388_v50 }
 0x2bd   :  { %v2812_v51 = vsel %vm161_vm1, %v422_v39, %v446_v49  ;;  %v2814_v52 = vpop.permute.xlu0 %1227 }
 0x2be   :  { %v452_v40 = vand.u32 2147483647, %v2812_v51  ;;  %1583 = vbcast.lane.b32.xlu1 %v2766_v15, 316  ;;  %1163 = vbcast.lane.b32.xlu0 %v2800_v29, 292 }
 0x2c0   :  { %v454_v53 = vsub.f32 0.0, %v452_v40  ;;  %v403_v55 = vpop.permute.xlu1 %402 }
 0x2c1   :  { %v413_v54 = vmul.f32 %v412_v19, %v403_v55  ;;  %v2819_v56 = vpop.permute.xlu0 %1283  ;;  %v2884_v55 = vsub.s32 %v484_v44, %v2572_v27 }
 0x2c2   :  { %v457_v41 = vmul.f32 1.442695, %v454_v53  ;;  %1591 = vbcast.lane.b32.xlu1 %v2757_v25, 316  ;;  %1219 = vbcast.lane.b32.xlu0 %v2717_v2, 292 }
 0x2c3   :  { %v415_v58 = vadd.f32 %v413_v54, %v399_v57  ;;  %4146 = vst [vmem:[#allocation13_spill] sm:$0xff] %v2884_v55  ;;  %v450_v57 = vmax.f32 %v2812_v51, 0.0 }
 0x2c4   :  { %2356 = vpow2.f32 %v457_v41  ;;  %v2889_v41 = vrot.slane %v2711_v48, %v2575_v28 }
 0x2c5   :  { %v421_v60 = vadd.f32 %v2229_v45, %v415_v58  ;;  %v2827_v61 = vpop.permute.xlu0 %971  ;;  %v435_v42 = vpop.permute.xlu1 %434 }
 0x2c6   :  { %v441_v63 = vmul.f32 %v435_v42, %v412_v19  ;;  %1599 = vbcast.lane.b32.xlu1 %v2747_v13, 316  ;;  %875 = vbcast.lane.b32.xlu0 %v2825_v37, 258  ;;  %4147 = vst [vmem:[#allocation14_spill] sm:$0xff] %v2889_v41 }
 0x2c8   :  { %v443_v0 = vadd.f32 %v441_v63, %v431_v34 }
 0x2c9   :  { %v2831_v1 = vpop.permute.xlu0 %1031  ;;  %v2833_v5 = vpop.permute.xlu1 %963 }
 0x2ca   :  { %v445_v7 = vadd.f32 %v2229_v45, %v443_v0  ;;  %867 = vbcast.lane.b32.xlu1 %v2800_v29, 266  ;;  %935 = vbcast.lane.b32.xlu0 %v2720_v3, 258 }
 0x2cc   :  { %v2838_v35 = vsel %vm161_vm1, %v421_v60, %v445_v7 }
 0x2cd   :  { %v451_v8 = vand.u32 2147483647, %v2838_v35  ;;  %v2841_v12 = vpop.permute.xlu0 %1235  ;;  %v2843_v13 = vpop.permute.xlu1 %1047 }
 0x2ce   :  { %951 = vbcast.lane.b32.xlu1 %v2717_v2, 266  ;;  %1171 = vbcast.lane.b32.xlu0 %v2825_v37, 292 }
 0x2cf   :  { %v453_v24 = vsub.f32 0.0, %v451_v8 }
 0x2d1   :  { %v2357_v25 = vpop.eup %2356  ;;  %v2847_v14 = vpop.permute.xlu0 %1275  ;;  %v455_v17 = vmul.f32 1.442695, %v453_v24 }
 0x2d2   :  { %v2849_v15 = vpop.permute.xlu1 %1231  ;;  %v468_v16 = vadd.f32 1.0, %v2357_v25  ;;  %1167 = vbcast.lane.b32.xlu1 %v2800_v29, 300  ;;  %1211 = vbcast.lane.b32.xlu0 %v2720_v3, 292  ;;  %v471_v23 = vmul.f32 -0.5, %v2357_v25  ;;  %v474_v45 = vand.u32 2147483647, %v2357_v25 }
 0x2d4   :  { %2358 = vlog2.f32 %v468_v16  ;;  %v472_v43 = vadd.f32 1.0, %v471_v23  ;;  %vm475_vm0 = vcmp.lt.f32.partialorder %v474_v45, 0.0004427343  ;;  %v2920_v45 = vld [vmem:[%s4095_s1 + $0x31] sm:$0xff] }
 0x2d5   :  { %v2857_v19 = vpop.permute.xlu0 %983  ;;  %2360 = vpow2.f32 %v455_v17 }
 0x2d6   :  { %v2859_v20 = vpop.permute.xlu1 %1287  ;;  %1223 = vbcast.lane.b32.xlu1 %v2717_v2, 300  ;;  %887 = vbcast.lane.b32.xlu0 %v2855_v18, 258  ;;  %v473_v40 = vmul.f32 %v2357_v25, %v472_v43 }
 0x2d9   :  { %v2863_v21 = vpop.permute.xlu0 %1019 }
 0x2da   :  { %v2865_v22 = vpop.permute.xlu1 %975  ;;  %879 = vbcast.lane.b32.xlu1 %v2825_v37, 266  ;;  %923 = vbcast.lane.b32.xlu0 %v2723_v4, 258 }
 0x2dd   :  { %v2869_v31 = vpop.permute.xlu0 %1243 }
 0x2de   :  { %v2871_v38 = vpop.permute.xlu1 %1035  ;;  %939 = vbcast.lane.b32.xlu1 %v2720_v3, 266  ;;  %1179 = vbcast.lane.b32.xlu0 %v2855_v18, 292 }
 0x2df   :  { %4145 = vst [vmem:[#allocation12_spill] sm:$0xff] %v2871_v38 }
 0x2e1   :  { %v2359_v46 = vpop.eup %2358  ;;  %v2875_v39 = vpop.permute.xlu0 %1267 }
 0x2e2   :  { %v2877_v49 = vpop.permute.xlu1 %1239  ;;  %v470_v50 = vmul.f32 0.6931472, %v2359_v46  ;;  %1175 = vbcast.lane.b32.xlu1 %v2825_v37, 300  ;;  %1203 = vbcast.lane.b32.xlu0 %v2723_v4, 292  ;;  %v2881_v53 = vpop.eup %2360 }
 0x2e3   :  { %v459_v34 = vadd.f32 1.0, %v2881_v53  ;;  %v462_v0 = vmul.f32 -0.5, %v2881_v53 }
 0x2e4   :  { %v476_v54 = vsel %vm475_vm0, %v473_v40, %v470_v50 }
 0x2e5   :  { %v478_v58 = vadd.f32 %v476_v54, %v450_v57  ;;  %v2891_v60 = vpop.permute.xlu0 %995  ;;  %2362 = vlog2.f32 %v459_v34  ;;  %v463_v44 = vadd.f32 1.0, %v462_v0 }
 0x2e6   :  { %4148 = vst [vmem:[#allocation15_spill] sm:$0xff] %v2891_v60  ;;  %v2893_v42 = vpop.permute.xlu1 %1279  ;;  %1215 = vbcast.lane.b32.xlu1 %v2720_v3, 300  ;;  %899 = vbcast.lane.b32.xlu0 %v2889_v41, 258 }
 0x2e7   :  { %4149 = vst [vmem:[#allocation16_spill] sm:$0xff] %v2893_v42  ;;  %v530_v27 = vcombine.high %v478_v58, %v478_v58  ;;  %v537_v51 = vrot.slane %v478_v58, %v2884_v55  ;;  %v756_v63 = vmul.f32 %v478_v58, %v2707_v62 }
 0x2e9   :  { %v544_v28 = vrot.slane %v530_v27, %v2884_v55  ;;  %v545_v48 = vcombine.high %v537_v51, %v537_v51  ;;  %v553_v7 = vrot.slane %v537_v51, %v2884_v55  ;;  %v2903_v8 = vpop.permute.xlu0 %1007  ;;  %v808_v43 = vcombine.high %v756_v63, %v756_v63 }
 0x2ea   :  { %4150 = vst [vmem:[#allocation17_spill] sm:$0xff] %v2903_v8  ;;  %v2905_v24 = vpop.permute.xlu1 %987  ;;  %891 = vbcast.lane.b32.xlu1 %v2855_v18, 266  ;;  %911 = vbcast.lane.b32.xlu0 %v2726_v6, 258  ;;  %v815_v57 = vrot.slane %v756_v63, %v2884_v55  ;;  %v465_v27 = vand.u32 2147483647, %v2881_v53 }
 0x2eb   :  { %4151 = vst [vmem:[#allocation18_spill] sm:$0xff] %v2905_v24  ;;  %v546_v25 = vcombine.high %v544_v28, %v544_v28  ;;  %v560_v16 = vrot.slane %v544_v28, %v2884_v55  ;;  %v567_v17 = vrot.slane %v545_v48, %v2884_v55  ;;  %v575_v23 = vcombine.high %v553_v7, %v553_v7 }
 0x2ec   :  { %v614_v26 = vrot.slane %v553_v7, %v2587_v33  ;;  %vm2958_vm3 = vcmp.lt.f32.partialorder %v465_v27, 0.0004427343 }
 0x2ed   :  { %v574_v46 = vrot.slane %v546_v25, %v2884_v55  ;;  %v577_v50 = vcombine.high %v567_v17, %v567_v17  ;;  %v618_v40 = vrot.slane %v567_v17, %v2587_v33  ;;  %v2925_v54 = vpop.permute.xlu0 %1251  ;;  %v576_v34 = vcombine.high %v560_v16, %v560_v16 }
 0x2ee   :  { %4152 = vst [vmem:[#allocation19_spill] sm:$0xff] %v2925_v54  ;;  %v2927_v58 = vpop.permute.xlu1 %1023  ;;  %927 = vbcast.lane.b32.xlu1 %v2723_v4, 266  ;;  %v622_v0 = vrot.slane %v575_v23, %v2587_v33  ;;  %v675_v48 = vmul.f32 %v614_v26, %v2914_v36  ;;  %1187 = vbcast.lane.b32.xlu0 %v2889_v41, 292 }
 0x2ef   :  { %4153 = vst [vmem:[#allocation20_spill] sm:$0xff] %v2927_v58  ;;  %v578_v51 = vcombine.high %v574_v46, %v574_v46  ;;  %v626_v28 = vrot.slane %v577_v50, %v2587_v33  ;;  %v630_v63 = vrot.slane %v560_v16, %v2587_v33  ;;  %v676_v7 = vmul.f32 %v614_v26, %v2920_v45 }
 0x2f0   :  { %v2939_v17 = vmul.f32 %v2881_v53, %v463_v44  ;;  %v634_v62 = vrot.slane %v574_v46, %v2587_v33  ;;  %v677_v11 = vmul.f32 %v618_v40, %v2914_v36  ;;  %v822_v23 = vrot.slane %v808_v43, %v2884_v55 }
 0x2f1   :  { %v2945_v50 = vrot.slane %v815_v57, %v2884_v55  ;;  %v2947_v9 = vpop.permute.xlu0 %1259  ;;  %v638_v16 = vrot.slane %v576_v34, %v2587_v33  ;;  %v642_v26 = vrot.slane %v578_v51, %v2587_v33  ;;  %v678_v53 = vmul.f32 %v618_v40, %v2920_v45 }
 0x2f2   :  { %4154 = vst [vmem:[#allocation21_spill] sm:$0xff] %v2947_v9  ;;  %v2949_v10 = vpop.permute.xlu1 %1247  ;;  %v823_v44 = vcombine.high %v815_v57, %v815_v57  ;;  %1183 = vbcast.lane.b32.xlu1 %v2855_v18, 300  ;;  %v679_v46 = vmul.f32 %v622_v0, %v2914_v36  ;;  %v680_v43 = vmul.f32 %v622_v0, %v2920_v45  ;;  %v723_v59 = vmul.f32 1.442695, %v675_v48 }
 0x2f3   :  { %4155 = vst [vmem:[#allocation22_spill] sm:$0xff] %v2949_v10  ;;  %v681_v25 = vmul.f32 %v626_v28, %v2914_v36  ;;  %1195 = vbcast.lane.b32.xlu0 %v2726_v6, 292  ;;  %v682_v34 = vmul.f32 %v626_v28, %v2920_v45  ;;  %v683_v40 = vmul.f32 %v630_v63, %v2914_v36  ;;  %v725_v51 = vmul.f32 1.442695, %v676_v7 }
 0x2f4   :  { %v684_v57 = vmul.f32 %v630_v63, %v2920_v45  ;;  %v685_v10 = vmul.f32 %v634_v62, %v2914_v36  ;;  %v686_v0 = vmul.f32 %v634_v62, %v2920_v45  ;;  %v727_v9 = vmul.f32 1.442695, %v677_v11  ;;  %v2363_v63 = vpop.eup %2362 }
 0x2f5   :  { %v824_v8 = vcombine.high %v822_v23, %v822_v23  ;;  %v2968_v48 = vpop.permute.xlu0 %1419  ;;  %v687_v54 = vmul.f32 %v638_v16, %v2914_v36  ;;  %v688_v24 = vmul.f32 %v638_v16, %v2920_v45  ;;  %v689_v28 = vmul.f32 %v642_v26, %v2914_v36 }
 0x2f6   :  { %4158 = vst [vmem:[#allocation23_spill] sm:$0xff] %v2968_v48  ;;  %v2970_v27 = vpop.permute.xlu1 %1271  ;;  %v690_v60 = vmul.f32 %v642_v26, %v2920_v45  ;;  %2364 = vpow2.f32 %v723_v59  ;;  %v729_v7 = vmul.f32 1.442695, %v678_v53  ;;  %v731_v42 = vmul.f32 1.442695, %v679_v46  ;;  %1207 = vbcast.lane.b32.xlu1 %v2723_v4, 300 }
 0x2f7   :  { %4159 = vst [vmem:[#allocation24_spill] sm:$0xff] %v2970_v27  ;;  %v733_v38 = vmul.f32 1.442695, %v680_v43  ;;  %2366 = vpow2.f32 %v725_v51  ;;  %v735_v11 = vmul.f32 1.442695, %v681_v25  ;;  %v2981_v27 = vrot.slane %v824_v8, %v2884_v55  ;;  %1355 = vbcast.lane.b32.xlu0 %v2800_v29, 274 }
 0x2f8   :  { %v737_v62 = vmul.f32 1.442695, %v682_v34  ;;  %v2976_v2 = vmul.f32 1.442695, %v683_v40  ;;  %2368 = vpow2.f32 %v727_v9  ;;  %v2978_v48 = vmul.f32 1.442695, %v684_v57 }
 0x2f9   :  { %v2984_v16 = vrot.slane %v823_v44, %v2884_v55  ;;  %v2988_v59 = vpop.permute.xlu0 %1427  ;;  %v743_v25 = vmul.f32 1.442695, %v685_v10  ;;  %v2992_v53 = vmul.f32 1.442695, %v686_v0  ;;  %v461_v9 = vmul.f32 0.6931472, %v2363_v63 }
 0x2fa   :  { %4160 = vst [vmem:[#allocation25_spill] sm:$0xff] %v2988_v59  ;;  %v2990_v26 = vpop.permute.xlu1 %999  ;;  %v2995_v46 = vrot.slane %v822_v23, %v2884_v55  ;;  %2370 = vpow2.f32 %v729_v7  ;;  %v747_v8 = vmul.f32 1.442695, %v687_v54  ;;  %v749_v43 = vmul.f32 1.442695, %v688_v24  ;;  %903 = vbcast.lane.b32.xlu1 %v2889_v41, 266 }
 0x2fb   :  { %4161 = vst [vmem:[#allocation26_spill] sm:$0xff] %v2990_v26  ;;  %v856_v44 = vcombine.high %v2981_v27, %v2981_v27  ;;  %2372 = vpow2.f32 %v731_v42  ;;  %v3001_v34 = vrot.slane %v2945_v50, %v2587_v33  ;;  %v467_v10 = vsel %vm2958_vm3, %v2939_v17, %v461_v9  ;;  %1363 = vbcast.lane.b32.xlu0 %v2825_v37, 274 }
 0x2fc   :  { %4162 = vst [vmem:[#allocation27_spill] sm:$0xff] %v2995_v46  ;;  %v854_v40 = vcombine.high %v2995_v46, %v2995_v46  ;;  %2374 = vpow2.f32 %v733_v38  ;;  %v3013_v24 = vrot.slane %v2984_v16, %v2587_v33  ;;  %v4163_v42 = vmax.f32 %v2838_v35, 0.0 }
 0x2fd   :  { %v3009_v23 = vrot.slane %v856_v44, %v2587_v33  ;;  %v3021_v58 = vpop.permute.xlu0 %1435  ;;  %2376 = vpow2.f32 %v735_v11  ;;  %v751_v38 = vmul.f32 1.442695, %v689_v28  ;;  %v753_v57 = vmul.f32 1.442695, %v690_v60 }
 0x2fe   :  { %v3017_v54 = vadd.f32 %v467_v10, %v4163_v42  ;;  %4165 = vst [vmem:[#allocation29_spill] sm:$0xff] %v3021_v58  ;;  %v3023_v17 = vpop.permute.xlu1 %1011  ;;  %v3026_v51 = vrot.slane %v854_v40, %v2587_v33  ;;  %2378 = vpow2.f32 %v737_v62  ;;  %v3036_v7 = vmul.f32 %v3001_v34, %v2802_v30  ;;  %915 = vbcast.lane.b32.xlu1 %v2726_v6, 266 }
 0x2ff   :  { %4166 = vst [vmem:[#allocation30_spill] sm:$0xff] %v3023_v17  ;;  %v1159_v35 = vmul.f32 %v3009_v23, %v2808_v47  ;;  %v1319_v0 = vmul.f32 %v2819_v56, %v3009_v23  ;;  %2380 = vpow2.f32 %v743_v25  ;;  %v3040_v60 = vmul.f32 %v2814_v52, %v3001_v34  ;;  %1371 = vbcast.lane.b32.xlu0 %v2855_v18, 274 }
 0x300   :  { %4164 = vst [vmem:[#allocation28_spill] sm:$0xff] %v3017_v54  ;;  %v481_v63 = vcombine.high %v3017_v54, %v3017_v54  ;;  %v488_v28 = vrot.slane %v3017_v54, %v2884_v55  ;;  %2382 = vpow2.f32 %v747_v8  ;;  %v3046_v47 = vmul.f32 %v3013_v24, %v2827_v61 }
 0x301   :  { %v3051_v11 = vmul.f32 %v3026_v51, %v2831_v1  ;;  %v3055_v30 = vpop.permute.xlu0 %1443  ;;  %2384 = vpow2.f32 %v749_v43  ;;  %v3062_v61 = vmul.f32 %v2841_v12, %v3013_v24  ;;  %v3065_v1 = vsel %vm161_vm1, %v1159_v35, %v1319_v0 }
 0x302   :  { %v495_v56 = vrot.slane %v481_v63, %v2884_v55  ;;  %4167 = vst [vmem:[#allocation31_spill] sm:$0xff] %v3055_v30  ;;  %v3057_v52 = vpop.permute.xlu1 %1255  ;;  %v496_v62 = vcombine.high %v488_v28, %v488_v28  ;;  %v504_v25 = vrot.slane %v488_v28, %v2884_v55  ;;  %2386 = vpow2.f32 %v751_v38  ;;  %4169 = vst [vmem:[#allocation33_spill] sm:$0xff] %v3065_v1 }
 0x303   :  { %4168 = vst [vmem:[#allocation32_spill] sm:$0xff] %v3057_v52  ;;  %v3068_v44 = vpop.eup %2364  ;;  %2388 = vpow2.f32 %v753_v57  ;;  %v1317_v35 = vmul.f32 %v2847_v14, %v3026_v51  ;;  %1191 = vbcast.lane.b32.xlu1 %v2889_v41, 300  ;;  %1379 = vbcast.lane.b32.xlu0 %v2889_v41, 274 }
 0x304   :  { %v497_v9 = vcombine.high %v495_v56, %v495_v56  ;;  %v511_v8 = vrot.slane %v495_v56, %v2884_v55  ;;  %4170 = vst [vmem:[#allocation34_spill] sm:$0xff] %v3068_v44  ;;  %v518_v10 = vrot.slane %v496_v62, %v2884_v55  ;;  %v526_v43 = vcombine.high %v504_v25, %v504_v25  ;;  %v3072_v42 = vpop.eup %2366 }
 0x305   :  { %v582_v40 = vrot.slane %v504_v25, %v2587_v33  ;;  %4171 = vst [vmem:[#allocation35_spill] sm:$0xff] %v3072_v42  ;;  %v3079_v0 = vpop.permute.xlu0 %1451  ;;  %v3083_v28 = vpop.eup %2368  ;;  %2390 = vpow2.f32 %v2976_v2  ;;  %v3143_v2 = vsel %vm161_vm1, %v3051_v11, %v1317_v35 }
 0x306   :  { %v525_v12 = vrot.slane %v497_v9, %v2884_v55  ;;  %v527_v63 = vcombine.high %v511_v8, %v511_v8  ;;  %v598_v38 = vrot.slane %v511_v8, %v2587_v33  ;;  %4172 = vst [vmem:[#allocation36_spill] sm:$0xff] %v3079_v0  ;;  %v3081_v57 = vpop.permute.xlu1 %1263  ;;  %v528_v56 = vcombine.high %v518_v10, %v518_v10 }
 0x307   :  { %4173 = vst [vmem:[#allocation37_spill] sm:$0xff] %v3081_v57  ;;  %v586_v62 = vrot.slane %v518_v10, %v2587_v33  ;;  %v590_v25 = vrot.slane %v526_v43, %v2587_v33  ;;  %v659_v9 = vmul.f32 %v582_v40, %v2914_v36  ;;  %v660_v54 = vmul.f32 %v582_v40, %v2920_v45  ;;  %v3092_v0 = vpop.eup %2370 }
 0x308   :  { %v529_v8 = vcombine.high %v525_v12, %v525_v12  ;;  %v602_v14 = vrot.slane %v525_v12, %v2587_v33  ;;  %v606_v55 = vrot.slane %v527_v63, %v2587_v33  ;;  %v594_v30 = vrot.slane %v528_v56, %v2587_v33  ;;  %v3098_v59 = vpop.eup %2372  ;;  %1199 = vbcast.lane.b32.xlu1 %v2726_v6, 300 }
 0x309   :  { %v661_v58 = vmul.f32 %v586_v62, %v2914_v36  ;;  %v662_v10 = vmul.f32 %v586_v62, %v2920_v45  ;;  %v663_v43 = vmul.f32 %v590_v25, %v2914_v36  ;;  %v664_v12 = vmul.f32 %v590_v25, %v2920_v45  ;;  %v3105_v26 = vpop.permute.xlu0 %1459  ;;  %v3109_v57 = vpop.eup %2374  ;;  %1387 = vbcast.lane.b32.xlu0 %v2726_v6, 274 }
 0x30a   :  { %v610_v17 = vrot.slane %v529_v8, %v2587_v33  ;;  %v667_v63 = vmul.f32 %v598_v38, %v2914_v36  ;;  %v668_v40 = vmul.f32 %v598_v38, %v2920_v45  ;;  %4174 = vst [vmem:[#allocation38_spill] sm:$0xff] %v3105_v26  ;;  %v3107_v56 = vpop.permute.xlu1 %1423  ;;  %4176 = vst [vmem:[#allocation40_spill] sm:$0xff] %v3109_v57  ;;  %v3116_v41 = vpop.eup %2376  ;;  %2392 = vpow2.f32 %v2978_v48 }
 0x30b   :  { %4175 = vst [vmem:[#allocation39_spill] sm:$0xff] %v3107_v56  ;;  %v665_v62 = vmul.f32 %v594_v30, %v2914_v36  ;;  %v666_v52 = vmul.f32 %v594_v30, %v2920_v45  ;;  %v669_v8 = vmul.f32 %v602_v14, %v2914_v36  ;;  %v670_v25 = vmul.f32 %v602_v14, %v2920_v45  ;;  %v3126_v46 = vpop.eup %2378 }
 0x30c   :  { %4177 = vst [vmem:[#allocation41_spill] sm:$0xff] %v3116_v41  ;;  %v671_v38 = vmul.f32 %v606_v55, %v2914_v36  ;;  %v3120_v26 = vmul.f32 %v606_v55, %v2920_v45  ;;  %v673_v56 = vmul.f32 %v610_v17, %v2914_v36  ;;  %v3124_v57 = vmul.f32 %v610_v17, %v2920_v45  ;;  %v3136_v55 = vpop.eup %2380 }
 0x30d   :  { %4178 = vst [vmem:[#allocation42_spill] sm:$0xff] %v3126_v46  ;;  %v3132_v30 = vsel %vm161_vm1, %v3036_v7, %v3040_v60  ;;  %v691_v14 = vmul.f32 1.442695, %v659_v9  ;;  %v853_v41 = vcombine.high %v2945_v50, %v2945_v50  ;;  %v693_v36 = vmul.f32 1.442695, %v660_v54  ;;  %v3145_v17 = vpop.permute.xlu0 %1467  ;;  %v3149_v60 = vpop.eup %2382  ;;  %1359 = vbcast.lane.b32.xlu1 %v2800_v29, 282 }
 0x30e   :  { %4179 = vst [vmem:[#allocation43_spill] sm:$0xff] %v3132_v30  ;;  %v1146_v45 = vmul.f32 %v3001_v34, %v2833_v5  ;;  %4180 = vst [vmem:[#allocation44_spill] sm:$0xff] %v3145_v17  ;;  %v3147_v7 = vpop.permute.xlu1 %1431  ;;  %2394 = vpow2.f32 %v2992_v53  ;;  %v1669_v50 = vsel %vm152_vm5, %v3132_v30, %v3065_v1  ;;  %v695_v48 = vmul.f32 1.442695, %v661_v58  ;;  %v3158_v54 = vpop.eup %2384  ;;  %1395 = vbcast.lane.b32.xlu0 %v2723_v4, 274 }
 0x30f   :  { %4181 = vst [vmem:[#allocation45_spill] sm:$0xff] %v3147_v7  ;;  %v1160_v5 = vmul.f32 %v3009_v23, %v2843_v13  ;;  %v697_v11 = vmul.f32 1.442695, %v662_v10  ;;  %v699_v35 = vmul.f32 1.442695, %v663_v43  ;;  %v3163_v7 = vsel %vm161_vm1, %v3046_v47, %v3062_v61  ;;  %v3165_v53 = vpop.eup %2386 }
 0x310   :  { %v701_v9 = vmul.f32 1.442695, %v664_v12  ;;  %4182 = vst [vmem:[#allocation46_spill] sm:$0xff] %v3165_v53  ;;  %2396 = vpow2.f32 %v691_v14  ;;  %v703_v17 = vmul.f32 1.442695, %v665_v62  ;;  %v1719_v13 = vsel %vm152_vm5, %v3163_v7, %v3143_v2  ;;  %v3171_v58 = vpop.eup %2388 }
 0x311   :  { %v705_v46 = vmul.f32 1.442695, %v666_v52  ;;  %4183 = vst [vmem:[#allocation47_spill] sm:$0xff] %v3171_v58  ;;  %v1667_v10 = vsel %vm152_vm5, %v3068_v44, %v3165_v53  ;;  %2398 = vpow2.f32 %v693_v36  ;;  %v707_v47 = vmul.f32 1.442695, %v667_v63  ;;  %v3179_v52 = vpop.permute.xlu0 %1475  ;;  %1367 = vbcast.lane.b32.xlu1 %v2825_v37, 282 }
 0x312   :  { %v709_v61 = vmul.f32 1.442695, %v668_v40  ;;  %4184 = vst [vmem:[#allocation48_spill] sm:$0xff] %v3179_v52  ;;  %v3181_v43 = vpop.permute.xlu1 %1439  ;;  %v1673_v12 = vmul.f32 0.0, %v1667_v10  ;;  %2400 = vpow2.f32 %v695_v48  ;;  %v711_v62 = vmul.f32 1.442695, %v669_v8 }
 0x313   :  { %v1306_v14 = vmul.f32 %v2849_v15, %v3001_v34  ;;  %v3186_v1 = vrot.slane %v853_v41, %v2587_v33  ;;  %v1668_v63 = vsel %vm152_vm5, %v3072_v42, %v3171_v58  ;;  %v1320_v40 = vmul.f32 %v2859_v20, %v3009_v23  ;;  %1403 = vbcast.lane.b32.xlu0 %v2720_v3, 274  ;;  %v4205_v42 = vld [vmem:[#allocation24_spill] sm:$0xff] }
 0x314   :  { %v3196_v36 = vrot.slane %v2981_v27, %v2587_v33  ;;  %v3198_v48 = vadd.f32 %v1673_v12, %v1669_v50  ;;  %2402 = vpow2.f32 %v697_v11  ;;  %v3200_v8 = vmul.f32 1.442695, %v670_v25  ;;  %v4190_v12 = vld [vmem:[#allocation10_spill] sm:$0xff] }
 0x315   :  { %v3202_v15 = vmul.f32 1.442695, %v671_v38  ;;  %2404 = vpow2.f32 %v699_v35  ;;  %v1717_v41 = vsel %vm152_vm5, %v3083_v28, %v3149_v60  ;;  %v1674_v34 = vmul.f32 0.0, %v1668_v63  ;;  %v3213_v27 = vpop.permute.xlu0 %1547  ;;  %1375 = vbcast.lane.b32.xlu1 %v2855_v18, 282 }
 0x316   :  { %4185 = vst [vmem:[#allocation49_spill] sm:$0xff] %v3198_v48  ;;  %v3209_v20 = vsel %vm161_vm1, %v1160_v5, %v1320_v40  ;;  %4187 = vst [vmem:[#allocation51_spill] sm:$0xff] %v3213_v27  ;;  %v3215_v23 = vpop.permute.xlu1 %1447  ;;  %2406 = vpow2.f32 %v701_v9  ;;  %v1723_v25 = vmul.f32 %v1717_v41, %v3198_v48  ;;  %v3219_v38 = vsel %vm161_vm1, %v1146_v45, %v1306_v14  ;;  %v4200_v27 = vld [vmem:[#allocation17_spill] sm:$0xff] }
 0x317   :  { %4186 = vst [vmem:[#allocation50_spill] sm:$0xff] %v3209_v20  ;;  %4188 = vst [vmem:[#allocation52_spill] sm:$0xff] %v3219_v38  ;;  %v1155_v50 = vmul.f32 %v3196_v36, %v2863_v21  ;;  %2408 = vpow2.f32 %v703_v17  ;;  %v719_v5 = vmul.f32 1.442695, %v673_v56  ;;  %v1149_v11 = vmul.f32 %v3186_v1, %v2857_v19  ;;  %v3237_v17 = vpop.eup %2390  ;;  %1411 = vbcast.lane.b32.xlu0 %v4190_v12, 274 }
 0x318   :  { %v1670_v35 = vsel %vm152_vm5, %v3219_v38, %v3209_v20  ;;  %v3229_v10 = vadd.f32 %v1723_v25, %v1719_v13  ;;  %v1309_v45 = vmul.f32 %v2869_v31, %v3186_v1  ;;  %v1315_v21 = vmul.f32 %v2875_v39, %v3196_v36  ;;  %v3251_v39 = vpop.eup %2392  ;;  %v4201_v38 = vld [vmem:[#allocation21_spill] sm:$0xff] }
 0x319   :  { %v3231_v9 = vadd.f32 %v1674_v34, %v1670_v35  ;;  %2410 = vpow2.f32 %v705_v46  ;;  %v1148_v19 = vmul.f32 %v3013_v24, %v2865_v22  ;;  %v1308_v56 = vmul.f32 %v2877_v49, %v3013_v24  ;;  %v3247_v31 = vpop.permute.xlu0 %1555  ;;  %v4192_v22 = vld [vmem:[#allocation12_spill] sm:$0xff] }
 0x31a   :  { %v855_v13 = vcombine.high %v2984_v16, %v2984_v16  ;;  %v3249_v14 = vpop.permute.xlu1 %1455  ;;  %2412 = vpow2.f32 %v707_v47  ;;  %v721_v46 = vmul.f32 1.442695, %v3124_v57  ;;  %v1158_v63 = vmul.f32 %v3026_v51, %v4192_v22 }
 0x31b   :  { %4189 = vst [vmem:[#allocation53_spill] sm:$0xff] %v3231_v9  ;;  %4191 = vst [vmem:[#allocation10_spill] sm:$0xff] %v3249_v14  ;;  %v3257_v49 = vsel %vm161_vm1, %v1155_v50, %v1315_v21  ;;  %v3259_v16 = vpop.eup %2394  ;;  %2414 = vpow2.f32 %v709_v61  ;;  %v1767_v24 = vsel %vm152_vm5, %v3098_v59, %v3136_v55  ;;  %v1718_v57 = vsel %vm152_vm5, %v3092_v0, %v3158_v54  ;;  %v4193_v61 = vld [vmem:[#allocation16_spill] sm:$0xff] }
 0x31c   :  { %v1096_v40 = vrot.slane %v855_v13, %v2587_v33  ;;  %v3271_v47 = vsel %vm161_vm1, %v1149_v11, %v1309_v45  ;;  %v1773_v41 = vmul.f32 %v1767_v24, %v3229_v10  ;;  %v1724_v34 = vmul.f32 %v1718_v57, %v3231_v9  ;;  %v4194_v11 = vld [vmem:[#allocation27_spill] sm:$0xff]  ;;  %v4195_v13 = vld [vmem:[#allocation14_spill] sm:$0xff]  ;;  %1483 = vbcast.lane.b32.xlu0 %v2800_v29, 308  ;;  %v4222_v14 = vld [vmem:[#allocation28_spill] sm:$0xff] }
 0x31d   :  { %v1318_v25 = vmul.f32 %v4193_v61, %v3026_v51  ;;  %v3277_v50 = vpop.eup %2396  ;;  %2416 = vpow2.f32 %v711_v62  ;;  %v1769_v35 = vsel %vm152_vm5, %v3271_v47, %v3257_v49  ;;  %v3284_v21 = vsel %vm161_vm1, %v1148_v19, %v1308_v56  ;;  %1383 = vbcast.lane.b32.xlu1 %v4195_v13, 282  ;;  %v1564_v22 = vpop.permute.xlu0 %1563  ;;  %v4197_v62 = vld [vmem:[#allocation15_spill] sm:$0xff]  ;;  %v4198_v9 = vld [vmem:[#allocation18_spill] sm:$0xff] }
 0x31e   :  { %v1100_v45 = vrot.slane %v4194_v11, %v2587_v33  ;;  %v3290_v51 = vpop.permute.xlu1 %1463  ;;  %v3292_v24 = vpop.eup %2398  ;;  %v1151_v57 = vmul.f32 %v1096_v40, %v4197_v62  ;;  %v1150_v19 = vmul.f32 %v3186_v1, %v4198_v9  ;;  %v4199_v56 = vld [vmem:[#allocation19_spill] sm:$0xff]  ;;  %v4202_v62 = vld [vmem:[#allocation22_spill] sm:$0xff]  ;;  %2418 = vpow2.f32 %v719_v5  ;;  %v4204_v9 = vld [vmem:[#allocation20_spill] sm:$0xff] }
 0x31f   :  { %4196 = vst [vmem:[#allocation12_spill] sm:$0xff] %v3290_v51  ;;  %v3296_v61 = vsel %vm161_vm1, %v1158_v63, %v1318_v25  ;;  %v1311_v48 = vmul.f32 %v4199_v56, %v1096_v40  ;;  %v3301_v11 = vpop.eup %2400  ;;  %v1310_v63 = vmul.f32 %v4202_v62, %v3186_v1  ;;  %v1156_v56 = vmul.f32 %v3196_v36, %v4204_v9 }
 0x320   :  { %v1720_v52 = vsel %vm152_vm5, %v3284_v21, %v3296_v61  ;;  %v1153_v20 = vmul.f32 %v1100_v45, %v4200_v27  ;;  %v1313_v58 = vmul.f32 %v4201_v38, %v1100_v45  ;;  %v1316_v51 = vmul.f32 %v4205_v42, %v3196_v36  ;;  %v4206_v38 = vld [vmem:[#allocation40_spill] sm:$0xff]  ;;  %1491 = vbcast.lane.b32.xlu0 %v2825_v37, 308 }
 0x321   :  { %v3311_v25 = vadd.f32 %v1724_v34, %v1720_v52  ;;  %v3317_v30 = vpop.eup %2402  ;;  %2420 = vpow2.f32 %v3200_v8  ;;  %v717_v27 = vmul.f32 1.442695, %v3120_v26  ;;  %v3321_v53 = vadd.f32 %v1773_v41, %v1769_v35  ;;  %1391 = vbcast.lane.b32.xlu1 %v2726_v6, 282  ;;  %v1572_v52 = vpop.permute.xlu0 %1571  ;;  %v4208_v36 = vld [vmem:[#allocation32_spill] sm:$0xff] }
 0x322   :  { %v1768_v1 = vsel %vm152_vm5, %v4206_v38, %v3259_v16  ;;  %v3328_v5 = vpop.permute.xlu1 %1471  ;;  %v3330_v34 = vpop.eup %2404  ;;  %2422 = vpow2.f32 %v3202_v15  ;;  %v3335_v26 = vsel %vm161_vm1, %v1156_v56, %v1316_v51  ;;  %v1312_v8 = vmul.f32 %v4208_v36, %v1096_v40  ;;  %v4210_v56 = vld [vmem:[#allocation26_spill] sm:$0xff]  ;;  %v4211_v36 = vld [vmem:[#allocation41_spill] sm:$0xff] }
 0x323   :  { %4203 = vst [vmem:[#allocation16_spill] sm:$0xff] %v3311_v25  ;;  %4207 = vst [vmem:[#allocation27_spill] sm:$0xff] %v3328_v5  ;;  %v1774_v42 = vmul.f32 %v1768_v1, %v3311_v25  ;;  %v3339_v41 = vpop.eup %2406  ;;  %v1343_v35 = vsel %vm161_vm1, %v1151_v57, %v1311_v48  ;;  %v1345_v62 = vsel %vm161_vm1, %v1153_v20, %v1313_v58  ;;  %v4209_v5 = vld [vmem:[#allocation37_spill] sm:$0xff]  ;;  %2424 = vpow2.f32 %v721_v46  ;;  %v4213_v20 = vld [vmem:[#allocation30_spill] sm:$0xff] }
 0x324   :  { %v3344_v9 = vsel %vm161_vm1, %v1150_v19, %v1310_v63  ;;  %v1314_v15 = vmul.f32 %v4209_v5, %v1100_v45  ;;  %v3347_v44 = vpop.eup %2408  ;;  %v1152_v1 = vmul.f32 %v1096_v40, %v4210_v56  ;;  %v1817_v58 = vsel %vm152_vm5, %v4211_v36, %v3237_v17  ;;  %v4216_v56 = vld [vmem:[#allocation25_spill] sm:$0xff]  ;;  %1499 = vbcast.lane.b32.xlu0 %v2855_v18, 308 }
 0x325   :  { %v1770_v51 = vsel %vm152_vm5, %v3344_v9, %v3335_v26  ;;  %2426 = vpow2.f32 %v717_v27  ;;  %v1154_v57 = vmul.f32 %v1100_v45, %v4213_v20  ;;  %1399 = vbcast.lane.b32.xlu1 %v2723_v4, 282  ;;  %v1823_v46 = vmul.f32 %v1817_v58, %v3321_v53  ;;  %v1580_v19 = vpop.permute.xlu0 %1579  ;;  %v4217_v27 = vld [vmem:[#allocation29_spill] sm:$0xff]  ;;  %v4218_v20 = vld [vmem:[#allocation31_spill] sm:$0xff] }
 0x326   :  { %v3358_v48 = vadd.f32 %v1774_v42, %v1770_v51  ;;  %v3363_v63 = vpop.permute.xlu1 %1479  ;;  %v3365_v5 = vpop.eup %2410  ;;  %v1344_v40 = vsel %vm161_vm1, %v1152_v1, %v1312_v8  ;;  %v3371_v25 = vsel %vm161_vm1, %v4216_v56, %v3247_v31  ;;  %v1629_v42 = vsel %vm161_vm1, %v4217_v27, %v1564_v22  ;;  %v4220_v27 = vld [vmem:[#allocation36_spill] sm:$0xff] }
 0x327   :  { %4214 = vst [vmem:[#allocation15_spill] sm:$0xff] %v3363_v63  ;;  %4215 = vst [vmem:[#allocation18_spill] sm:$0xff] %v3365_v5  ;;  %v1819_v45 = vsel %vm152_vm5, %v1343_v35, %v1345_v62  ;;  %v3378_v51 = vpop.eup %2412  ;;  %v1346_v58 = vsel %vm161_vm1, %v1154_v57, %v1314_v15  ;;  %v1631_v8 = vsel %vm161_vm1, %v4218_v20, %v1572_v52  ;;  %v4221_v5 = vld [vmem:[#allocation8_spill] sm:$0xff]  ;;  %v4223_v57 = vld [vmem:[#allocation42_spill] sm:$0xff] }
 0x328   :  { %4212 = vst [vmem:[#allocation14_spill] sm:$0xff] %v3358_v48  ;;  %v1825_v1 = vadd.f32 %v1823_v46, %v1819_v45  ;;  %v1867_v31 = vsel %vm152_vm5, %v3237_v17, %v4211_v36  ;;  %v3387_v56 = vpop.eup %2414  ;;  %v1869_v22 = vsel %vm152_vm5, %v1345_v62, %v1343_v35  ;;  %v1633_v63 = vsel %vm161_vm1, %v4220_v27, %v1580_v19  ;;  %v4225_v45 = vld [vmem:[#allocation38_spill] sm:$0xff]  ;;  %v4226_v27 = vld [vmem:[#allocation13_spill] sm:$0xff] }
 0x329   :  { %4219 = vst [vmem:[#allocation19_spill] sm:$0xff] %v3387_v56  ;;  %v755_v15 = vmul.f32 %v4222_v14, %v4221_v5  ;;  %v1818_v52 = vsel %vm152_vm5, %v4223_v57, %v3251_v39  ;;  %1407 = vbcast.lane.b32.xlu1 %v2720_v3, 282  ;;  %v1917_v17 = vsel %vm152_vm5, %v3136_v55, %v3098_v59  ;;  %v1588_v62 = vpop.permute.xlu0 %1587 }
 0x32a   :  { %v1873_v46 = vmul.f32 %v1867_v31, %v1825_v1  ;;  %v1919_v35 = vsel %vm152_vm5, %v3257_v49, %v3271_v47  ;;  %v3408_v14 = vpop.permute.xlu1 %1551  ;;  %v1824_v36 = vmul.f32 %v1818_v52, %v3358_v48  ;;  %v3411_v19 = vpop.eup %2416  ;;  %1507 = vbcast.lane.b32.xlu0 %v4195_v13, 308  ;;  %v1635_v20 = vsel %vm161_vm1, %v4225_v45, %v1588_v62 }
 0x32b   :  { %4224 = vst [vmem:[#allocation17_spill] sm:$0xff] %v3408_v14  ;;  %v759_v31 = vcombine.high %v755_v15, %v755_v15  ;;  %v766_v59 = vrot.slane %v755_v15, %v4226_v27  ;;  %v1820_v55 = vsel %vm152_vm5, %v1344_v40, %v1346_v58  ;;  %v1821_v49 = vsel %vm152_vm5, %v1631_v8, %v1633_v63 }
 0x32c   :  { %v1875_v5 = vadd.f32 %v1873_v46, %v1869_v22  ;;  %v1967_v47 = vsel %vm152_vm5, %v3149_v60, %v3083_v28  ;;  %v3425_v52 = vadd.f32 %v1824_v36, %v1820_v55  ;;  %v1771_v62 = vsel %vm152_vm5, %v1629_v42, %v1635_v20  ;;  %v3437_v46 = vpop.eup %2418 }
 0x32d   :  { %v3430_v45 = vrot.slane %v766_v59, %v4226_v27  ;;  %v773_v15 = vrot.slane %v759_v31, %v4226_v27  ;;  %v1868_v22 = vsel %vm152_vm5, %v3251_v39, %v4223_v57  ;;  %v1871_v28 = vsel %vm152_vm5, %v1633_v63, %v1631_v8  ;;  %1415 = vbcast.lane.b32.xlu1 %v4190_v12, 282  ;;  %v1596_v55 = vpop.permute.xlu0 %1595 }
 0x32e   :  { %v1923_v60 = vmul.f32 %v1917_v17, %v1875_v5  ;;  %v1969_v36 = vsel %vm152_vm5, %v3143_v2, %v3163_v7  ;;  %v1560_v31 = vpop.permute.xlu1 %1559  ;;  %v1874_v14 = vmul.f32 %v1868_v22, %v3425_v52  ;;  %v3447_v48 = vpop.eup %2420  ;;  %v3449_v39 = vmul.f32 %v1825_v1, %v1821_v49  ;;  %1515 = vbcast.lane.b32.xlu0 %v2726_v6, 308  ;;  %v4227_v22 = vld [vmem:[#allocation44_spill] sm:$0xff] }
 0x32f   :  { %v1921_v63 = vsel %vm152_vm5, %v1635_v20, %v1629_v42  ;;  %v775_v8 = vcombine.high %v773_v15, %v773_v15  ;;  %v1870_v57 = vsel %vm152_vm5, %v1346_v58, %v1344_v40  ;;  %v3456_v17 = vpop.eup %2422  ;;  %v3459_v7 = vmul.f32 %v3321_v53, %v1771_v62 }
 0x330   :  { %v1925_v2 = vadd.f32 %v1923_v60, %v1919_v35  ;;  %v1637_v56 = vsel %vm161_vm1, %v4227_v22, %v1596_v55  ;;  %v3463_v1 = vadd.f32 %v1874_v14, %v1870_v57  ;;  %v3467_v49 = vrot.slane %v3430_v45, %v2587_v33  ;;  %v3480_v58 = vpop.eup %2424 }
 0x331   :  { %v3470_v42 = vrot.slane %v775_v8, %v4226_v27  ;;  %v1918_v40 = vsel %vm152_vm5, %v3259_v16, %v4206_v38  ;;  %v1641_v53 = vsel %vm152_vm5, %v3277_v50, %v3437_v46  ;;  %v3482_v35 = vmul.f32 %v1875_v5, %v1871_v28  ;;  %1487 = vbcast.lane.b32.xlu1 %v2800_v29, 316  ;;  %v864_v62 = vpop.permute.xlu0 %863  ;;  %v4228_v28 = vld [vmem:[#allocation45_spill] sm:$0xff] }
 0x332   :  { %v1973_v14 = vmul.f32 %v1967_v47, %v1925_v2  ;;  %v1568_v20 = vpop.permute.xlu1 %1567  ;;  %v1920_v60 = vsel %vm152_vm5, %v3335_v26, %v3344_v9  ;;  %v1924_v16 = vmul.f32 %v1918_v40, %v3463_v1  ;;  %v3490_v38 = vpop.eup %2426  ;;  %1523 = vbcast.lane.b32.xlu0 %v2723_v4, 308  ;;  %v1721_v5 = vsel %vm152_vm5, %v3371_v25, %v1637_v56 }
 0x333   :  { %v3498_v29 = vsel %vm161_vm1, %v4228_v28, %v1560_v31  ;;  %v1129_v47 = vmul.f32 %v3467_v49, %v864_v62  ;;  %v807_v55 = vcombine.high %v3470_v42, %v3470_v42  ;;  %v1971_v26 = vsel %vm152_vm5, %v1637_v56, %v3371_v25 }
 0x334   :  { %v3506_v9 = vadd.f32 %v1924_v16, %v1920_v60  ;;  %v774_v8 = vcombine.high %v766_v59, %v766_v59  ;;  %v3509_v57 = vrot.slane %v773_v15, %v4226_v27  ;;  %v1968_v31 = vsel %vm152_vm5, %v3158_v54, %v3092_v0 }
 0x335   :  { %v3512_v22 = vrot.slane %v807_v55, %v2587_v33  ;;  %v3522_v40 = vsel %vm152_vm5, %v3301_v11, %v3456_v17  ;;  %v3528_v25 = vsel %vm152_vm5, %v3292_v24, %v3480_v58  ;;  %v1975_v56 = vadd.f32 %v1973_v14, %v1969_v36  ;;  %1495 = vbcast.lane.b32.xlu1 %v2825_v37, 316  ;;  %v948_v0 = vpop.permute.xlu0 %947  ;;  %v4229_v55 = vld [vmem:[#allocation10_spill] sm:$0xff] }
 0x336   :  { %v3531_v59 = vmul.f32 %v3229_v10, %v1721_v5  ;;  %v1576_v15 = vpop.permute.xlu1 %1575  ;;  %v1974_v54 = vmul.f32 %v1968_v31, %v3506_v9  ;;  %v3536_v62 = vrot.slane %v774_v8, %v4226_v27  ;;  %v3538_v60 = vmul.f32 %v1925_v2, %v1921_v63  ;;  %1531 = vbcast.lane.b32.xlu0 %v2720_v3, 308 }
 0x337   :  { %v1143_v16 = vmul.f32 %v3512_v22, %v948_v0  ;;  %v3542_v28 = vmul.f32 0.0, %v1641_v53  ;;  %v805_v10 = vcombine.high %v3509_v57, %v3509_v57  ;;  %v3546_v36 = vmul.f32 %v1975_v56, %v1971_v26  ;;  %v4231_v0 = vld [vmem:[#allocation46_spill] sm:$0xff] }
 0x338   :  { %v1630_v37 = vsel %vm161_vm1, %v3181_v43, %v1568_v20  ;;  %v1632_v27 = vsel %vm161_vm1, %v3215_v23, %v1576_v15  ;;  %v1970_v63 = vsel %vm152_vm5, %v3296_v61, %v3284_v21  ;;  %v3560_v53 = vrot.slane %v3536_v62, %v2587_v33  ;;  %v4230_v15 = vld [vmem:[#allocation34_spill] sm:$0xff] }
 0x339   :  { %v3556_v2 = vadd.f32 %v1974_v54, %v1970_v63  ;;  %v3566_v14 = vsel %vm152_vm5, %v3330_v34, %v3411_v19  ;;  %v3572_v43 = vsel %vm152_vm5, %v3317_v30, %v3490_v38  ;;  %1503 = vbcast.lane.b32.xlu1 %v2855_v18, 316  ;;  %v1164_v21 = vpop.permute.xlu0 %1163  ;;  %v3579_v61 = vsel %vm152_vm5, %v3339_v41, %v3447_v48  ;;  %v4232_v63 = vld [vmem:[#allocation43_spill] sm:$0xff] }
 0x33a   :  { %v1584_v23 = vpop.permute.xlu1 %1583  ;;  %v3585_v20 = vsel %vm152_vm5, %v3347_v44, %v3378_v51  ;;  %v3591_v5 = vsel %vm152_vm5, %v3378_v51, %v3347_v44  ;;  %v3597_v18 = vsel %vm152_vm5, %v3411_v19, %v3330_v34  ;;  %1539 = vbcast.lane.b32.xlu0 %v4190_v12, 308  ;;  %v1289_v8 = vmul.f32 %v1164_v21, %v3467_v49 }
 0x33b   :  { %v1634_v26 = vsel %vm161_vm1, %v4229_v55, %v1584_v23  ;;  %v3604_v31 = vrot.slane %v805_v10, %v2587_v33  ;;  %v3610_v44 = vsel %vm152_vm5, %v3456_v17, %v3301_v11  ;;  %v3620_v19 = vsel %vm152_vm5, %v3437_v46, %v3277_v50  ;;  %v4233_v23 = vld [vmem:[#allocation33_spill] sm:$0xff]  ;;  %v4234_v55 = vld [vmem:[#allocation19_spill] sm:$0xff] }
 0x33c   :  { %v1822_v34 = vsel %vm152_vm5, %v1632_v27, %v1634_v26  ;;  %v1872_v51 = vsel %vm152_vm5, %v1634_v26, %v1632_v27  ;;  %v2017_v54 = vsel %vm152_vm5, %v4231_v0, %v4230_v15  ;;  %v1321_v10 = vsel %vm161_vm1, %v1129_v47, %v1289_v8  ;;  %v4235_v26 = vld [vmem:[#allocation18_spill] sm:$0xff]  ;;  %v4237_v8 = vld [vmem:[#allocation12_spill] sm:$0xff] }
 0x33d   :  { %v1828_v11 = vmul.f32 %v3425_v52, %v1822_v34  ;;  %v1878_v17 = vmul.f32 %v3463_v1, %v1872_v51  ;;  %v2019_v27 = vsel %vm152_vm5, %v4233_v23, %v4232_v63  ;;  %1511 = vbcast.lane.b32.xlu1 %v4195_v13, 316  ;;  %v1220_v46 = vpop.permute.xlu0 %1219  ;;  %v2023_v21 = vmul.f32 %v2017_v54, %v1975_v56  ;;  %v4236_v1 = vld [vmem:[#allocation11_spill] sm:$0xff] }
 0x33e   :  { %v1592_v50 = vpop.permute.xlu1 %1591  ;;  %v3638_v15 = vsel %vm152_vm5, %v4235_v26, %v4234_v55  ;;  %v3644_v52 = vsel %vm152_vm5, %v4234_v55, %v4235_v26  ;;  %v3650_v13 = vsel %vm152_vm5, %v3447_v48, %v3339_v41  ;;  %1603 = vbcast.lane.b32.xlu0 %v4236_v1, 308  ;;  %v1303_v51 = vmul.f32 %v1220_v46, %v3512_v22  ;;  %v4242_v55 = vld [vmem:[#allocation50_spill] sm:$0xff] }
 0x33f   :  { %v1829_v47 = vadd.f32 %v1828_v11, %v3449_v39  ;;  %v1879_v56 = vadd.f32 %v1878_v17, %v3482_v35  ;;  %v1636_v34 = vsel %vm161_vm1, %v4237_v8, %v1592_v50  ;;  %v3662_v63 = vadd.f32 %v2023_v21, %v2019_v27  ;;  %v4238_v35 = vld [vmem:[#allocation14_spill] sm:$0xff]  ;;  %v4241_v21 = vld [vmem:[#allocation52_spill] sm:$0xff] }
 0x340   :  { %v1772_v0 = vsel %vm152_vm5, %v1630_v37, %v1636_v34  ;;  %v1922_v54 = vsel %vm152_vm5, %v1636_v34, %v1630_v37  ;;  %v3668_v41 = vsel %vm152_vm5, %v3490_v38, %v3317_v30  ;;  %v1335_v23 = vsel %vm161_vm1, %v1143_v16, %v1303_v51  ;;  %v4239_v30 = vld [vmem:[#allocation35_spill] sm:$0xff] }
 0x341   :  { %v1830_v48 = vrot.slane %v1829_v47, 4  ;;  %v1880_v39 = vrot.slane %v1879_v56, 4  ;;  %v1778_v11 = vmul.f32 %v4238_v35, %v1772_v0  ;;  %v1928_v17 = vmul.f32 %v3506_v9, %v1922_v54  ;;  %1519 = vbcast.lane.b32.xlu1 %v2726_v6, 316  ;;  %v876_v37 = vpop.permute.xlu0 %875  ;;  %v4240_v38 = vld [vmem:[#allocation47_spill] sm:$0xff] }
 0x342   :  { %v1600_v50 = vpop.permute.xlu1 %1599  ;;  %v3678_v27 = vsel %vm152_vm5, %v3480_v58, %v3292_v24  ;;  %v2018_v46 = vsel %vm152_vm5, %v4240_v38, %v4239_v30  ;;  %v2020_v6 = vsel %vm152_vm5, %v4242_v55, %v4241_v21  ;;  %v1643_v24 = vsel %vm152_vm5, %v1321_v10, %v1335_v23  ;;  %v4243_v34 = vld [vmem:[#allocation27_spill] sm:$0xff] }
 0x343   :  { %v1831_v9 = vadd.f32 %v1830_v48, %v1829_v47  ;;  %v1881_v16 = vadd.f32 %v1880_v39, %v1879_v56  ;;  %v1779_v26 = vadd.f32 %v1778_v11, %v3459_v7  ;;  %v1929_v8 = vadd.f32 %v1928_v17, %v3538_v60 }
 0x344   :  { %v3694_v58 = vsel %vm152_vm5, %v1335_v23, %v1321_v10  ;;  %v1638_v51 = vsel %vm161_vm1, %v4243_v34, %v1600_v50  ;;  %v1131_v0 = vmul.f32 %v3560_v53, %v876_v37  ;;  %v3700_v7 = vadd.f32 %v3542_v28, %v1643_v24  ;;  %v4244_v50 = vld [vmem:[#allocation16_spill] sm:$0xff] }
 0x345   :  { %v1832_v54 = vrot.slane %v1831_v9, 2  ;;  %v1882_v35 = vrot.slane %v1881_v16, 2  ;;  %v1780_v47 = vrot.slane %v1779_v26, 4  ;;  %v1930_v56 = vrot.slane %v1929_v8, 4  ;;  %1527 = vbcast.lane.b32.xlu1 %v2723_v4, 316  ;;  %v936_v39 = vpop.permute.xlu0 %935 }
 0x346   :  { %v1722_v60 = vsel %vm152_vm5, %v3498_v29, %v1638_v51  ;;  %v1972_v10 = vsel %vm152_vm5, %v1638_v51, %v3498_v29  ;;  %v868_v48 = vpop.permute.xlu1 %867  ;;  %v2024_v11 = vmul.f32 %v2018_v46, %v3556_v2  ;;  %v1141_v30 = vmul.f32 %v3604_v31, %v936_v39 }
 0x347   :  { %v1781_v17 = vadd.f32 %v1780_v47, %v1779_v26  ;;  %v1931_v23 = vadd.f32 %v1930_v56, %v1929_v8  ;;  %v1728_v37 = vmul.f32 %v4244_v50, %v1722_v60  ;;  %v1978_v28 = vmul.f32 %v3556_v2, %v1972_v10 }
 0x348   :  { %v1130_v4 = vmul.f32 %v3467_v49, %v868_v48  ;;  %v1698_v38 = vmul.f32 %v3522_v40, %v3700_v7  ;;  %v3716_v21 = vadd.f32 %v2024_v11, %v2020_v6  ;;  %v804_v2 = vcombine.high %v3430_v45, %v3430_v45 }
 0x349   :  { %v1782_v29 = vrot.slane %v1781_v17, 2  ;;  %v1932_v55 = vrot.slane %v1931_v23, 2  ;;  %v1729_v24 = vadd.f32 %v1728_v37, %v3531_v59  ;;  %v1979_v46 = vadd.f32 %v1978_v28, %v3546_v36  ;;  %1535 = vbcast.lane.b32.xlu1 %v2720_v3, 316  ;;  %v1172_v8 = vpop.permute.xlu0 %1171 }
 0x34a   :  { %v952_v26 = vpop.permute.xlu1 %951  ;;  %v1833_v34 = vadd.f32 %v1832_v54, %v1831_v9  ;;  %v1883_v51 = vadd.f32 %v1882_v35, %v1881_v16  ;;  %v1291_v6 = vmul.f32 %v1172_v8, %v3560_v53  ;;  %v3734_v28 = vrot.slane %v804_v2, %v2587_v33 }
 0x34b   :  { %v1730_v47 = vrot.slane %v1729_v24, 4  ;;  %v1980_v56 = vrot.slane %v1979_v46, 4  ;;  %v1144_v40 = vmul.f32 %v3512_v22, %v952_v26  ;;  %v1933_v10 = vadd.f32 %v1932_v55, %v1931_v23 }
 0x34c   :  { %v1834_v60 = vrot.slane %v1833_v34, 1  ;;  %v1783_v59 = vadd.f32 %v1782_v29, %v1781_v17  ;;  %v1884_v48 = vrot.slane %v1883_v51, 1  ;;  %v1323_v3 = vsel %vm161_vm1, %v1131_v0, %v1291_v6 }
 0x34d   :  { %v1731_v36 = vadd.f32 %v1730_v47, %v1729_v24  ;;  %v1981_v39 = vadd.f32 %v1980_v56, %v1979_v46  ;;  %1543 = vbcast.lane.b32.xlu1 %v4190_v12, 316  ;;  %v1212_v9 = vpop.permute.xlu0 %1211  ;;  %v1934_v54 = vrot.slane %v1933_v10, 1 }
 0x34e   :  { %v1168_v45 = vpop.permute.xlu1 %1167  ;;  %v3727_v16 = vadd.f32 %v1834_v60, %v1833_v34  ;;  %v1784_v35 = vrot.slane %v1783_v59, 1  ;;  %v3729_v11 = vadd.f32 %v1884_v48, %v1883_v51  ;;  %v1301_v23 = vmul.f32 %v1212_v9, %v3604_v31 }
 0x34f   :  { %v1732_v50 = vrot.slane %v1731_v36, 2  ;;  %v1982_v37 = vrot.slane %v1981_v39, 2  ;;  %v1290_v17 = vmul.f32 %v1168_v45, %v3467_v49  ;;  %v3738_v12 = vadd.f32 %v1934_v54, %v1933_v10 }
 0x350   :  { %1836 = vst.msk [vmem:[#allocation2 + $0xb] sm:$0x1] %vm1660_vm4, %v3727_v16  ;;  %v3740_v0 = vadd.f32 %v1784_v35, %v1783_v59  ;;  %1886 = vst.msk [vmem:[#allocation2 + $0xc] sm:$0x1] %vm1660_vm4, %v3729_v11  ;;  %v1333_v55 = vsel %vm161_vm1, %v1141_v30, %v1301_v23  ;;  %v1648_v51 = vmul.f32 0.0, %v3528_v25  ;;  %v1072_v60 = vrot.slane %v3470_v42, %v2587_v33 }
 0x351   :  { %v1322_v29 = vsel %vm161_vm1, %v1130_v4, %v1290_v17  ;;  %v1733_v49 = vadd.f32 %v1732_v50, %v1731_v36  ;;  %v1983_v24 = vadd.f32 %v1982_v37, %v1981_v39  ;;  %1607 = vbcast.lane.b32.xlu1 %v4236_v1, 316  ;;  %v1694_v46 = vsel %vm152_vm5, %v1323_v3, %v1333_v55  ;;  %v888_v2 = vpop.permute.xlu0 %887 }
 0x352   :  { %v3751_v26 = vsel %vm152_vm5, %v1333_v55, %v1323_v3  ;;  %v1224_v8 = vpop.permute.xlu1 %1223  ;;  %1936 = vst.msk [vmem:[#allocation2 + $0xd] sm:$0x1] %vm1660_vm4, %v3738_v12  ;;  %1786 = vst.msk [vmem:[#allocation2 + $0xa] sm:$0x1] %vm1660_vm4, %v3740_v0  ;;  %v3757_v4 = vadd.f32 %v1698_v38, %v1694_v46  ;;  %v1133_v1 = vmul.f32 %v3734_v28, %v888_v2 }
 0x353   :  { %v1304_v30 = vmul.f32 %v1224_v8, %v3512_v22  ;;  %v1734_v34 = vrot.slane %v1733_v49, 1  ;;  %v1984_v47 = vrot.slane %v1983_v24, 1 }
 0x354   :  { %v1748_v10 = vmul.f32 %v3566_v14, %v3757_v4 }
 0x355   :  { %v1336_v56 = vsel %vm161_vm1, %v1144_v40, %v1304_v30  ;;  %v1735_v6 = vadd.f32 %v1734_v34, %v1733_v49  ;;  %v924_v48 = vpop.permute.xlu0 %923  ;;  %v3773_v25 = vadd.f32 %v1984_v47, %v1983_v24 }
 0x356   :  { %v1644_v38 = vsel %vm152_vm5, %v1322_v29, %v1336_v56  ;;  %v3771_v22 = vsel %vm152_vm5, %v1336_v56, %v1322_v29  ;;  %v880_v59 = vpop.permute.xlu1 %879  ;;  %v1139_v14 = vmul.f32 %v1072_v60, %v924_v48  ;;  %v806_v56 = vcombine.high %v3536_v62, %v3536_v62 }
 0x357   :  { %v3775_v36 = vadd.f32 %v1648_v51, %v1644_v38  ;;  %1736 = vst.msk [vmem:[#allocation2 + $0x9] sm:$0x1] %vm1660_vm4, %v1735_v6  ;;  %1738 = vrot.lane.b32.xlu1 %v1735_v6, %s2460_s11  ;;  %v1132_v42 = vmul.f32 %v3560_v53, %v880_v59  ;;  %1986 = vst.msk [vmem:[#allocation2 + $0xe] sm:$0x1] %vm1660_vm4, %v3773_v25  ;;  %v1068_v48 = vrot.slane %v3509_v57, %v2587_v33 }
 0x358   :  { %v1064_v38 = vrot.slane %v806_v56, %v2587_v33 }
 0x359   :  { %v1699_v40 = vmul.f32 %v3572_v43, %v3775_v36  ;;  %v1180_v3 = vpop.permute.xlu0 %1179 }
 0x35a   :  { %v940_v39 = vpop.permute.xlu1 %939  ;;  %v1293_v9 = vmul.f32 %v1180_v3, %v3734_v28 }
 0x35b   :  { %v1142_v45 = vmul.f32 %v3604_v31, %v940_v39 }
 0x35c   :  { %v1325_v54 = vsel %vm161_vm1, %v1133_v1, %v1293_v9 }
 0x35d   :  { %v1204_v50 = vpop.permute.xlu0 %1203 }
 0x35e   :  { %v1176_v35 = vpop.permute.xlu1 %1175  ;;  %v1299_v17 = vmul.f32 %v1204_v50, %v1072_v60 }
 0x35f   :  { %v1292_v37 = vmul.f32 %v1176_v35, %v3560_v53 }
 0x360   :  { %v1331_v29 = vsel %vm161_vm1, %v1139_v14, %v1299_v17 }
 0x361   :  { %v1324_v23 = vsel %vm161_vm1, %v1132_v42, %v1292_v37  ;;  %v1744_v43 = vsel %vm152_vm5, %v1325_v54, %v1331_v29  ;;  %v1894_v55 = vsel %vm152_vm5, %v1331_v29, %v1325_v54  ;;  %v900_v24 = vpop.permute.xlu0 %899 }
 0x362   :  { %v1216_v49 = vpop.permute.xlu1 %1215  ;;  %v3794_v46 = vadd.f32 %v1748_v10, %v1744_v43  ;;  %v1135_v39 = vmul.f32 %v1064_v38, %v900_v24 }
 0x363   :  { %v1302_v8 = vmul.f32 %v1216_v49, %v3604_v31 }
 0x364   :  { %v1798_v53 = vmul.f32 %v3585_v20, %v3794_v46 }
 0x365   :  { %v1334_v2 = vsel %vm161_vm1, %v1142_v45, %v1302_v8  ;;  %v912_v51 = vpop.permute.xlu0 %911 }
 0x366   :  { %v1695_v30 = vsel %vm152_vm5, %v1324_v23, %v1334_v2  ;;  %v3804_v1 = vsel %vm152_vm5, %v1334_v2, %v1324_v23  ;;  %v892_v34 = vpop.permute.xlu1 %891  ;;  %v1137_v3 = vmul.f32 %v1068_v48, %v912_v51 }
 0x367   :  { %v3806_v47 = vadd.f32 %v1699_v40, %v1695_v30  ;;  %v1134_v31 = vmul.f32 %v3734_v28, %v892_v34 }
 0x369   :  { %v1749_v6 = vmul.f32 %v3579_v61, %v3806_v47  ;;  %v1188_v10 = vpop.permute.xlu0 %1187 }
 0x36a   :  { %v928_v20 = vpop.permute.xlu1 %927  ;;  %v1295_v42 = vmul.f32 %v1188_v10, %v1064_v38 }
 0x36b   :  { %v1140_v59 = vmul.f32 %v1072_v60, %v928_v20 }
 0x36c   :  { %v1327_v9 = vsel %vm161_vm1, %v1135_v39, %v1295_v42 }
 0x36d   :  { %v1196_v40 = vpop.permute.xlu0 %1195 }
 0x36e   :  { %v1184_v14 = vpop.permute.xlu1 %1183  ;;  %v1297_v45 = vmul.f32 %v1196_v40, %v1068_v48 }
 0x36f   :  { %v1294_v62 = vmul.f32 %v1184_v14, %v3734_v28 }
 0x370   :  { %v1329_v54 = vsel %vm161_vm1, %v1137_v3, %v1297_v45 }
 0x371   :  { %v1326_v61 = vsel %vm161_vm1, %v1134_v31, %v1294_v62  ;;  %v1794_v35 = vsel %vm152_vm5, %v1327_v9, %v1329_v54  ;;  %v3822_v37 = vpop.permute.xlu0 %1355  ;;  %v1844_v23 = vsel %vm152_vm5, %v1329_v54, %v1327_v9 }
 0x372   :  { %v1208_v50 = vpop.permute.xlu1 %1207  ;;  %v3824_v57 = vadd.f32 %v1798_v53, %v1794_v35 }
 0x373   :  { %v1300_v33 = vmul.f32 %v1208_v50, %v1072_v60 }
 0x374   :  { %v1848_v28 = vmul.f32 %v3591_v5, %v3824_v57 }
 0x375   :  { %v1332_v17 = vsel %vm161_vm1, %v1140_v59, %v1300_v33  ;;  %v3835_v24 = vpop.permute.xlu0 %1363 }
 0x376   :  { %v1745_v29 = vsel %vm152_vm5, %v1326_v61, %v1332_v17  ;;  %v1895_v43 = vsel %vm152_vm5, %v1332_v17, %v1326_v61  ;;  %v904_v49 = vpop.permute.xlu1 %903  ;;  %v3839_v8 = vadd.f32 %v1848_v28, %v1844_v23 }
 0x377   :  { %v3837_v60 = vadd.f32 %v1749_v6, %v1745_v29  ;;  %v1136_v42 = vmul.f32 %v1064_v38, %v904_v49 }
 0x378   :  { %v1898_v2 = vmul.f32 %v3597_v18, %v3839_v8 }
 0x379   :  { %v1799_v5 = vmul.f32 %v3638_v15, %v3837_v60  ;;  %v1372_v30 = vpop.permute.xlu0 %1371 }
 0x37a   :  { %v916_v53 = vpop.permute.xlu1 %915  ;;  %v3845_v34 = vadd.f32 %v1898_v2, %v1894_v55 }
 0x37b   :  { %v1138_v15 = vmul.f32 %v1068_v48, %v916_v53 }
 0x37c   :  { %v1948_v51 = vmul.f32 %v3610_v44, %v3845_v34 }
 0x37d   :  { %v1380_v31 = vpop.permute.xlu0 %1379 }
 0x37e   :  { %v1192_v56 = vpop.permute.xlu1 %1191  ;;  %v3850_v6 = vadd.f32 %v1948_v51, %v3751_v26 }
 0x37f   :  { %v1296_v20 = vmul.f32 %v1192_v56, %v1064_v38 }
 0x380   :  { %v1998_v10 = vmul.f32 %v3620_v19, %v3850_v6 }
 0x381   :  { %v1388_v59 = vpop.permute.xlu0 %1387  ;;  %v1328_v40 = vsel %vm161_vm1, %v1136_v42, %v1296_v20 }
 0x382   :  { %v1200_v18 = vpop.permute.xlu1 %1199  ;;  %v3855_v55 = vadd.f32 %v1998_v10, %v3694_v58 }
 0x383   :  { %v1298_v14 = vmul.f32 %v1200_v18, %v1068_v48 }
 0x385   :  { %v1330_v44 = vsel %vm161_vm1, %v1138_v15, %v1298_v14  ;;  %v1396_v3 = vpop.permute.xlu0 %1395  ;;  %v4245_v14 = vld [vmem:[#allocation51_spill] sm:$0xff] }
 0x386   :  { %v1795_v26 = vsel %vm152_vm5, %v1328_v40, %v1330_v44  ;;  %v1360_v39 = vpop.permute.xlu1 %1359  ;;  %v1845_v38 = vsel %vm152_vm5, %v1330_v44, %v1328_v40  ;;  %v4246_v40 = vld [vmem:[#allocation23_spill] sm:$0xff] }
 0x387   :  { %v1801_v62 = vadd.f32 %v1799_v5, %v1795_v26  ;;  %v1625_v44 = vsel %vm161_vm1, %v4246_v40, %v4245_v14  ;;  %v4249_v14 = vld [vmem:[#allocation48_spill] sm:$0xff] }
 0x389   :  { %v1849_v19 = vmul.f32 %v3644_v52, %v1801_v62  ;;  %v1404_v48 = vpop.permute.xlu0 %1403 }
 0x38a   :  { %v3864_v45 = vpop.permute.xlu1 %1367 }
 0x38b   :  { %v1851_v58 = vadd.f32 %v1849_v19, %v1845_v38 }
 0x38d   :  { %v1899_v9 = vmul.f32 %v3650_v13, %v1851_v58  ;;  %v1412_v54 = vpop.permute.xlu0 %1411 }
 0x38e   :  { %v1376_v61 = vpop.permute.xlu1 %1375 }
 0x38f   :  { %v3867_v35 = vadd.f32 %v1899_v9, %v1895_v43  ;;  %v4247_v9 = vld [vmem:[#allocation17_spill] sm:$0xff] }
 0x391   :  { %v1949_v50 = vmul.f32 %v3668_v41, %v3867_v35  ;;  %v1484_v17 = vpop.permute.xlu0 %1483 }
 0x392   :  { %v1384_v33 = vpop.permute.xlu1 %1383 }
 0x393   :  { %v3872_v52 = vadd.f32 %v1949_v50, %v3804_v1 }
 0x395   :  { %v1999_v28 = vmul.f32 %v3678_v27, %v3872_v52  ;;  %v1492_v29 = vpop.permute.xlu0 %1491 }
 0x396   :  { %v1392_v23 = vpop.permute.xlu1 %1391 }
 0x397   :  { %v3877_v49 = vadd.f32 %v1999_v28, %v3771_v22 }
 0x399   :  { %v1500_v2 = vpop.permute.xlu0 %1499 }
 0x39a   :  { %v1400_v13 = vpop.permute.xlu1 %1399  ;;  %v1613_v26 = vsel %vm161_vm1, %v1372_v30, %v1500_v2 }
 0x39d   :  { %v1508_v5 = vpop.permute.xlu0 %1507 }
 0x39e   :  { %v3879_v43 = vpop.permute.xlu1 %1407  ;;  %v1615_v15 = vsel %vm161_vm1, %v1380_v31, %v1508_v5  ;;  %v1609_v31 = vsel %vm161_vm1, %v3822_v37, %v1484_v17 }
 0x3a1   :  { %v1516_v41 = vpop.permute.xlu0 %1515 }
 0x3a2   :  { %v3881_v53 = vpop.permute.xlu1 %1415  ;;  %v1617_v27 = vsel %vm161_vm1, %v1388_v59, %v1516_v41  ;;  %v4248_v59 = vld [vmem:[#allocation39_spill] sm:$0xff] }
 0x3a3   :  { %v1796_v19 = vsel %vm152_vm5, %v1615_v15, %v1617_v27  ;;  %v1846_v38 = vsel %vm152_vm5, %v1617_v27, %v1615_v15  ;;  %v3897_v50 = vsel %vm161_vm1, %v4248_v59, %v4247_v9 }
 0x3a4   :  { %v1802_v27 = vmul.f32 %v3824_v57, %v1796_v19  ;;  %v1852_v37 = vmul.f32 %v3839_v8, %v1846_v38 }
 0x3a5   :  { %v1524_v56 = vpop.permute.xlu0 %1523 }
 0x3a6   :  { %v1488_v51 = vpop.permute.xlu1 %1487  ;;  %v1619_v22 = vsel %vm161_vm1, %v1396_v3, %v1524_v56  ;;  %v1611_v3 = vsel %vm161_vm1, %v3835_v24, %v1492_v29 }
 0x3a7   :  { %v1746_v30 = vsel %vm152_vm5, %v1613_v26, %v1619_v22  ;;  %v1896_v2 = vsel %vm152_vm5, %v1619_v22, %v1613_v26  ;;  %v1610_v15 = vsel %vm161_vm1, %v1360_v39, %v1488_v51 }
 0x3a9   :  { %v1532_v20 = vpop.permute.xlu0 %1531 }
 0x3aa   :  { %v1496_v1 = vpop.permute.xlu1 %1495  ;;  %v1621_v5 = vsel %vm161_vm1, %v1404_v48, %v1532_v20 }
 0x3ab   :  { %v1696_v57 = vsel %vm152_vm5, %v1611_v3, %v1621_v5 }
 0x3ad   :  { %v1540_v18 = vpop.permute.xlu0 %1539 }
 0x3ae   :  { %v1504_v10 = vpop.permute.xlu1 %1503  ;;  %v1623_v22 = vsel %vm161_vm1, %v1412_v54, %v1540_v18  ;;  %v1702_v18 = vmul.f32 %v3757_v4, %v1696_v57 }
 0x3af   :  { %v1614_v8 = vsel %vm161_vm1, %v1376_v61, %v1504_v10  ;;  %v1996_v38 = vsel %vm152_vm5, %v1623_v22, %v1609_v31 }
 0x3b1   :  { %v1604_v17 = vpop.permute.xlu0 %1603 }
 0x3b2   :  { %v1512_v42 = vpop.permute.xlu1 %1511  ;;  %v1639_v40 = vsel %vm161_vm1, %v4249_v14, %v1604_v17 }
 0x3b3   :  { %v1616_v41 = vsel %vm161_vm1, %v1384_v33, %v1512_v42  ;;  %v1752_v33 = vmul.f32 %v3794_v46, %v1746_v30  ;;  %v1645_v46 = vsel %vm152_vm5, %v1609_v31, %v1623_v22  ;;  %v1671_v9 = vsel %vm152_vm5, %v1625_v44, %v1639_v40 }
 0x3b6   :  { %v1520_v28 = vpop.permute.xlu1 %1519 }
 0x3b7   :  { %v1618_v56 = vsel %vm161_vm1, %v1392_v23, %v1520_v28  ;;  %v1902_v23 = vmul.f32 %v3845_v34, %v1896_v2 }
 0x3b8   :  { %v1797_v24 = vsel %vm152_vm5, %v1616_v41, %v1618_v56  ;;  %v1847_v29 = vsel %vm152_vm5, %v1618_v56, %v1616_v41  ;;  %v2002_v56 = vmul.f32 %v3855_v55, %v1996_v38 }
 0x3b9   :  { %v1803_v48 = vmul.f32 %v1801_v62, %v1797_v24  ;;  %v1853_v20 = vmul.f32 %v1851_v58, %v1847_v29  ;;  %v1946_v62 = vsel %vm152_vm5, %v1621_v5, %v1611_v3 }
 0x3ba   :  { %v1528_v42 = vpop.permute.xlu1 %1527 }
 0x3bb   :  { %v1804_v26 = vadd.f32 %v1803_v48, %v1802_v27  ;;  %v1854_v19 = vadd.f32 %v1853_v20, %v1852_v37  ;;  %v1620_v39 = vsel %vm161_vm1, %v1400_v13, %v1528_v42  ;;  %v1612_v13 = vsel %vm161_vm1, %v3864_v45, %v1496_v1  ;;  %v4250_v27 = vld [vmem:[#allocation49_spill] sm:$0xff] }
 0x3bc   :  { %v1747_v34 = vsel %vm152_vm5, %v1614_v8, %v1620_v39  ;;  %v1897_v58 = vsel %vm152_vm5, %v1620_v39, %v1614_v8  ;;  %v2021_v45 = vsel %vm152_vm5, %v1639_v40, %v1625_v44  ;;  %v1677_v37 = vmul.f32 %v4250_v27, %v1671_v9  ;;  %v4251_v39 = vld [vmem:[#allocation15_spill] sm:$0xff] }
 0x3bd   :  { %v1805_v61 = vrot.slane %v1804_v26, 4  ;;  %v1855_v54 = vrot.slane %v1854_v19, 4  ;;  %v1753_v51 = vmul.f32 %v3837_v60, %v1747_v34  ;;  %v1903_v10 = vmul.f32 %v3867_v35, %v1897_v58 }
 0x3be   :  { %v1536_v59 = vpop.permute.xlu1 %1535  ;;  %v1952_v60 = vmul.f32 %v3850_v6, %v1946_v62  ;;  %v1651_v35 = vmul.f32 %v3700_v7, %v1645_v46  ;;  %v2027_v22 = vmul.f32 %v3662_v63, %v2021_v45 }
 0x3bf   :  { %v1806_v3 = vadd.f32 %v1805_v61, %v1804_v26  ;;  %v1856_v30 = vadd.f32 %v1855_v54, %v1854_v19  ;;  %v1754_v28 = vadd.f32 %v1753_v51, %v1752_v33  ;;  %v1904_v2 = vadd.f32 %v1903_v10, %v1902_v23 }
 0x3c0   :  { %v1622_v4 = vsel %vm161_vm1, %v3879_v43, %v1536_v59 }
 0x3c1   :  { %v1807_v1 = vrot.slane %v1806_v3, 2  ;;  %v1857_v31 = vrot.slane %v1856_v30, 2  ;;  %v1755_v5 = vrot.slane %v1754_v28, 4  ;;  %v1905_v41 = vrot.slane %v1904_v2, 4 }
 0x3c2   :  { %v1697_v17 = vsel %vm152_vm5, %v1612_v13, %v1622_v4  ;;  %v1947_v7 = vsel %vm152_vm5, %v1622_v4, %v1612_v13  ;;  %v1544_v6 = vpop.permute.xlu1 %1543 }
 0x3c3   :  { %v1756_v24 = vadd.f32 %v1755_v5, %v1754_v28  ;;  %v1906_v44 = vadd.f32 %v1905_v41, %v1904_v2  ;;  %v1703_v29 = vmul.f32 %v3806_v47, %v1697_v17  ;;  %v1953_v43 = vmul.f32 %v3872_v52, %v1947_v7 }
 0x3c4   :  { %v1624_v55 = vsel %vm161_vm1, %v3881_v53, %v1544_v6  ;;  %v1808_v48 = vadd.f32 %v1807_v1, %v1806_v3  ;;  %v1858_v20 = vadd.f32 %v1857_v31, %v1856_v30  ;;  %v4252_v30 = vld [vmem:[#allocation53_spill] sm:$0xff] }
 0x3c5   :  { %v1757_v33 = vrot.slane %v1756_v24, 2  ;;  %v1907_v23 = vrot.slane %v1906_v44, 2  ;;  %v1704_v57 = vadd.f32 %v1703_v29, %v1702_v18  ;;  %v1954_v8 = vadd.f32 %v1953_v43, %v1952_v60 }
 0x3c6   :  { %v1646_v42 = vsel %vm152_vm5, %v1610_v15, %v1624_v55  ;;  %v1997_v14 = vsel %vm152_vm5, %v1624_v55, %v1610_v15  ;;  %v1608_v47 = vpop.permute.xlu1 %1607  ;;  %v1809_v40 = vrot.slane %v1808_v48, 1  ;;  %v1859_v52 = vrot.slane %v1858_v20, 1 }
 0x3c7   :  { %v1705_v26 = vrot.slane %v1704_v57, 4  ;;  %v1955_v63 = vrot.slane %v1954_v8, 4  ;;  %v1652_v19 = vmul.f32 %v3775_v36, %v1646_v42  ;;  %v2003_v53 = vmul.f32 %v3877_v49, %v1997_v14 }
 0x3c8   :  { %v1640_v62 = vsel %vm161_vm1, %v4251_v39, %v1608_v47  ;;  %v3968_v46 = vadd.f32 %v1809_v40, %v1808_v48  ;;  %v1908_v34 = vadd.f32 %v1907_v23, %v1906_v44  ;;  %v1758_v58 = vadd.f32 %v1757_v33, %v1756_v24  ;;  %v4253_v33 = vld [vmem:[#allocation6_spill] sm:$0xff]  ;;  %v2230_v39 = vld [vmem:[%s4095_s1 + $0x28] ss:$0 sm:$0xff] }
 0x3c9   :  { %v1706_v61 = vadd.f32 %v1705_v26, %v1704_v57  ;;  %v1956_v54 = vadd.f32 %v1955_v63, %v1954_v8  ;;  %v1653_v51 = vadd.f32 %v1652_v19, %v1651_v35  ;;  %v2004_v15 = vadd.f32 %v2003_v53, %v2002_v56  ;;  %v38_v53 = vld [vmem:[%s4097_s3 + $0x38] sm:$0xff] }
 0x3ca   :  { %v1672_v10 = vsel %vm152_vm5, %v3897_v50, %v1640_v62  ;;  %v2022_v36 = vsel %vm152_vm5, %v1640_v62, %v3897_v50  ;;  %v1739_v49 = vpop.permute.xlu1 %1738  ;;  %1811 = vst.msk [vmem:[#allocation2 + $0x3] sm:$0x1] %vm1660_vm4, %v3968_v46  ;;  %v1909_v13 = vrot.slane %v1908_v34, 1  ;;  %v1759_v18 = vrot.slane %v1758_v58, 1  ;;  %2315 = vmatprep.subr.mxu0 %v38_v53  ;;  %v36_v62 = vld [vmem:[%s4097_s3 + $0x28] sm:$0xff] }
 0x3cb   :  { %v1707_v38 = vrot.slane %v1706_v61, 2  ;;  %v1957_v9 = vrot.slane %v1956_v54, 2  ;;  %v1654_v59 = vrot.slane %v1653_v51, 4  ;;  %v2005_v3 = vrot.slane %v2004_v15, 4  ;;  %1741 = vst.msk [vmem:[#allocation2 + $0x1e] sm:$0x1] %vm1660_vm4, %v1739_v49  ;;  %2316 = vmatpush3.msra.mxu0 %v38_v53 }
 0x3cc   :  { %v1678_v28 = vmul.f32 %v4252_v30, %v1672_v10  ;;  %v2028_v2 = vmul.f32 %v3716_v21, %v2022_v36  ;;  %v1910_v60 = vadd.f32 %v1909_v13, %v1908_v34  ;;  %v1760_v35 = vadd.f32 %v1759_v18, %v1758_v58  ;;  %v4255_v34 = vld [vmem:[#allocation9_spill] sm:$0xff]  ;;  %v31_v36 = vld [vmem:[%s4097_s3] sm:$0xff] }
 0x3cd   :  { %v1655_v32 = vadd.f32 %v1654_v59, %v1653_v51  ;;  %v2006_v50 = vadd.f32 %v2005_v3, %v2004_v15  ;;  %v1708_v45 = vadd.f32 %v1707_v38, %v1706_v61  ;;  %v3981_v4 = vadd.f32 %v1859_v52, %v1858_v20  ;;  %v35_v61 = vld [vmem:[%s4097_s3 + $0x20] sm:$0xff]  ;;  %v33_v15 = vld [vmem:[%s4097_s3 + $0x10] sm:$0xff]  ;;  %v32_v10 = vld [vmem:[%s4097_s3 + $0x8] sm:$0xff] }
 0x3ce   :  { %v1679_v1 = vadd.f32 %v1678_v28, %v1677_v37  ;;  %v2029_v31 = vadd.f32 %v2028_v2, %v2027_v22  ;;  %1911 = vst.msk [vmem:[#allocation2 + $0x5] sm:$0x1] %vm1660_vm4, %v1910_v60  ;;  %1761 = vst.msk [vmem:[#allocation2 + $0x2] sm:$0x1] %vm1660_vm4, %v1760_v35  ;;  %v1958_v5 = vadd.f32 %v1957_v9, %v1956_v54  ;;  %v2067_v23 = vmul.f32 0.5, %v4253_v33  ;;  %v34_v54 = vld [vmem:[%s4097_s3 + $0x18] sm:$0xff] }
 0x3cf   :  { %v1656_v41 = vrot.slane %v1655_v32, 2  ;;  %v2007_v56 = vrot.slane %v2006_v50, 2  ;;  %v1709_v27 = vrot.slane %v1708_v45, 1  ;;  %1861 = vst.msk [vmem:[#allocation2 + $0x4] sm:$0x1] %vm1660_vm4, %v3981_v4  ;;  %v4025_v58 = vmul.f32 %v2230_v39, %v4255_v34  ;;  %v4256_v18 = vld [vmem:[#allocation8_spill] sm:$0xff] }
 0x3d0   :  { %v1680_v21 = vrot.slane %v1679_v1, 4  ;;  %v2030_v17 = vrot.slane %v2029_v31, 4  ;;  %v1959_v7 = vrot.slane %v1958_v5, 1  ;;  %2428 = vtanh.f32 %v2067_v23 }
 0x3d1   :  { %v1710_v6 = vadd.f32 %v1709_v27, %v1708_v45  ;;  %v1657_v24 = vadd.f32 %v1656_v41, %v1655_v32  ;;  %v2008_v44 = vadd.f32 %v2007_v56, %v2006_v50  ;;  %v2050_v38 = vmul.f32 %v2230_v39, %v4256_v18 }
 0x3d2   :  { %v1681_v29 = vadd.f32 %v1680_v21, %v1679_v1  ;;  %v2031_v37 = vadd.f32 %v2030_v17, %v2029_v31  ;;  %v1960_v43 = vadd.f32 %v1959_v7, %v1958_v5  ;;  %vm4257_vm5 = vcmask 261120  }
 0x3d3   :  { %1713 = vrot.lane.b32.xlu1 %v1710_v6, %s2460_s11  ;;  %1711 = vst.msk [vmem:[#allocation2 + $0x1] sm:$0x1] %vm1660_vm4, %v1710_v6  ;;  %v1658_v22 = vrot.slane %v1657_v24, 1  ;;  %v2009_v55 = vrot.slane %v2008_v44, 1  ;;  %vm4258_vm10 = vmmov %vm4257_vm5 }
 0x3d4   :  { %v1682_v48 = vrot.slane %v1681_v29, 2  ;;  %v2032_v20 = vrot.slane %v2031_v37, 2  ;;  %1961 = vst.msk [vmem:[#allocation2 + $0x6] sm:$0x1] %vm1660_vm4, %v1960_v43  ;;  %vm4259_vm11 = vmmov %vm4257_vm5 }
 0x3d5   :  { %v1659_v57 = vadd.f32 %v1658_v22, %v1657_v24  ;;  %v2010_v8 = vadd.f32 %v2009_v55, %v2008_v44 }
 0x3d6   :  { %v1683_v42 = vadd.f32 %v1682_v48, %v1681_v29  ;;  %v2033_v14 = vadd.f32 %v2032_v20, %v2031_v37 }
 0x3d7   :  { %1838 = vrot.lane.b32.xlu1 %v3727_v16, %s2460_s11  ;;  %1661 = vst.msk [vmem:[#allocation2] sm:$0x1] %vm1660_vm4, %v1659_v57  ;;  %2011 = vst.msk [vmem:[#allocation2 + $0x7] sm:$0x1] %vm1660_vm4, %v2010_v8  ;;  %v4254_v16 = vld [vmem:[#allocation7_spill] sm:$0xff] }
 0x3d8   :  { %v1684_v47 = vrot.slane %v1683_v42, 1  ;;  %v2034_v40 = vrot.slane %v2033_v14, 1  ;;  %v2066_v63 = vmul.f32 0.5, %v4254_v16 }
 0x3da   :  { %v1685_v52 = vadd.f32 %v1684_v47, %v1683_v42  ;;  %v2035_v26 = vadd.f32 %v2034_v40, %v2033_v14  ;;  %2430 = vtanh.f32 %v2066_v63 }
 0x3db   :  { %1813 = vrot.lane.b32.xlu1 %v3968_v46, %s2460_s11 }
 0x3dc   :  { %1688 = vrot.lane.b32.xlu0 %v1685_v52, %s2460_s11  ;;  %1686 = vst.msk [vmem:[#allocation2 + $0x8] sm:$0x1] %vm1660_vm4, %v1685_v52  ;;  %2036 = vst.msk [vmem:[#allocation2 + $0xf] sm:$0x1] %vm1660_vm4, %v2035_v26 }
 0x3dd   :  { %v2429_v19 = vpop.eup %2428 }
 0x3de   :  { %v2042_v41 = vld [vmem:[#allocation2] sm:$0xff] }
 0x3df   :  { %1938 = vrot.lane.b32.xlu1 %v3738_v12, %s2460_s11  ;;  %v2071_v12 = vadd.f32 1.0, %v2429_v19  ;;  %v2052_v17 = vadd.f32 %v2050_v38, %v2042_v41 }
 0x3e0   :  { %1663 = vrot.lane.b32.xlu0 %v1659_v57, %s2460_s11 }
 0x3e1   :  { %v2073_v46 = vmul.f32 0.5, %v2071_v12 }
 0x3e3   :  { %1913 = vrot.lane.b32.xlu1 %v1910_v60, %s2460_s11  ;;  %v2043_v6 = vld [vmem:[#allocation2 + $0x8] sm:$0xff] }
 0x3e4   :  { %1788 = vrot.lane.b32.xlu0 %v3740_v0, %s2460_s11  ;;  %v37_v0 = vld [vmem:[%s4097_s3 + $0x30] sm:$0xff] }
 0x3e5   :  { %2317 = vmatprep.subr.mxu0 %v37_v0 }
 0x3e6   :  { %2318 = vmatpush3.msra.mxu0 %v37_v0 }
 0x3e7   :  { %2013 = vrot.lane.b32.xlu1 %v2010_v8, %s2460_s11  ;;  %2319 = vmatprep.subr.mxu0 %v36_v62  ;;  %v2431_v51 = vpop.eup %2430 }
 0x3e8   :  { %1763 = vrot.lane.b32.xlu0 %v1760_v35, %s2460_s11  ;;  %2320 = vmatpush3.msra.mxu0 %v36_v62  ;;  %v2070_v49 = vadd.f32 1.0, %v2431_v51 }
 0x3e9   :  { %2321 = vmatprep.subr.mxu0 %v35_v61 }
 0x3ea   :  { %2322 = vmatpush3.msra.mxu0 %v35_v61  ;;  %v2072_v13 = vmul.f32 0.5, %v2070_v49  ;;  %v2233_v61 = vld [vmem:[%s4097_s3 + $0x40] ss:$0 sm:$0xff] }
 0x3eb   :  { %2038 = vrot.lane.b32.xlu1 %v2035_v26, %s2460_s11  ;;  %2323 = vmatprep.subr.mxu0 %v34_v54 }
 0x3ec   :  { %1888 = vrot.lane.b32.xlu0 %v3729_v11, %s2460_s11  ;;  %v2075_v11 = vmul.f32 %v4253_v33, %v2073_v46  ;;  %2324 = vmatpush3.msra.mxu0 %v34_v54  ;;  %v2074_v9 = vmul.f32 %v2072_v13, %v4254_v16 }
 0x3ed   :  { %2325 = vmatprep.subr.mxu0 %v33_v15 }
 0x3ee   :  { %2326 = vmatpush3.msra.mxu0 %v33_v15  ;;  %v2234_v15 = vld [vmem:[%s4097_s3 + $0x41] ss:$0 sm:$0xff]  ;;  %s2438_s3 = scalar_lea.vmem %s2216_s17, 256 }
 0x3ef   :  { %2058 = vrot.lane.b32.xlu1 %v4025_v58, %s2460_s11  ;;  %2327 = vmatprep.subr.mxu0 %v32_v10  ;;  %p2439_p0 = scmp.ne.s32.totalorder %s2216_s17, %s2438_s3  ;;  %p2444_p2 = scmp.lt.s32.totalorder %s2438_s3, %s2438_s3 }
 0x3f0   :  { %1863 = vrot.lane.b32.xlu0 %v3981_v4, %s2460_s11  ;;  %2328 = vmatpush3.msra.mxu0 %v32_v10 }
 0x3f1   :  { %2329 = vmatprep.subr.mxu0 %v31_v36  ;;  %p2445_p3 = por %p2444_p2, %p2443_p1 }
 0x3f2   :  { %2330 = vmatpush3.msra.mxu0 %v31_v36  ;;  %v2436_v36 = vld [vmem:[%s4094_s0] sm:$0xff] }
 0x3f3   :  { %2080 = vrot.lane.b32.xlu1 %v2075_v11, %s2460_s11  ;;  %p2446_p4 = pnand %p2445_p3, %p2439_p0 }
 0x3f4   :  { %1963 = vrot.lane.b32.xlu0 %v1960_v43, %s2460_s11  ;;  %v2053_v43 = vadd.f32 %v4025_v58, %v2043_v6 }
 0x3f8   :  { %1988 = vrot.lane.b32.xlu0 %v3773_v25, %s2460_s11 }
 0x3fc   :  { %2056 = vrot.lane.b32.xlu0 %v2050_v38, %s2460_s11  ;;  %v2437_v38 = vld [vmem:[%s4094_s0 + $0x8] sm:$0xff] }
 0x400   :  { %2078 = vrot.lane.b32.xlu0 %v2074_v9, %s2460_s11 }
 0x445   :  { %v1714_v59 = vpop.permute.xlu1 %1713 }
 0x446   :  { %1716 = vst.msk [vmem:[#allocation2 + $0x16] sm:$0x1] %vm1660_vm4, %v1714_v59 }
 0x449   :  { %v1839_v3 = vpop.permute.xlu1 %1838 }
 0x44a   :  { %1841 = vst.msk [vmem:[#allocation2 + $0x1c] sm:$0x1] %vm1660_vm4, %v1839_v3 }
 0x44d   :  { %v1814_v30 = vpop.permute.xlu1 %1813 }
 0x44e   :  { %1816 = vst.msk [vmem:[#allocation2 + $0x14] sm:$0x1] %vm1660_vm4, %v1814_v30  ;;  %v1689_v25 = vpop.permute.xlu0 %1688 }
 0x44f   :  { %1691 = vst.msk [vmem:[#allocation2 + $0x1f] sm:$0x1] %vm1660_vm4, %v1689_v25 }
 0x451   :  { %v1939_v28 = vpop.permute.xlu1 %1938 }
 0x452   :  { %1941 = vst.msk [vmem:[#allocation2 + $0x1a] sm:$0x1] %vm1660_vm4, %v1939_v28  ;;  %v1664_v2 = vpop.permute.xlu0 %1663 }
 0x453   :  { %1666 = vst.msk [vmem:[#allocation2 + $0x17] sm:$0x1] %vm1660_vm4, %v1664_v2 }
 0x455   :  { %v1914_v60 = vpop.permute.xlu1 %1913 }
 0x456   :  { %1916 = vst.msk [vmem:[#allocation2 + $0x12] sm:$0x1] %vm1660_vm4, %v1914_v60  ;;  %v1789_v35 = vpop.permute.xlu0 %1788 }
 0x457   :  { %1791 = vst.msk [vmem:[#allocation2 + $0x1d] sm:$0x1] %vm1660_vm4, %v1789_v35 }
 0x459   :  { %v2014_v32 = vpop.permute.xlu1 %2013 }
 0x45a   :  { %2016 = vst.msk [vmem:[#allocation2 + $0x10] sm:$0x1] %vm1660_vm4, %v2014_v32  ;;  %v1764_v50 = vpop.permute.xlu0 %1763 }
 0x45b   :  { %1766 = vst.msk [vmem:[#allocation2 + $0x15] sm:$0x1] %vm1660_vm4, %v1764_v50 }
 0x45d   :  { %v2039_v45 = vpop.permute.xlu1 %2038 }
 0x45e   :  { %2041 = vst.msk [vmem:[#allocation2 + $0x18] sm:$0x1] %vm1660_vm4, %v2039_v45  ;;  %v1889_v4 = vpop.permute.xlu0 %1888 }
 0x45f   :  { %1891 = vst.msk [vmem:[#allocation2 + $0x1b] sm:$0x1] %vm1660_vm4, %v1889_v4 }
 0x461   :  { %v2059_v7 = vpop.permute.xlu1 %2058 }
 0x462   :  { %v1864_v1 = vpop.permute.xlu0 %1863 }
 0x463   :  { %1866 = vst.msk [vmem:[#allocation2 + $0x13] sm:$0x1] %vm1660_vm4, %v1864_v1 }
 0x465   :  { %v2081_v48 = vpop.permute.xlu1 %2080 }
 0x466   :  { %v1964_v31 = vpop.permute.xlu0 %1963 }
 0x467   :  { %1966 = vst.msk [vmem:[#allocation2 + $0x11] sm:$0x1] %vm1660_vm4, %v1964_v31 }
 0x46a   :  { %v1989_v5 = vpop.permute.xlu0 %1988 }
 0x46b   :  { %1991 = vst.msk [vmem:[#allocation2 + $0x19] sm:$0x1] %vm1660_vm4, %v1989_v5 }
 0x46e   :  { %v2044_v56 = vld [vmem:[#allocation2 + $0x10] sm:$0xff]  ;;  %v2057_v27 = vpop.permute.xlu0 %2056 }
 0x46f   :  { %v2062_v21 = vadd.f32 %v2057_v27, %v2044_v56 }
 0x471   :  { %v2064_v24 = vadd.f32 %v2062_v21, %v2052_v17 }
 0x472   :  { %v2079_v44 = vpop.permute.xlu0 %2078  ;;  %v2045_v29 = vld [vmem:[#allocation2 + $0x18] sm:$0xff] }
 0x473   :  { %v2084_v37 = vmul.f32 %v2079_v44, %v2064_v24  ;;  %v2063_v22 = vadd.f32 %v2059_v7, %v2045_v29 }
 0x475   :  { %2331 = vmatprep.mubr.msk.f32.mxu0 %vm161_vm1, %v2084_v37  ;;  %v2065_v55 = vadd.f32 %v2063_v22, %v2053_v43 }
 0x477   :  { %v2085_v20 = vmul.f32 %v2081_v48, %v2065_v55 }
 0x479   :  { %2332 = vmatmul.mubr.msk.f32.vlgmr.msra.gmra.mxu0 %vm161_vm1, %v2085_v20  ;;  %vm4260_vm1 = vmmov %vm4257_vm5 }
 0x47a   :  { %vm4261_vm12 = vmmov %vm4260_vm1 }
 0x47b   :  { %vm4262_vm13 = vmmov %vm4260_vm1 }
 0x539   :  { %v2333_v33 = vpop.f32.mrf.mxu0 }
 0x53a   :  { %v2170_v23 = vsel %vm4257_vm5, %v2333_v33, 0.0 }
 0x53b   :  { %2171 = vadd.xlane.f32.xlu1 %v2170_v23  ;;  %v2158_v57 = vpop.f32.mrf.mxu0 }
 0x53c   :  { %v2167_v8 = vsel %vm4258_vm10, %v2158_v57, 0.0 }
 0x53d   :  { %2168 = vadd.xlane.f32.xlu0 %v2167_v8 }
 0x5c4   :  { %v2172_v42 = vpop.xlane.xlu1 %2171 }
 0x5c5   :  { %v2175_v14 = vmul.f32 0.03125, %v2172_v42 }
 0x5c6   :  { %v2169_v47 = vpop.xlane.xlu0 %2168 }
 0x5c7   :  { %v2174_v40 = vmul.f32 0.03125, %v2169_v47  ;;  %v2177_v52 = vsub.f32 %v2333_v33, %v2175_v14 }
 0x5c9   :  { %v2176_v26 = vsub.f32 %v2158_v57, %v2174_v40  ;;  %v2179_v19 = vmul.f32 %v2177_v52, %v2177_v52 }
 0x5cb   :  { %v2178_v16 = vmul.f32 %v2176_v26, %v2176_v26  ;;  %v2183_v53 = vsel %vm4260_vm1, %v2179_v19, 0.0 }
 0x5cd   :  { %v2180_v63 = vsel %vm4259_vm11, %v2178_v16, 0.0 }
 0x5ce   :  { %2181 = vadd.xlane.f32.xlu0 %v2180_v63 }
 0x5d2   :  { %2184 = vadd.xlane.f32.xlu0 %v2183_v53 }
 0x657   :  { %v2182_v12 = vpop.xlane.xlu0 %2181 }
 0x658   :  { %v2186_v39 = vmul.f32 0.03125, %v2182_v12 }
 0x65a   :  { %v2188_v0 = vadd.f32 1e-06, %v2186_v39 }
 0x65b   :  { %v2185_v62 = vpop.xlane.xlu0 %2184 }
 0x65c   :  { %2432 = vrsqrt.f32 %v2188_v0  ;;  %v2187_v46 = vmul.f32 0.03125, %v2185_v62 }
 0x65e   :  { %v2189_v34 = vadd.f32 1e-06, %v2187_v46 }
 0x660   :  { %2434 = vrsqrt.f32 %v2189_v34 }
 0x669   :  { %v2433_v58 = vpop.eup %2432 }
 0x66a   :  { %v2192_v54 = vmul.f32 %v2433_v58, %v2176_v26 }
 0x66c   :  { %v2198_v11 = vmul.f32 %v2233_v61, %v2192_v54 }
 0x66d   :  { %v2435_v51 = vpop.eup %2434 }
 0x66e   :  { %v2193_v10 = vmul.f32 %v2435_v51, %v2177_v52  ;;  %v2200_v49 = vadd.f32 %v2436_v36, %v2198_v11 }
 0x670   :  { %v2199_v13 = vmul.f32 %v2233_v61, %v2193_v10  ;;  %v2206_v18 = vadd.f32 %v2234_v15, %v2200_v49 }
 0x672   :  { %v2201_v9 = vadd.f32 %v2437_v38, %v2199_v13  ;;  %2208 = vst.msk [vmem:[#allocation3] sm:$0xff] %vm4261_vm12, %v2206_v18 }
 0x674   :  { %v2207_v59 = vadd.f32 %v2234_v15, %v2201_v9 }
 0x676   :  { %2209 = vst.msk [vmem:[#allocation3 + $0x8] sm:$0xff] %vm4262_vm13, %v2207_v59 }
 0x677   :  { %2449 = shalt.err (!%p2446_p4)
}
 0x678   :  { %s2467_s20 = smov 128   ;;  %s2468_s21 = smov 8  }
 0x679   :  { %2221 = dma.vmem_to_hbm [thread:$0]  %s2216_s17, 256, %s4098_s4, [#allocation4], %s2467_s20, %s2467_s20, %s2468_s21  }
 0x67a   :  { %2458 = dma.done.wait [#allocation4], 256  }
 0x67b   :  { %2459 = vsyncadd [#allocation4], 4294967040 }
 0x67c   :  { %2225 = vsyncpa [#allocation4], 1 }

</bundles_post_ra>
